<compile_context>
chip_gen: v6e
topology: v6e:2x2x1
jax: 0.10.0
libtpu: 0.0.40
codegen_flags: <defaults>
</compile_context>

<pallas_src>
import functools

import jax
import jax.numpy as jnp
from jax.experimental import pallas as pl
from jax.experimental.pallas import tpu as pltpu


CP = 128            # lane-padded channel / feature width (keep exactly 128)
NUM_CLASSES = 10
FC1_IN = 180        # 20 * 3 * 3
HK1 = 256           # fc1 contraction dim padded 180 -> 256
NEG_INF = -1e30     # padded-class-lane logit (safe: logits stay f32)


def _round_up(x, m):
    return (x + m - 1) // m * m


# ----------------------------------------------------------------------------
# Pallas kernels
# ----------------------------------------------------------------------------
def _conv_pool_relu_kernel(c_ref, w_ref, b_ref, o_ref, *, tm):
    """Fused conv-as-matmul + 2x2 max-pool + bias + ReLU for one M tile.

    c_ref: (4, TM, Kp) bf16 -- im2col rows for the 4 elements of each 2x2
           pooling window (window element on the leading axis).
    w_ref: (Kp, CP) bf16;  b_ref: (1, CP) f32;  o_ref: (TM, CP) bf16.
    """
    kp = c_ref.shape[2]
    # One long-M matmul instead of four: (4*TM, Kp) @ (Kp, CP).
    c = c_ref[...].reshape(4 * tm, kp)
    y = jnp.dot(c, w_ref[...], preferred_element_type=jnp.float32)
    # Max over the 4 pool-window positions (static, sublane-aligned slices).
    acc = jnp.maximum(jnp.maximum(y[0 * tm:1 * tm], y[1 * tm:2 * tm]),
                      jnp.maximum(y[2 * tm:3 * tm], y[3 * tm:4 * tm]))
    # Bias + ReLU deferred past the max (exact: max/+const/ReLU commute).
    o_ref[...] = jnp.maximum(acc + b_ref[...], 0.0).astype(o_ref.dtype)


def _head_kernel(x_ref, w1_ref, b1_ref, w2_ref, b2_ref, o_ref):
    """Fused fc1 + ReLU + fc2 + log_softmax.

    Padded class lanes already hold -1e30 via the fc2 bias padding (their
    weight columns are zero), so no in-kernel iota/where mask is needed.
    """
    h1 = jnp.dot(x_ref[...], w1_ref[...], preferred_element_type=jnp.float32)
    h1 = jnp.maximum(h1 + b1_ref[...], 0.0)
    # TODO(synk): F.dropout(x) between fc1 and fc2 is stochastic; identity here.
    logits = jnp.dot(h1.astype(w2_ref.dtype), w2_ref[...],
                     preferred_element_type=jnp.float32) + b2_ref[...]
    m = jnp.max(logits, axis=-1, keepdims=True)
    s = logits - m
    lse = jnp.log(jnp.sum(jnp.exp(s), axis=-1, keepdims=True))
    o_ref[...] = (s - lse).astype(o_ref.dtype)


# ----------------------------------------------------------------------------
# Plain-JAX glue: im2col rows grouped by 2x2-pool-window element
# ----------------------------------------------------------------------------
def _im2col_pool_windows(x_nhwc, k=5, pad=3):
    """Return cols4 of shape (4, N*H2*W2, k*k*C) and (N, H2, W2)."""
    N, H, W, C = x_nhwc.shape
    xp = jnp.pad(x_nhwc, ((0, 0), (pad, pad), (pad, pad), (0, 0)))
    Ho = H + 2 * pad - k + 1
    Wo = W + 2 * pad - k + 1
    H2, W2 = Ho // 2, Wo // 2
    patches = []
    for ky in range(k):
        for kx in range(k):
            patches.append(xp[:, ky:ky + Ho, kx:kx + Wo, :])
    p = jnp.concatenate(patches, axis=-1)               # (N, Ho, Wo, k*k*C)
    wins = [p[:, 0:2 * H2:2, 0:2 * W2:2, :],
            p[:, 0:2 * H2:2, 1:2 * W2:2, :],
            p[:, 1:2 * H2:2, 0:2 * W2:2, :],
            p[:, 1:2 * H2:2, 1:2 * W2:2, :]]
    cols4 = jnp.stack([w.reshape(N * H2 * W2, k * k * C) for w in wins], axis=0)
    return cols4, (N, H2, W2)


# ----------------------------------------------------------------------------
# Pallas wrappers
# ----------------------------------------------------------------------------
def conv_pool_relu_stage(x_nhwc, w_pad, b_pad, c_out, *, max_rows_per_step=512):
    """One fused `relu(max_pool2d(conv2d(x, k=5, pad=3), 2))` stage."""
    # Cast BEFORE the 25x im2col expansion (halves patch-tensor HBM traffic).
    x_nhwc = x_nhwc.astype(jnp.bfloat16)
    cols4, (N, H2, W2) = _im2col_pool_windows(x_nhwc)
    M2, K = cols4.shape[1], cols4.shape[2]
    Kp = w_pad.shape[0]

    # Grid steps: split only when there is enough work (>=2 steps for stage 1
    # feeds both v7x TensorCores and double-buffers the cols DMA); TM is a
    # multiple of 16 (bf16 sublane tile) with minimal padding.
    g = max(1, -(-M2 // max_rows_per_step))
    TM = _round_up(-(-M2 // g), 16)
    Mp = g * TM

    cols4 = jnp.pad(cols4, ((0, 0), (0, Mp - M2), (0, Kp - K)))

    out = pl.pallas_call(
        functools.partial(_conv_pool_relu_kernel, tm=TM),
        out_shape=jax.ShapeDtypeStruct((Mp, CP), jnp.bfloat16),
        grid=(g,),
        in_specs=[
            pl.BlockSpec((4, TM, Kp), lambda i: (0, i, 0)),
            pl.BlockSpec((Kp, CP), lambda i: (0, 0)),
            pl.BlockSpec((1, CP), lambda i: (0, 0)),
        ],
        out_specs=pl.BlockSpec((TM, CP), lambda i: (i, 0)),
        compiler_params=pltpu.CompilerParams(
            dimension_semantics=("parallel",)),
    )(cols4, w_pad, b_pad)

    return out[:M2, :c_out].reshape(N, H2, W2, c_out)


def classifier_head(x_flat, w1_pad, b1_pad, w2_pad, b2_pad):
    """Fused fc1 + ReLU + fc2 + log_softmax; returns (h, NUM_CLASSES) f32."""
    h, kin = x_flat.shape
    hp = _round_up(max(h, 16), 16)       # sublane-aligned M (unmasked stores)
    xp = jnp.pad(x_flat, ((0, hp - h), (0, HK1 - kin))).astype(jnp.bfloat16)
    out = pl.pallas_call(
        _head_kernel,
        out_shape=jax.ShapeDtypeStruct((hp, CP), jnp.float32),
        grid=(1,),
        in_specs=[
            pl.BlockSpec((hp, HK1), lambda i: (0, 0)),
            pl.BlockSpec((HK1, CP), lambda i: (0, 0)),
            pl.BlockSpec((1, CP), lambda i: (0, 0)),
            pl.BlockSpec((CP, CP), lambda i: (0, 0)),
            pl.BlockSpec((1, CP), lambda i: (0, 0)),
        ],
        out_specs=pl.BlockSpec((hp, CP), lambda i: (0, 0)),
    )(xp, w1_pad, b1_pad, w2_pad, b2_pad)
    return out[:h, :NUM_CLASSES]


# ----------------------------------------------------------------------------
# Parameters (deterministic init, shapes from the module __init__)
# ----------------------------------------------------------------------------
def init_params(key):
    ks = jax.random.split(key, 6)

    def conv_init(k, c_out, c_in, ksz=5):
        fan_out = c_out * ksz * ksz
        std = (2.0 / fan_out) ** 0.5          # kaiming_normal_(mode='fan_out')
        w = std * jax.random.normal(k, (c_out, c_in, ksz, ksz), jnp.float32)
        return w, jnp.zeros((c_out,), jnp.float32)

    def lin_init(k, n_out, n_in):
        w = 0.001 * jax.random.normal(k, (n_out, n_in), jnp.float32)
        return w, jnp.zeros((n_out,), jnp.float32)

    p = {}
    p["conv1_w"], p["conv1_b"] = conv_init(ks[0], 20, 3)
    p["conv2_w"], p["conv2_b"] = conv_init(ks[1], 30, 20)
    p["conv3_w"], p["conv3_b"] = conv_init(ks[2], 20, 30)
    p["conv4_w"], p["conv4_b"] = conv_init(ks[3], 20, 20)
    p["fc1_w"], p["fc1_b"] = lin_init(ks[4], 50, 180)
    p["fc2_w"], p["fc2_b"] = lin_init(ks[5], 10, 50)
    return p


def _prep_conv(w_oihw, b):
    """(C_out, C_in, kH, kW) -> lane-dense bf16 (Kp, 128) + f32 (1, 128) bias."""
    c_out, c_in, kh, kw = w_oihw.shape
    K = kh * kw * c_in
    Kp = _round_up(K, 128)
    wm = jnp.transpose(w_oihw, (2, 3, 1, 0)).reshape(K, c_out)   # (ky,kx,c) rows
    wm = jnp.pad(wm, ((0, Kp - K), (0, CP - c_out))).astype(jnp.bfloat16)
    bp = jnp.pad(b, (0, CP - c_out)).reshape(1, CP).astype(jnp.float32)
    return wm, bp


def _prep_fc(w, b, k_pad, n_pad, pad_bias_value=0.0):
    """torch Linear (n_out, n_in) -> lane-dense bf16 (k_pad, n_pad) + f32 bias."""
    n_out, n_in = w.shape
    wm = jnp.pad(w.T, ((0, k_pad - n_in), (0, n_pad - n_out))).astype(jnp.bfloat16)
    bp = jnp.pad(b, (0, n_pad - n_out), constant_values=pad_bias_value)
    bp = bp.reshape(1, n_pad).astype(jnp.float32)
    return wm, bp


def prepare_params(p):
    """Pre-transpose / pad / cast all weights once (outside the hot path)."""
    q = {}
    for name in ("conv1", "conv2", "conv3", "conv4"):
        q[name + "_w"], q[name + "_b"] = _prep_conv(p[name + "_w"], p[name + "_b"])
    q["fc1_w"], q["fc1_b"] = _prep_fc(p["fc1_w"], p["fc1_b"], HK1, CP)
    # fc2 bias padded with -1e30: padded weight columns are zero, so padded
    # class logits become exactly -1e30 (replaces the in-kernel lane mask).
    q["fc2_w"], q["fc2_b"] = _prep_fc(p["fc2_w"], p["fc2_b"], CP, CP,
                                      pad_bias_value=NEG_INF)
    return q


# ----------------------------------------------------------------------------
# Forward pass (mirrors Classifier.forward)
# ----------------------------------------------------------------------------
def classifier_forward(packed, x_nchw):
    h = x_nchw.shape[0]
    x = jnp.transpose(x_nchw, (0, 2, 3, 1))            # NCHW -> NHWC

    # TODO(synk): Dropout2d after conv2/conv4 is stochastic (training-mode in
    # the reference default); treated as identity (inference semantics).
    x = conv_pool_relu_stage(x, packed["conv1_w"], packed["conv1_b"], 20)
    x = conv_pool_relu_stage(x, packed["conv2_w"], packed["conv2_b"], 30)
    x = conv_pool_relu_stage(x, packed["conv3_w"], packed["conv3_b"], 20)
    x = conv_pool_relu_stage(x, packed["conv4_w"], packed["conv4_b"], 20)

    # x.view(h, 180) is taken on NCHW memory order -> transpose back first.
    x = jnp.transpose(x, (0, 3, 1, 2)).reshape(h, FC1_IN)

    return classifier_head(x, packed["fc1_w"], packed["fc1_b"],
                           packed["fc2_w"], packed["fc2_b"])


if __name__ == "__main__":
    key = jax.random.PRNGKey(0)
    pkey, xkey = jax.random.split(key)
    params = init_params(pkey)
    packed = prepare_params(params)      # one-time weight packing

    # Input consistent with fc1's 180 = 20*3*3 requirement: (N, 3, 32, 32).
    x = jax.random.normal(xkey, (2, 3, 32, 32), jnp.float32)

    out = jax.jit(classifier_forward)(packed, x)
    out = jax.block_until_ready(out)

    assert out.shape == (2, 10)
    assert bool(jnp.all(jnp.isfinite(out)))
    # log_softmax rows must exponentiate-sum to 1
    assert bool(jnp.allclose(jnp.sum(jnp.exp(out), axis=-1), 1.0, atol=1e-4))
    print("KERNEL_OK")
</pallas_src>

<mosaic_0001>
module attributes {stable_mosaic.version = 11 : i64} {
  func.func @_conv_pool_relu_kernel(%arg0: i32, %arg1: memref<4x304x128xbf16, #tpu.memory_space<vmem>>, %arg2: memref<128x128xbf16, #tpu.memory_space<vmem>>, %arg3: memref<1x128xf32, #tpu.memory_space<vmem>>, %arg4: memref<304x128xbf16, #tpu.memory_space<vmem>>) attributes {dimension_semantics = [#tpu.dimension_semantics<parallel>], iteration_bounds = array<i64: 2>, scalar_prefetch = 0 : i64, scratch_operands = 0 : i64, tpu.core_type = #tpu.core_type<tc>, window_params = [{transform_indices = @transform_0, window_bounds = array<i64: 4, 304, 128>}, {pipeline_mode = #tpu.pipeline_mode<synchronous>, transform_indices = @transform_1, window_bounds = array<i64: 128, 128>}, {pipeline_mode = #tpu.pipeline_mode<synchronous>, transform_indices = @transform_2, window_bounds = array<i64: 1, 128>}, {transform_indices = @transform_3, window_bounds = array<i64: 304, 128>}]} {
    %c0 = arith.constant 0 : index
    %c0_0 = arith.constant 0 : index
    %c0_1 = arith.constant 0 : index
    %0 = vector.load %arg1[%c0, %c0_0, %c0_1] : memref<4x304x128xbf16, #tpu.memory_space<vmem>>, vector<4x304x128xbf16>
    %1 = vector.shape_cast %0 : vector<4x304x128xbf16> to vector<1216x128xbf16>
    %c0_2 = arith.constant 0 : index
    %c0_3 = arith.constant 0 : index
    %2 = vector.load %arg2[%c0_2, %c0_3] : memref<128x128xbf16, #tpu.memory_space<vmem>>, vector<128x128xbf16>
    %cst = arith.constant dense<0.000000e+00> : vector<1216x128xf32>
    %3 = tpu.matmul %1, %2, %cst {dimension_numbers = #tpu.dot_dimension_numbers<[1], [0], [0], [1], [0, 0, 1, 1], [], []>} : vector<1216x128xbf16>, vector<128x128xbf16>, vector<1216x128xf32> -> vector<1216x128xf32>
    %4 = vector.extract_strided_slice %3 {offsets = [0, 0], sizes = [304, 128], strides = [1, 1]} : vector<1216x128xf32> to vector<304x128xf32>
    %5 = vector.extract_strided_slice %3 {offsets = [304, 0], sizes = [304, 128], strides = [1, 1]} : vector<1216x128xf32> to vector<304x128xf32>
    %6 = arith.maximumf %4, %5 : vector<304x128xf32>
    %7 = vector.extract_strided_slice %3 {offsets = [608, 0], sizes = [304, 128], strides = [1, 1]} : vector<1216x128xf32> to vector<304x128xf32>
    %8 = vector.extract_strided_slice %3 {offsets = [912, 0], sizes = [304, 128], strides = [1, 1]} : vector<1216x128xf32> to vector<304x128xf32>
    %9 = arith.maximumf %7, %8 : vector<304x128xf32>
    %10 = arith.maximumf %6, %9 : vector<304x128xf32>
    %c0_4 = arith.constant 0 : index
    %c0_5 = arith.constant 0 : index
    %11 = vector.load %arg3[%c0_4, %c0_5] : memref<1x128xf32, #tpu.memory_space<vmem>>, vector<1x128xf32>
    %12 = vector.broadcast %11 : vector<1x128xf32> to vector<304x128xf32>
    %13 = arith.addf %10, %12 : vector<304x128xf32>
    %cst_6 = arith.constant 0.000000e+00 : f32
    %14 = vector.broadcast %cst_6 : f32 to vector<304x128xf32>
    %15 = arith.maximumf %13, %14 : vector<304x128xf32>
    %16 = arith.truncf %15 : vector<304x128xf32> to vector<304x128xbf16>
    %c0_7 = arith.constant 0 : index
    %c0_8 = arith.constant 0 : index
    %17 = vector.load %arg4[%c0_7, %c0_8] : memref<304x128xbf16, #tpu.memory_space<vmem>>, vector<304x128xbf16>
    tpu.vector_store %arg4[%c0_7, %c0_8], %16 {strides = array<i32>} : memref<304x128xbf16, #tpu.memory_space<vmem>>, vector<304x128xbf16>,
    return
  }
  func.func @transform_0(%arg0: i32) -> (i32, i32, i32) {
    %c0_i32 = arith.constant 0 : i32
    %c0_i32_0 = arith.constant 0 : i32
    %c0_i32_1 = arith.constant 0 : i32
    return %c0_i32, %arg0, %c0_i32_0 : i32, i32, i32
  }
  func.func @transform_1(%arg0: i32) -> (i32, i32) {
    %c0_i32 = arith.constant 0 : i32
    %c0_i32_0 = arith.constant 0 : i32
    %c0_i32_1 = arith.constant 0 : i32
    return %c0_i32, %c0_i32_0 : i32, i32
  }
  func.func @transform_2(%arg0: i32) -> (i32, i32) {
    %c0_i32 = arith.constant 0 : i32
    %c0_i32_0 = arith.constant 0 : i32
    %c0_i32_1 = arith.constant 0 : i32
    return %c0_i32, %c0_i32_0 : i32, i32
  }
  func.func @transform_3(%arg0: i32) -> (i32, i32) {
    %c0_i32 = arith.constant 0 : i32
    %c0_i32_0 = arith.constant 0 : i32
    return %arg0, %c0_i32 : i32, i32
  }
}

module attributes {stable_mosaic.version = 11 : i64} {
  func.func @_conv_pool_relu_kernel(%arg0: i32, %arg1: memref<4x176x512xbf16, #tpu.memory_space<vmem>>, %arg2: memref<512x128xbf16, #tpu.memory_space<vmem>>, %arg3: memref<1x128xf32, #tpu.memory_space<vmem>>, %arg4: memref<176x128xbf16, #tpu.memory_space<vmem>>) attributes {dimension_semantics = [#tpu.dimension_semantics<parallel>], iteration_bounds = array<i64: 1>, scalar_prefetch = 0 : i64, scratch_operands = 0 : i64, tpu.core_type = #tpu.core_type<tc>, window_params = [{transform_indices = @transform_0, window_bounds = array<i64: 4, 176, 512>}, {pipeline_mode = #tpu.pipeline_mode<synchronous>, transform_indices = @transform_1, window_bounds = array<i64: 512, 128>}, {pipeline_mode = #tpu.pipeline_mode<synchronous>, transform_indices = @transform_2, window_bounds = array<i64: 1, 128>}, {transform_indices = @transform_3, window_bounds = array<i64: 176, 128>}]} {
    %c0 = arith.constant 0 : index
    %c0_0 = arith.constant 0 : index
    %c0_1 = arith.constant 0 : index
    %0 = vector.load %arg1[%c0, %c0_0, %c0_1] : memref<4x176x512xbf16, #tpu.memory_space<vmem>>, vector<4x176x512xbf16>
    %1 = vector.shape_cast %0 : vector<4x176x512xbf16> to vector<704x512xbf16>
    %c0_2 = arith.constant 0 : index
    %c0_3 = arith.constant 0 : index
    %2 = vector.load %arg2[%c0_2, %c0_3] : memref<512x128xbf16, #tpu.memory_space<vmem>>, vector<512x128xbf16>
    %cst = arith.constant dense<0.000000e+00> : vector<704x128xf32>
    %3 = tpu.matmul %1, %2, %cst {dimension_numbers = #tpu.dot_dimension_numbers<[1], [0], [0], [1], [0, 0, 1, 1], [], []>} : vector<704x512xbf16>, vector<512x128xbf16>, vector<704x128xf32> -> vector<704x128xf32>
    %4 = vector.extract_strided_slice %3 {offsets = [0, 0], sizes = [176, 128], strides = [1, 1]} : vector<704x128xf32> to vector<176x128xf32>
    %5 = vector.extract_strided_slice %3 {offsets = [176, 0], sizes = [176, 128], strides = [1, 1]} : vector<704x128xf32> to vector<176x128xf32>
    %6 = arith.maximumf %4, %5 : vector<176x128xf32>
    %7 = vector.extract_strided_slice %3 {offsets = [352, 0], sizes = [176, 128], strides = [1, 1]} : vector<704x128xf32> to vector<176x128xf32>
    %8 = vector.extract_strided_slice %3 {offsets = [528, 0], sizes = [176, 128], strides = [1, 1]} : vector<704x128xf32> to vector<176x128xf32>
    %9 = arith.maximumf %7, %8 : vector<176x128xf32>
    %10 = arith.maximumf %6, %9 : vector<176x128xf32>
    %c0_4 = arith.constant 0 : index
    %c0_5 = arith.constant 0 : index
    %11 = vector.load %arg3[%c0_4, %c0_5] : memref<1x128xf32, #tpu.memory_space<vmem>>, vector<1x128xf32>
    %12 = vector.broadcast %11 : vector<1x128xf32> to vector<176x128xf32>
    %13 = arith.addf %10, %12 : vector<176x128xf32>
    %cst_6 = arith.constant 0.000000e+00 : f32
    %14 = vector.broadcast %cst_6 : f32 to vector<176x128xf32>
    %15 = arith.maximumf %13, %14 : vector<176x128xf32>
    %16 = arith.truncf %15 : vector<176x128xf32> to vector<176x128xbf16>
    %c0_7 = arith.constant 0 : index
    %c0_8 = arith.constant 0 : index
    %17 = vector.load %arg4[%c0_7, %c0_8] : memref<176x128xbf16, #tpu.memory_space<vmem>>, vector<176x128xbf16>
    tpu.vector_store %arg4[%c0_7, %c0_8], %16 {strides = array<i32>} : memref<176x128xbf16, #tpu.memory_space<vmem>>, vector<176x128xbf16>,
    return
  }
  func.func @transform_0(%arg0: i32) -> (i32, i32, i32) {
    %c0_i32 = arith.constant 0 : i32
    %c0_i32_0 = arith.constant 0 : i32
    %c0_i32_1 = arith.constant 0 : i32
    return %c0_i32, %arg0, %c0_i32_0 : i32, i32, i32
  }
  func.func @transform_1(%arg0: i32) -> (i32, i32) {
    %c0_i32 = arith.constant 0 : i32
    %c0_i32_0 = arith.constant 0 : i32
    %c0_i32_1 = arith.constant 0 : i32
    return %c0_i32, %c0_i32_0 : i32, i32
  }
  func.func @transform_2(%arg0: i32) -> (i32, i32) {
    %c0_i32 = arith.constant 0 : i32
    %c0_i32_0 = arith.constant 0 : i32
    %c0_i32_1 = arith.constant 0 : i32
    return %c0_i32, %c0_i32_0 : i32, i32
  }
  func.func @transform_3(%arg0: i32) -> (i32, i32) {
    %c0_i32 = arith.constant 0 : i32
    %c0_i32_0 = arith.constant 0 : i32
    return %arg0, %c0_i32 : i32, i32
  }
}

module attributes {stable_mosaic.version = 11 : i64} {
  func.func @_conv_pool_relu_kernel(%arg0: i32, %arg1: memref<4x64x768xbf16, #tpu.memory_space<vmem>>, %arg2: memref<768x128xbf16, #tpu.memory_space<vmem>>, %arg3: memref<1x128xf32, #tpu.memory_space<vmem>>, %arg4: memref<64x128xbf16, #tpu.memory_space<vmem>>) attributes {dimension_semantics = [#tpu.dimension_semantics<parallel>], iteration_bounds = array<i64: 1>, scalar_prefetch = 0 : i64, scratch_operands = 0 : i64, tpu.core_type = #tpu.core_type<tc>, window_params = [{transform_indices = @transform_0, window_bounds = array<i64: 4, 64, 768>}, {pipeline_mode = #tpu.pipeline_mode<synchronous>, transform_indices = @transform_1, window_bounds = array<i64: 768, 128>}, {pipeline_mode = #tpu.pipeline_mode<synchronous>, transform_indices = @transform_2, window_bounds = array<i64: 1, 128>}, {transform_indices = @transform_3, window_bounds = array<i64: 64, 128>}]} {
    %c0 = arith.constant 0 : index
    %c0_0 = arith.constant 0 : index
    %c0_1 = arith.constant 0 : index
    %0 = vector.load %arg1[%c0, %c0_0, %c0_1] : memref<4x64x768xbf16, #tpu.memory_space<vmem>>, vector<4x64x768xbf16>
    %1 = vector.shape_cast %0 : vector<4x64x768xbf16> to vector<256x768xbf16>
    %c0_2 = arith.constant 0 : index
    %c0_3 = arith.constant 0 : index
    %2 = vector.load %arg2[%c0_2, %c0_3] : memref<768x128xbf16, #tpu.memory_space<vmem>>, vector<768x128xbf16>
    %cst = arith.constant dense<0.000000e+00> : vector<256x128xf32>
    %3 = tpu.matmul %1, %2, %cst {dimension_numbers = #tpu.dot_dimension_numbers<[1], [0], [0], [1], [0, 0, 1, 1], [], []>} : vector<256x768xbf16>, vector<768x128xbf16>, vector<256x128xf32> -> vector<256x128xf32>
    %4 = vector.extract_strided_slice %3 {offsets = [0, 0], sizes = [64, 128], strides = [1, 1]} : vector<256x128xf32> to vector<64x128xf32>
    %5 = vector.extract_strided_slice %3 {offsets = [64, 0], sizes = [64, 128], strides = [1, 1]} : vector<256x128xf32> to vector<64x128xf32>
    %6 = arith.maximumf %4, %5 : vector<64x128xf32>
    %7 = vector.extract_strided_slice %3 {offsets = [128, 0], sizes = [64, 128], strides = [1, 1]} : vector<256x128xf32> to vector<64x128xf32>
    %8 = vector.extract_strided_slice %3 {offsets = [192, 0], sizes = [64, 128], strides = [1, 1]} : vector<256x128xf32> to vector<64x128xf32>
    %9 = arith.maximumf %7, %8 : vector<64x128xf32>
    %10 = arith.maximumf %6, %9 : vector<64x128xf32>
    %c0_4 = arith.constant 0 : index
    %c0_5 = arith.constant 0 : index
    %11 = vector.load %arg3[%c0_4, %c0_5] : memref<1x128xf32, #tpu.memory_space<vmem>>, vector<1x128xf32>
    %12 = vector.broadcast %11 : vector<1x128xf32> to vector<64x128xf32>
    %13 = arith.addf %10, %12 : vector<64x128xf32>
    %cst_6 = arith.constant 0.000000e+00 : f32
    %14 = vector.broadcast %cst_6 : f32 to vector<64x128xf32>
    %15 = arith.maximumf %13, %14 : vector<64x128xf32>
    %16 = arith.truncf %15 : vector<64x128xf32> to vector<64x128xbf16>
    %c0_7 = arith.constant 0 : index
    %c0_8 = arith.constant 0 : index
    %17 = vector.load %arg4[%c0_7, %c0_8] : memref<64x128xbf16, #tpu.memory_space<vmem>>, vector<64x128xbf16>
    tpu.vector_store %arg4[%c0_7, %c0_8], %16 {strides = array<i32>} : memref<64x128xbf16, #tpu.memory_space<vmem>>, vector<64x128xbf16>,
    return
  }
  func.func @transform_0(%arg0: i32) -> (i32, i32, i32) {
    %c0_i32 = arith.constant 0 : i32
    %c0_i32_0 = arith.constant 0 : i32
    %c0_i32_1 = arith.constant 0 : i32
    return %c0_i32, %arg0, %c0_i32_0 : i32, i32, i32
  }
  func.func @transform_1(%arg0: i32) -> (i32, i32) {
    %c0_i32 = arith.constant 0 : i32
    %c0_i32_0 = arith.constant 0 : i32
    %c0_i32_1 = arith.constant 0 : i32
    return %c0_i32, %c0_i32_0 : i32, i32
  }
  func.func @transform_2(%arg0: i32) -> (i32, i32) {
    %c0_i32 = arith.constant 0 : i32
    %c0_i32_0 = arith.constant 0 : i32
    %c0_i32_1 = arith.constant 0 : i32
    return %c0_i32, %c0_i32_0 : i32, i32
  }
  func.func @transform_3(%arg0: i32) -> (i32, i32) {
    %c0_i32 = arith.constant 0 : i32
    %c0_i32_0 = arith.constant 0 : i32
    return %arg0, %c0_i32 : i32, i32
  }
}

module attributes {stable_mosaic.version = 11 : i64} {
  func.func @_conv_pool_relu_kernel(%arg0: i32, %arg1: memref<4x32x512xbf16, #tpu.memory_space<vmem>>, %arg2: memref<512x128xbf16, #tpu.memory_space<vmem>>, %arg3: memref<1x128xf32, #tpu.memory_space<vmem>>, %arg4: memref<32x128xbf16, #tpu.memory_space<vmem>>) attributes {dimension_semantics = [#tpu.dimension_semantics<parallel>], iteration_bounds = array<i64: 1>, scalar_prefetch = 0 : i64, scratch_operands = 0 : i64, tpu.core_type = #tpu.core_type<tc>, window_params = [{transform_indices = @transform_0, window_bounds = array<i64: 4, 32, 512>}, {pipeline_mode = #tpu.pipeline_mode<synchronous>, transform_indices = @transform_1, window_bounds = array<i64: 512, 128>}, {pipeline_mode = #tpu.pipeline_mode<synchronous>, transform_indices = @transform_2, window_bounds = array<i64: 1, 128>}, {transform_indices = @transform_3, window_bounds = array<i64: 32, 128>}]} {
    %c0 = arith.constant 0 : index
    %c0_0 = arith.constant 0 : index
    %c0_1 = arith.constant 0 : index
    %0 = vector.load %arg1[%c0, %c0_0, %c0_1] : memref<4x32x512xbf16, #tpu.memory_space<vmem>>, vector<4x32x512xbf16>
    %1 = vector.shape_cast %0 : vector<4x32x512xbf16> to vector<128x512xbf16>
    %c0_2 = arith.constant 0 : index
    %c0_3 = arith.constant 0 : index
    %2 = vector.load %arg2[%c0_2, %c0_3] : memref<512x128xbf16, #tpu.memory_space<vmem>>, vector<512x128xbf16>
    %cst = arith.constant dense<0.000000e+00> : vector<128x128xf32>
    %3 = tpu.matmul %1, %2, %cst {dimension_numbers = #tpu.dot_dimension_numbers<[1], [0], [0], [1], [0, 0, 1, 1], [], []>} : vector<128x512xbf16>, vector<512x128xbf16>, vector<128x128xf32> -> vector<128x128xf32>
    %4 = vector.extract_strided_slice %3 {offsets = [0, 0], sizes = [32, 128], strides = [1, 1]} : vector<128x128xf32> to vector<32x128xf32>
    %5 = vector.extract_strided_slice %3 {offsets = [32, 0], sizes = [32, 128], strides = [1, 1]} : vector<128x128xf32> to vector<32x128xf32>
    %6 = arith.maximumf %4, %5 : vector<32x128xf32>
    %7 = vector.extract_strided_slice %3 {offsets = [64, 0], sizes = [32, 128], strides = [1, 1]} : vector<128x128xf32> to vector<32x128xf32>
    %8 = vector.extract_strided_slice %3 {offsets = [96, 0], sizes = [32, 128], strides = [1, 1]} : vector<128x128xf32> to vector<32x128xf32>
    %9 = arith.maximumf %7, %8 : vector<32x128xf32>
    %10 = arith.maximumf %6, %9 : vector<32x128xf32>
    %c0_4 = arith.constant 0 : index
    %c0_5 = arith.constant 0 : index
    %11 = vector.load %arg3[%c0_4, %c0_5] : memref<1x128xf32, #tpu.memory_space<vmem>>, vector<1x128xf32>
    %12 = vector.broadcast %11 : vector<1x128xf32> to vector<32x128xf32>
    %13 = arith.addf %10, %12 : vector<32x128xf32>
    %cst_6 = arith.constant 0.000000e+00 : f32
    %14 = vector.broadcast %cst_6 : f32 to vector<32x128xf32>
    %15 = arith.maximumf %13, %14 : vector<32x128xf32>
    %16 = arith.truncf %15 : vector<32x128xf32> to vector<32x128xbf16>
    %c0_7 = arith.constant 0 : index
    %c0_8 = arith.constant 0 : index
    %17 = vector.load %arg4[%c0_7, %c0_8] : memref<32x128xbf16, #tpu.memory_space<vmem>>, vector<32x128xbf16>
    tpu.vector_store %arg4[%c0_7, %c0_8], %16 {strides = array<i32>} : memref<32x128xbf16, #tpu.memory_space<vmem>>, vector<32x128xbf16>,
    return
  }
  func.func @transform_0(%arg0: i32) -> (i32, i32, i32) {
    %c0_i32 = arith.constant 0 : i32
    %c0_i32_0 = arith.constant 0 : i32
    %c0_i32_1 = arith.constant 0 : i32
    return %c0_i32, %arg0, %c0_i32_0 : i32, i32, i32
  }
  func.func @transform_1(%arg0: i32) -> (i32, i32) {
    %c0_i32 = arith.constant 0 : i32
    %c0_i32_0 = arith.constant 0 : i32
    %c0_i32_1 = arith.constant 0 : i32
    return %c0_i32, %c0_i32_0 : i32, i32
  }
  func.func @transform_2(%arg0: i32) -> (i32, i32) {
    %c0_i32 = arith.constant 0 : i32
    %c0_i32_0 = arith.constant 0 : i32
    %c0_i32_1 = arith.constant 0 : i32
    return %c0_i32, %c0_i32_0 : i32, i32
  }
  func.func @transform_3(%arg0: i32) -> (i32, i32) {
    %c0_i32 = arith.constant 0 : i32
    %c0_i32_0 = arith.constant 0 : i32
    return %arg0, %c0_i32 : i32, i32
  }
}

module attributes {stable_mosaic.version = 11 : i64} {
  func.func @_head_kernel(%arg0: i32, %arg1: memref<16x256xbf16, #tpu.memory_space<vmem>>, %arg2: memref<256x128xbf16, #tpu.memory_space<vmem>>, %arg3: memref<1x128xf32, #tpu.memory_space<vmem>>, %arg4: memref<128x128xbf16, #tpu.memory_space<vmem>>, %arg5: memref<1x128xf32, #tpu.memory_space<vmem>>, %arg6: memref<16x128xf32, #tpu.memory_space<vmem>>) attributes {dimension_semantics = [#tpu.dimension_semantics<arbitrary>], iteration_bounds = array<i64: 1>, scalar_prefetch = 0 : i64, scratch_operands = 0 : i64, tpu.core_type = #tpu.core_type<tc>, window_params = [{pipeline_mode = #tpu.pipeline_mode<synchronous>, transform_indices = @transform_0, window_bounds = array<i64: 16, 256>}, {pipeline_mode = #tpu.pipeline_mode<synchronous>, transform_indices = @transform_1, window_bounds = array<i64: 256, 128>}, {pipeline_mode = #tpu.pipeline_mode<synchronous>, transform_indices = @transform_2, window_bounds = array<i64: 1, 128>}, {pipeline_mode = #tpu.pipeline_mode<synchronous>, transform_indices = @transform_3, window_bounds = array<i64: 128, 128>}, {pipeline_mode = #tpu.pipeline_mode<synchronous>, transform_indices = @transform_4, window_bounds = array<i64: 1, 128>}, {pipeline_mode = #tpu.pipeline_mode<synchronous>, transform_indices = @transform_5, window_bounds = array<i64: 16, 128>}]} {
    %c0 = arith.constant 0 : index
    %c0_0 = arith.constant 0 : index
    %0 = vector.load %arg1[%c0, %c0_0] : memref<16x256xbf16, #tpu.memory_space<vmem>>, vector<16x256xbf16>
    %c0_1 = arith.constant 0 : index
    %c0_2 = arith.constant 0 : index
    %1 = vector.load %arg2[%c0_1, %c0_2] : memref<256x128xbf16, #tpu.memory_space<vmem>>, vector<256x128xbf16>
    %cst = arith.constant dense<0.000000e+00> : vector<16x128xf32>
    %2 = tpu.matmul %0, %1, %cst {dimension_numbers = #tpu.dot_dimension_numbers<[1], [0], [0], [1], [0, 0, 1, 1], [], []>} : vector<16x256xbf16>, vector<256x128xbf16>, vector<16x128xf32> -> vector<16x128xf32>
    %c0_3 = arith.constant 0 : index
    %c0_4 = arith.constant 0 : index
    %3 = vector.load %arg3[%c0_3, %c0_4] : memref<1x128xf32, #tpu.memory_space<vmem>>, vector<1x128xf32>
    %4 = vector.broadcast %3 : vector<1x128xf32> to vector<16x128xf32>
    %5 = arith.addf %2, %4 : vector<16x128xf32>
    %cst_5 = arith.constant 0.000000e+00 : f32
    %6 = vector.broadcast %cst_5 : f32 to vector<16x128xf32>
    %7 = arith.maximumf %5, %6 : vector<16x128xf32>
    %8 = arith.truncf %7 : vector<16x128xf32> to vector<16x128xbf16>
    %c0_6 = arith.constant 0 : index
    %c0_7 = arith.constant 0 : index
    %9 = vector.load %arg4[%c0_6, %c0_7] : memref<128x128xbf16, #tpu.memory_space<vmem>>, vector<128x128xbf16>
    %cst_8 = arith.constant dense<0.000000e+00> : vector<16x128xf32>
    %10 = tpu.matmul %8, %9, %cst_8 {dimension_numbers = #tpu.dot_dimension_numbers<[1], [0], [0], [1], [0, 0, 1, 1], [], []>} : vector<16x128xbf16>, vector<128x128xbf16>, vector<16x128xf32> -> vector<16x128xf32>
    %c0_9 = arith.constant 0 : index
    %c0_10 = arith.constant 0 : index
    %11 = vector.load %arg5[%c0_9, %c0_10] : memref<1x128xf32, #tpu.memory_space<vmem>>, vector<1x128xf32>
    %12 = vector.broadcast %11 : vector<1x128xf32> to vector<16x128xf32>
    %13 = arith.addf %10, %12 : vector<16x128xf32>
    %cst_11 = arith.constant dense<0xFF800000> : vector<16xf32>
    %14 = vector.multi_reduction <maximumf>, %13, %cst_11 [1] : vector<16x128xf32> to vector<16xf32>
    %15 = vector.shape_cast %14 : vector<16xf32> to vector<16x1xf32>
    %16 = vector.broadcast %15 : vector<16x1xf32> to vector<16x128xf32>
    %17 = arith.subf %13, %16 : vector<16x128xf32>
    %18 = math.exp %17 : vector<16x128xf32>
    %cst_12 = arith.constant dense<0.000000e+00> : vector<16xf32>
    %19 = vector.multi_reduction <add>, %18, %cst_12 [1] : vector<16x128xf32> to vector<16xf32>
    %20 = vector.shape_cast %19 : vector<16xf32> to vector<16x1xf32>
    %21 = math.log %20 : vector<16x1xf32>
    %22 = vector.broadcast %21 : vector<16x1xf32> to vector<16x128xf32>
    %23 = arith.subf %17, %22 : vector<16x128xf32>
    %c0_13 = arith.constant 0 : index
    %c0_14 = arith.constant 0 : index
    %24 = vector.load %arg6[%c0_13, %c0_14] : memref<16x128xf32, #tpu.memory_space<vmem>>, vector<16x128xf32>
    tpu.vector_store %arg6[%c0_13, %c0_14], %23 {strides = array<i32>} : memref<16x128xf32, #tpu.memory_space<vmem>>, vector<16x128xf32>,
    return
  }
  func.func @transform_0(%arg0: i32) -> (i32, i32) {
    %c0_i32 = arith.constant 0 : i32
    %c0_i32_0 = arith.constant 0 : i32
    %c0_i32_1 = arith.constant 0 : i32
    return %c0_i32, %c0_i32_0 : i32, i32
  }
  func.func @transform_1(%arg0: i32) -> (i32, i32) {
    %c0_i32 = arith.constant 0 : i32
    %c0_i32_0 = arith.constant 0 : i32
    %c0_i32_1 = arith.constant 0 : i32
    return %c0_i32, %c0_i32_0 : i32, i32
  }
  func.func @transform_2(%arg0: i32) -> (i32, i32) {
    %c0_i32 = arith.constant 0 : i32
    %c0_i32_0 = arith.constant 0 : i32
    %c0_i32_1 = arith.constant 0 : i32
    return %c0_i32, %c0_i32_0 : i32, i32
  }
  func.func @transform_3(%arg0: i32) -> (i32, i32) {
    %c0_i32 = arith.constant 0 : i32
    %c0_i32_0 = arith.constant 0 : i32
    %c0_i32_1 = arith.constant 0 : i32
    return %c0_i32, %c0_i32_0 : i32, i32
  }
  func.func @transform_4(%arg0: i32) -> (i32, i32) {
    %c0_i32 = arith.constant 0 : i32
    %c0_i32_0 = arith.constant 0 : i32
    %c0_i32_1 = arith.constant 0 : i32
    return %c0_i32, %c0_i32_0 : i32, i32
  }
  func.func @transform_5(%arg0: i32) -> (i32, i32) {
    %c0_i32 = arith.constant 0 : i32
    %c0_i32_0 = arith.constant 0 : i32
    %c0_i32_1 = arith.constant 0 : i32
    return %c0_i32, %c0_i32_0 : i32, i32
  }
}

</mosaic_0001>

<bundles_post_ra>
// kernel: classifier_forward.5
= control target key start
LH: loop header
LB: loop body
LE: loop exit
PB: predicated region body
PF: predicated region fallthrough
CT: control target
= control target key end

     0   :  { %s3290_s12 = smov 0   ;;  %s3292_s13 = smov 0   ;;  %s3892_s0 = inlined_call_operand.vmem [shape: bf16[4,608,128], index: 0, kind: input, shape index: {}]   ;;  %s3893_s1 = inlined_call_operand.vmem [shape: bf16[128,128], index: 1, kind: input, shape index: {}]   ;;  %s3894_s2 = inlined_call_operand.vmem [shape: f32[1,128], index: 2, kind: input, shape index: {}]   ;;  %s3895_s3 = inlined_call_operand.vmem [shape: bf16[608,128], index: 3, kind: output, shape index: {}]  }
   0x1   :  { %s3294_s14 = smov 0  }
   0x2 LB: > { %s2584_s15 = sadd.s32 4294967295, %s3268_s14   ;;  %s3307_s16 = sadd.s32 1, %s3268_s14   ;;  %s3268_s14 = sphi %s3294_s14, %s3948_s14   ;;  %s3264_s13 = sphi %s3292_s13, %s3947_s13   ;;  %s3260_s12 = sphi %s3290_s12, %s3946_s12  }
   0x3   : > { %s17_s17 = ssub.s32 %s3268_s14, %s3307_s16  ;;  %s20_s18 = sadd.s32 1, %s3264_s13 }
   0x4   : > { %p18_p0 = scmp.eq.s32.totalorder %s17_s17, 0  ;;  %p27_p1 = scmp.ne.s32.totalorder %s3264_s13, %s3260_s12 }
   0x5   : > { %p28_p2 = scmp.eq.s32.totalorder %s3268_s14, 0  ;;  %p2587_p4 = scmp.ge.s32.totalorder %s3268_s14, 2 }
   0x6   : > { %s3316_s19 = scalar_select %p18_p0, %s3264_s13, %s20_s18  }
   0x7   : > { %p29_p3 = por %p28_p2, %p27_p1  ;;  %127 = sbr.rel (%p2587_p4) target bundleno = 55 (0x37), region = 24 }
   0xc   : > { %130 = sbr.rel (!%p29_p3) target bundleno = 55 (0x37), region = 28  ;;  %s132_s20 = sand.u32 (%p29_p3), 1, %s3264_s13  }
   0xd   : > { %s2716_s21 = smul.u32 (%p29_p3), 152, %s3268_s14 }
   0xe   : > { %s3136_s22 = smul.u32 (%p29_p3), 608, %s132_s20 }
   0xf   : > { %s3324_s25 = scalar_lea.vmem (%p29_p3), %s3892_s0, %s2716_s21 }
  0x10   : > { %v154_v0 = vld [vmem:[%s3324_s25] sm:$0xff] (%p29_p3)   ;;  %v158_v1 = vld [vmem:[%s3324_s25 + $0x8] sm:$0xff] (%p29_p3)   ;;  %v162_v2 = vld [vmem:[%s3324_s25 + $0x10] sm:$0xff] (%p29_p3)   ;;  %s3329_s26 = scalar_lea.vmem (%p29_p3), [#allocation2], %s3136_s22 }
  0x11   : > { %155 = vst [vmem:[%s3329_s26] sm:$0xff] %v154_v0   ;;  %159 = vst [vmem:[%s3329_s26 + $0x8] sm:$0xff] %v158_v1   ;;  %v166_v3 = vld [vmem:[%s3324_s25 + $0x18] sm:$0xff]   ;;  %v170_v4 = vld [vmem:[%s3324_s25 + $0x20] sm:$0xff]  }
  0x12   : > { %163 = vst [vmem:[%s3329_s26 + $0x10] sm:$0xff] %v162_v2   ;;  %v174_v5 = vld [vmem:[%s3324_s25 + $0x28] sm:$0xff]   ;;  %167 = vst [vmem:[%s3329_s26 + $0x18] sm:$0xff] %v166_v3   ;;  %v178_v6 = vld [vmem:[%s3324_s25 + $0x30] sm:$0xff]  }
  0x13   : > { %171 = vst [vmem:[%s3329_s26 + $0x20] sm:$0xff] %v170_v4   ;;  %175 = vst [vmem:[%s3329_s26 + $0x28] sm:$0xff] %v174_v5   ;;  %v182_v7 = vld [vmem:[%s3324_s25 + $0x38] sm:$0xff]   ;;  %v186_v8 = vld [vmem:[%s3324_s25 + $0x40] sm:$0xff]  }
  0x14   : > { %179 = vst [vmem:[%s3329_s26 + $0x30] sm:$0xff] %v178_v6   ;;  %183 = vst [vmem:[%s3329_s26 + $0x38] sm:$0xff] %v182_v7   ;;  %v190_v9 = vld [vmem:[%s3324_s25 + $0x48] sm:$0xff]   ;;  %v194_v10 = vld [vmem:[%s3324_s25 + $0x50] sm:$0xff]  }
  0x15   : > { %187 = vst [vmem:[%s3329_s26 + $0x40] sm:$0xff] %v186_v8   ;;  %v198_v11 = vld [vmem:[%s3324_s25 + $0x58] sm:$0xff]   ;;  %191 = vst [vmem:[%s3329_s26 + $0x48] sm:$0xff] %v190_v9   ;;  %v202_v12 = vld [vmem:[%s3324_s25 + $0x60] sm:$0xff]  }
  0x16   : > { %195 = vst [vmem:[%s3329_s26 + $0x50] sm:$0xff] %v194_v10   ;;  %199 = vst [vmem:[%s3329_s26 + $0x58] sm:$0xff] %v198_v11   ;;  %v206_v13 = vld [vmem:[%s3324_s25 + $0x68] sm:$0xff]   ;;  %v210_v14 = vld [vmem:[%s3324_s25 + $0x70] sm:$0xff]  }
  0x17   : > { %203 = vst [vmem:[%s3329_s26 + $0x60] sm:$0xff] %v202_v12   ;;  %207 = vst [vmem:[%s3329_s26 + $0x68] sm:$0xff] %v206_v13   ;;  %v214_v15 = vld [vmem:[%s3324_s25 + $0x78] sm:$0xff]   ;;  %v218_v16 = vld [vmem:[%s3324_s25 + $0x80] sm:$0xff]  }
  0x18   : > { %211 = vst [vmem:[%s3329_s26 + $0x70] sm:$0xff] %v210_v14   ;;  %v222_v17 = vld [vmem:[%s3324_s25 + $0x88] sm:$0xff]   ;;  %215 = vst [vmem:[%s3329_s26 + $0x78] sm:$0xff] %v214_v15   ;;  %v226_v18 = vld [vmem:[%s3324_s25 + $0x90] sm:$0xff]  }
  0x19   : > { %219 = vst [vmem:[%s3329_s26 + $0x80] sm:$0xff] %v218_v16   ;;  %223 = vst [vmem:[%s3329_s26 + $0x88] sm:$0xff] %v222_v17   ;;  %v230_v19 = vld [vmem:[%s3324_s25 + $0x130] sm:$0xff]   ;;  %v234_v20 = vld [vmem:[%s3324_s25 + $0x138] sm:$0xff]  }
  0x1a   : > { %227 = vst [vmem:[%s3329_s26 + $0x90] sm:$0xff] %v226_v18   ;;  %231 = vst [vmem:[%s3329_s26 + $0x98] sm:$0xff] %v230_v19   ;;  %v238_v21 = vld [vmem:[%s3324_s25 + $0x140] sm:$0xff]   ;;  %v242_v22 = vld [vmem:[%s3324_s25 + $0x148] sm:$0xff]  }
  0x1b   : > { %235 = vst [vmem:[%s3329_s26 + $0xa0] sm:$0xff] %v234_v20   ;;  %v246_v23 = vld [vmem:[%s3324_s25 + $0x150] sm:$0xff]   ;;  %239 = vst [vmem:[%s3329_s26 + $0xa8] sm:$0xff] %v238_v21   ;;  %v250_v24 = vld [vmem:[%s3324_s25 + $0x158] sm:$0xff]  }
  0x1c   : > { %243 = vst [vmem:[%s3329_s26 + $0xb0] sm:$0xff] %v242_v22   ;;  %247 = vst [vmem:[%s3329_s26 + $0xb8] sm:$0xff] %v246_v23   ;;  %v254_v25 = vld [vmem:[%s3324_s25 + $0x160] sm:$0xff]   ;;  %v258_v26 = vld [vmem:[%s3324_s25 + $0x168] sm:$0xff]  }
  0x1d   : > { %251 = vst [vmem:[%s3329_s26 + $0xc0] sm:$0xff] %v250_v24   ;;  %255 = vst [vmem:[%s3329_s26 + $0xc8] sm:$0xff] %v254_v25   ;;  %v262_v27 = vld [vmem:[%s3324_s25 + $0x170] sm:$0xff]   ;;  %v266_v28 = vld [vmem:[%s3324_s25 + $0x178] sm:$0xff]  }
  0x1e   : > { %259 = vst [vmem:[%s3329_s26 + $0xd0] sm:$0xff] %v258_v26   ;;  %v270_v29 = vld [vmem:[%s3324_s25 + $0x180] sm:$0xff]   ;;  %263 = vst [vmem:[%s3329_s26 + $0xd8] sm:$0xff] %v262_v27   ;;  %v274_v30 = vld [vmem:[%s3324_s25 + $0x188] sm:$0xff]  }
  0x1f   : > { %267 = vst [vmem:[%s3329_s26 + $0xe0] sm:$0xff] %v266_v28   ;;  %271 = vst [vmem:[%s3329_s26 + $0xe8] sm:$0xff] %v270_v29   ;;  %v278_v31 = vld [vmem:[%s3324_s25 + $0x190] sm:$0xff]   ;;  %v282_v32 = vld [vmem:[%s3324_s25 + $0x198] sm:$0xff]  }
  0x20   : > { %275 = vst [vmem:[%s3329_s26 + $0xf0] sm:$0xff] %v274_v30   ;;  %279 = vst [vmem:[%s3329_s26 + $0xf8] sm:$0xff] %v278_v31   ;;  %v286_v33 = vld [vmem:[%s3324_s25 + $0x1a0] sm:$0xff]   ;;  %v290_v34 = vld [vmem:[%s3324_s25 + $0x1a8] sm:$0xff]  }
  0x21   : > { %283 = vst [vmem:[%s3329_s26 + $0x100] sm:$0xff] %v282_v32   ;;  %v294_v35 = vld [vmem:[%s3324_s25 + $0x1b0] sm:$0xff]   ;;  %287 = vst [vmem:[%s3329_s26 + $0x108] sm:$0xff] %v286_v33   ;;  %v298_v36 = vld [vmem:[%s3324_s25 + $0x1b8] sm:$0xff]  }
  0x22   : > { %291 = vst [vmem:[%s3329_s26 + $0x110] sm:$0xff] %v290_v34   ;;  %295 = vst [vmem:[%s3329_s26 + $0x118] sm:$0xff] %v294_v35   ;;  %v302_v37 = vld [vmem:[%s3324_s25 + $0x1c0] sm:$0xff]   ;;  %v310_v39 = vld [vmem:[%s3324_s25 + $0x268] sm:$0xff]  }
  0x23   : > { %v306_v38 = vld [vmem:[%s3324_s25 + $0x260] sm:$0xff]   ;;  %299 = vst [vmem:[%s3329_s26 + $0x120] sm:$0xff] %v298_v36   ;;  %303 = vst [vmem:[%s3329_s26 + $0x128] sm:$0xff] %v302_v37   ;;  %v314_v40 = vld [vmem:[%s3324_s25 + $0x270] sm:$0xff]  }
  0x24   : > { %307 = vst [vmem:[%s3329_s26 + $0x130] sm:$0xff] %v306_v38   ;;  %v318_v41 = vld [vmem:[%s3324_s25 + $0x278] sm:$0xff]   ;;  %311 = vst [vmem:[%s3329_s26 + $0x138] sm:$0xff] %v310_v39   ;;  %v322_v42 = vld [vmem:[%s3324_s25 + $0x280] sm:$0xff]  }
  0x25   : > { %315 = vst [vmem:[%s3329_s26 + $0x140] sm:$0xff] %v314_v40   ;;  %319 = vst [vmem:[%s3329_s26 + $0x148] sm:$0xff] %v318_v41   ;;  %v326_v43 = vld [vmem:[%s3324_s25 + $0x288] sm:$0xff]   ;;  %v330_v44 = vld [vmem:[%s3324_s25 + $0x290] sm:$0xff]  }
  0x26   : > { %323 = vst [vmem:[%s3329_s26 + $0x150] sm:$0xff] %v322_v42   ;;  %327 = vst [vmem:[%s3329_s26 + $0x158] sm:$0xff] %v326_v43   ;;  %v334_v45 = vld [vmem:[%s3324_s25 + $0x298] sm:$0xff]   ;;  %v338_v46 = vld [vmem:[%s3324_s25 + $0x2a0] sm:$0xff]  }
  0x27   : > { %331 = vst [vmem:[%s3329_s26 + $0x160] sm:$0xff] %v330_v44   ;;  %v342_v47 = vld [vmem:[%s3324_s25 + $0x2a8] sm:$0xff]   ;;  %335 = vst [vmem:[%s3329_s26 + $0x168] sm:$0xff] %v334_v45   ;;  %v346_v48 = vld [vmem:[%s3324_s25 + $0x2b0] sm:$0xff]  }
  0x28   : > { %339 = vst [vmem:[%s3329_s26 + $0x170] sm:$0xff] %v338_v46   ;;  %343 = vst [vmem:[%s3329_s26 + $0x178] sm:$0xff] %v342_v47   ;;  %v350_v49 = vld [vmem:[%s3324_s25 + $0x2b8] sm:$0xff]   ;;  %v354_v50 = vld [vmem:[%s3324_s25 + $0x2c0] sm:$0xff]  }
  0x29   : > { %347 = vst [vmem:[%s3329_s26 + $0x180] sm:$0xff] %v346_v48   ;;  %351 = vst [vmem:[%s3329_s26 + $0x188] sm:$0xff] %v350_v49   ;;  %v358_v51 = vld [vmem:[%s3324_s25 + $0x2c8] sm:$0xff]   ;;  %v362_v52 = vld [vmem:[%s3324_s25 + $0x2d0] sm:$0xff]  }
  0x2a   : > { %355 = vst [vmem:[%s3329_s26 + $0x190] sm:$0xff] %v354_v50   ;;  %v366_v53 = vld [vmem:[%s3324_s25 + $0x2d8] sm:$0xff]   ;;  %359 = vst [vmem:[%s3329_s26 + $0x198] sm:$0xff] %v358_v51   ;;  %v370_v54 = vld [vmem:[%s3324_s25 + $0x2e0] sm:$0xff]  }
  0x2b   : > { %363 = vst [vmem:[%s3329_s26 + $0x1a0] sm:$0xff] %v362_v52   ;;  %367 = vst [vmem:[%s3329_s26 + $0x1a8] sm:$0xff] %v366_v53   ;;  %v374_v55 = vld [vmem:[%s3324_s25 + $0x2e8] sm:$0xff]   ;;  %v378_v56 = vld [vmem:[%s3324_s25 + $0x2f0] sm:$0xff]  }
  0x2c   : > { %371 = vst [vmem:[%s3329_s26 + $0x1b0] sm:$0xff] %v370_v54   ;;  %375 = vst [vmem:[%s3329_s26 + $0x1b8] sm:$0xff] %v374_v55   ;;  %v382_v57 = vld [vmem:[%s3324_s25 + $0x390] sm:$0xff]   ;;  %v386_v58 = vld [vmem:[%s3324_s25 + $0x398] sm:$0xff]  }
  0x2d   : > { %379 = vst [vmem:[%s3329_s26 + $0x1c0] sm:$0xff] %v378_v56   ;;  %v390_v59 = vld [vmem:[%s3324_s25 + $0x3a0] sm:$0xff]   ;;  %383 = vst [vmem:[%s3329_s26 + $0x1c8] sm:$0xff] %v382_v57   ;;  %v394_v60 = vld [vmem:[%s3324_s25 + $0x3a8] sm:$0xff]  }
  0x2e   : > { %387 = vst [vmem:[%s3329_s26 + $0x1d0] sm:$0xff] %v386_v58   ;;  %391 = vst [vmem:[%s3329_s26 + $0x1d8] sm:$0xff] %v390_v59   ;;  %v398_v61 = vld [vmem:[%s3324_s25 + $0x3b0] sm:$0xff]   ;;  %v402_v62 = vld [vmem:[%s3324_s25 + $0x3b8] sm:$0xff]  }
  0x2f   : > { %395 = vst [vmem:[%s3329_s26 + $0x1e0] sm:$0xff] %v394_v60   ;;  %399 = vst [vmem:[%s3329_s26 + $0x1e8] sm:$0xff] %v398_v61   ;;  %v406_v63 = vld [vmem:[%s3324_s25 + $0x3c0] sm:$0xff]   ;;  %v410_v0 = vld [vmem:[%s3324_s25 + $0x3c8] sm:$0xff]  }
  0x30   : > { %403 = vst [vmem:[%s3329_s26 + $0x1f0] sm:$0xff] %v402_v62   ;;  %v414_v1 = vld [vmem:[%s3324_s25 + $0x3d0] sm:$0xff]   ;;  %407 = vst [vmem:[%s3329_s26 + $0x1f8] sm:$0xff] %v406_v63   ;;  %v418_v2 = vld [vmem:[%s3324_s25 + $0x3d8] sm:$0xff]  }
  0x31   : > { %411 = vst [vmem:[%s3329_s26 + $0x200] sm:$0xff] %v410_v0   ;;  %415 = vst [vmem:[%s3329_s26 + $0x208] sm:$0xff] %v414_v1   ;;  %v422_v3 = vld [vmem:[%s3324_s25 + $0x3e0] sm:$0xff]   ;;  %v426_v4 = vld [vmem:[%s3324_s25 + $0x3e8] sm:$0xff]  }
  0x32   : > { %419 = vst [vmem:[%s3329_s26 + $0x210] sm:$0xff] %v418_v2   ;;  %423 = vst [vmem:[%s3329_s26 + $0x218] sm:$0xff] %v422_v3   ;;  %v430_v5 = vld [vmem:[%s3324_s25 + $0x3f0] sm:$0xff]   ;;  %v434_v6 = vld [vmem:[%s3324_s25 + $0x3f8] sm:$0xff]  }
  0x33   : > { %427 = vst [vmem:[%s3329_s26 + $0x220] sm:$0xff] %v426_v4   ;;  %v438_v7 = vld [vmem:[%s3324_s25 + $0x400] sm:$0xff]   ;;  %431 = vst [vmem:[%s3329_s26 + $0x228] sm:$0xff] %v430_v5   ;;  %v442_v8 = vld [vmem:[%s3324_s25 + $0x408] sm:$0xff]  }
  0x34   : > { %435 = vst [vmem:[%s3329_s26 + $0x230] sm:$0xff] %v434_v6   ;;  %439 = vst [vmem:[%s3329_s26 + $0x238] sm:$0xff] %v438_v7   ;;  %v446_v9 = vld [vmem:[%s3324_s25 + $0x410] sm:$0xff]   ;;  %v450_v10 = vld [vmem:[%s3324_s25 + $0x418] sm:$0xff]  }
  0x35   : > { %443 = vst [vmem:[%s3329_s26 + $0x240] sm:$0xff] %v442_v8   ;;  %447 = vst [vmem:[%s3329_s26 + $0x248] sm:$0xff] %v446_v9   ;;  %v454_v11 = vld [vmem:[%s3324_s25 + $0x420] sm:$0xff]  }
  0x36   : > { %451 = vst [vmem:[%s3329_s26 + $0x250] sm:$0xff] %v450_v10   ;;  %455 = vst [vmem:[%s3329_s26 + $0x258] sm:$0xff] %v454_v11  }
  0x37 PF: > { %p2589_p5 = scmp.ge.s32.totalorder %s3268_s14, 1  ;;  %p784_p6 = scmp.lt.s32.totalorder %s3268_s14, 3 }
  0x39   : > { %p785_p7 = pnand %p2589_p5, %p784_p6 }
  0x3b   : > { %788 = sbr.rel (%p785_p7) target bundleno = 451 (0x1c3), region = 69 }
  0x40   : > { %v3162_v12 = vld [vmem:[%s3893_s1 + $0x38] sm:$0xff]   ;;  %s791_s29 = sand.u32 1, %s3260_s12   ;;  %v3163_v13 = vld [vmem:[%s3893_s1 + $0x30] sm:$0xff]   ;;  %v3164_v14 = vld [vmem:[%s3893_s1 + $0x28] sm:$0xff]   ;;  %s815_s24 = smul.u32 38, %s2584_s15 }
  0x41   : > { %s3137_s5 = smul.u32 608, %s791_s29  ;;  %2952 = vmatprep.subr.bf16.mxu0 %v3162_v12  ;;  %3120 = vmatprep.subr.bf16.mxu1 %v3162_v12  ;;  %v3165_v15 = vld [vmem:[%s3893_s1 + $0x20] sm:$0xff]   ;;  %v3166_v18 = vld [vmem:[%s3893_s1 + $0x18] sm:$0xff]   ;;  %v3167_v19 = vld [vmem:[%s3893_s1 + $0x10] sm:$0xff]  }
  0x42   : > { %2953 = vmatpush3.bf16.msra.mxu0 %v3162_v12  ;;  %3128 = vmatpush3.bf16.msra.mxu1 %v3162_v12  ;;  %v3168_v20 = vld [vmem:[%s3893_s1 + $0x8] sm:$0xff]   ;;  %v3169_v21 = vld [vmem:[%s3893_s1] sm:$0xff]   ;;  %p816_p8 = scmp.lt.s32.totalorder %s815_s24, 75 }
  0x43   : > { %2954 = vmatprep.subr.bf16.mxu0 %v3163_v13  ;;  %3121 = vmatprep.subr.bf16.mxu1 %v3163_v13  ;;  %s3495_s10 = scalar_lea.vmem [#allocation2], %s3137_s5 }
  0x44   : > { %v3170_v16 = vld [vmem:[%s3495_s10] sm:$0xff]   ;;  %v3171_v17 = vld [vmem:[%s3495_s10 + $0x130] sm:$0xff]   ;;  %v3172_v22 = vld [vmem:[%s3495_s10 + $0x8] sm:$0xff]   ;;  %s3950_s24 = smov (!%p816_p8, %s815_s24), 75 }
  0x45   : > { %2968 = vmatprep.mubr.bf16.mxu0 %v3170_v16  ;;  %3044 = vmatprep.mubr.bf16.mxu1 %v3171_v17  ;;  %v3173_v23 = vld [vmem:[%s3495_s10 + $0x138] sm:$0xff]   ;;  %v3174_v24 = vld [vmem:[%s3495_s10 + $0x10] sm:$0xff]   ;;  %v3175_v25 = vld [vmem:[%s3495_s10 + $0x140] sm:$0xff]   ;;  %s2590_s14 = sshll.u32 %s3950_s24, 2 }
  0x46   : > { %2955 = vmatpush3.bf16.msra.mxu0 %v3163_v13  ;;  %3129 = vmatpush3.bf16.msra.mxu1 %v3163_v13  ;;  %v3176_v26 = vld [vmem:[%s3495_s10 + $0x18] sm:$0xff]   ;;  %v3177_v27 = vld [vmem:[%s3495_s10 + $0x148] sm:$0xff]   ;;  %v3178_v28 = vld [vmem:[%s3495_s10 + $0x20] sm:$0xff]   ;;  %s3757_s28 = scalar_lea.vmem %s3895_s3, %s2590_s14 }
  0x47   : > { %2956 = vmatprep.subr.bf16.mxu0 %v3164_v14  ;;  %3122 = vmatprep.subr.bf16.mxu1 %v3164_v14  ;;  %v3179_v29 = vld [vmem:[%s3495_s10 + $0x150] sm:$0xff]   ;;  %v3180_v30 = vld [vmem:[%s3495_s10 + $0x28] sm:$0xff]   ;;  %v3181_v31 = vld [vmem:[%s3495_s10 + $0x158] sm:$0xff]  }
  0x48   : > { %v3182_v32 = vld [vmem:[%s3495_s10 + $0x30] sm:$0xff]   ;;  %v3183_v33 = vld [vmem:[%s3495_s10 + $0x160] sm:$0xff]   ;;  %v3184_v34 = vld [vmem:[%s3495_s10 + $0x38] sm:$0xff]  }
  0x49   : > { %v3185_v35 = vld [vmem:[%s3495_s10 + $0x168] sm:$0xff]   ;;  %v3186_v36 = vld [vmem:[%s3495_s10 + $0x40] sm:$0xff]   ;;  %v3187_v37 = vld [vmem:[%s3495_s10 + $0x170] sm:$0xff]  }
  0x4a   : > { %2957 = vmatpush3.bf16.msra.mxu0 %v3164_v14  ;;  %3130 = vmatpush3.bf16.msra.mxu1 %v3164_v14  ;;  %v3188_v38 = vld [vmem:[%s3495_s10 + $0x48] sm:$0xff]   ;;  %v3189_v39 = vld [vmem:[%s3495_s10 + $0x178] sm:$0xff]   ;;  %v3190_v40 = vld [vmem:[%s3495_s10 + $0x50] sm:$0xff]  }
  0x4b   : > { %2958 = vmatprep.subr.bf16.mxu0 %v3165_v15  ;;  %3123 = vmatprep.subr.bf16.mxu1 %v3165_v15  ;;  %v3191_v41 = vld [vmem:[%s3495_s10 + $0x180] sm:$0xff]   ;;  %v3192_v42 = vld [vmem:[%s3495_s10 + $0x58] sm:$0xff]   ;;  %v3193_v43 = vld [vmem:[%s3495_s10 + $0x188] sm:$0xff]  }
  0x4c   : > { %v3194_v44 = vld [vmem:[%s3495_s10 + $0x60] sm:$0xff]   ;;  %v3195_v45 = vld [vmem:[%s3495_s10 + $0x190] sm:$0xff]   ;;  %v3196_v46 = vld [vmem:[%s3495_s10 + $0x68] sm:$0xff]  }
  0x4d   : > { %v3197_v47 = vld [vmem:[%s3495_s10 + $0x198] sm:$0xff]   ;;  %v3198_v48 = vld [vmem:[%s3495_s10 + $0x70] sm:$0xff]   ;;  %v3199_v49 = vld [vmem:[%s3495_s10 + $0x1a0] sm:$0xff]  }
  0x4e   : > { %2959 = vmatpush3.bf16.msra.mxu0 %v3165_v15  ;;  %3131 = vmatpush3.bf16.msra.mxu1 %v3165_v15  ;;  %v3200_v50 = vld [vmem:[%s3495_s10 + $0x78] sm:$0xff]   ;;  %v3201_v51 = vld [vmem:[%s3495_s10 + $0x1a8] sm:$0xff]   ;;  %v3202_v52 = vld [vmem:[%s3495_s10 + $0x80] sm:$0xff]  }
  0x4f   : > { %2960 = vmatprep.subr.bf16.mxu0 %v3166_v18  ;;  %3124 = vmatprep.subr.bf16.mxu1 %v3166_v18  ;;  %v3203_v53 = vld [vmem:[%s3495_s10 + $0x1b0] sm:$0xff]   ;;  %v3204_v54 = vld [vmem:[%s3495_s10 + $0x88] sm:$0xff]   ;;  %v3205_v55 = vld [vmem:[%s3495_s10 + $0x1b8] sm:$0xff]  }
  0x50   : > { %v3206_v56 = vld [vmem:[%s3495_s10 + $0x90] sm:$0xff]   ;;  %v3207_v57 = vld [vmem:[%s3495_s10 + $0x1c0] sm:$0xff]   ;;  %v3208_v58 = vld [vmem:[%s3495_s10 + $0x98] sm:$0xff]  }
  0x51   : > { %v3209_v59 = vld [vmem:[%s3495_s10 + $0x1c8] sm:$0xff]   ;;  %v3210_v60 = vld [vmem:[%s3495_s10 + $0xa0] sm:$0xff]   ;;  %v3211_v61 = vld [vmem:[%s3495_s10 + $0x1d0] sm:$0xff]  }
  0x52   : > { %2961 = vmatpush3.bf16.msra.mxu0 %v3166_v18  ;;  %3132 = vmatpush3.bf16.msra.mxu1 %v3166_v18  ;;  %v3212_v62 = vld [vmem:[%s3495_s10 + $0xa8] sm:$0xff]   ;;  %v3213_v63 = vld [vmem:[%s3495_s10 + $0x1d8] sm:$0xff]   ;;  %v3214_v0 = vld [vmem:[%s3495_s10 + $0xb0] sm:$0xff]  }
  0x53   : > { %2962 = vmatprep.subr.bf16.mxu0 %v3167_v19  ;;  %3125 = vmatprep.subr.bf16.mxu1 %v3167_v19  ;;  %v3215_v1 = vld [vmem:[%s3495_s10 + $0x1e0] sm:$0xff]   ;;  %v3216_v2 = vld [vmem:[%s3495_s10 + $0xb8] sm:$0xff]   ;;  %v3217_v3 = vld [vmem:[%s3495_s10 + $0x1e8] sm:$0xff]  }
  0x54   : > { %v3218_v4 = vld [vmem:[%s3495_s10 + $0xc0] sm:$0xff]   ;;  %v3219_v5 = vld [vmem:[%s3495_s10 + $0x1f0] sm:$0xff]   ;;  %v3220_v6 = vld [vmem:[%s3495_s10 + $0xc8] sm:$0xff]  }
  0x55   : > { %v3221_v7 = vld [vmem:[%s3495_s10 + $0x1f8] sm:$0xff]   ;;  %v3222_v8 = vld [vmem:[%s3495_s10 + $0xd0] sm:$0xff]   ;;  %v3223_v9 = vld [vmem:[%s3495_s10 + $0x200] sm:$0xff]  }
  0x56   : > { %2963 = vmatpush3.bf16.msra.mxu0 %v3167_v19  ;;  %3133 = vmatpush3.bf16.msra.mxu1 %v3167_v19  ;;  %v3224_v10 = vld [vmem:[%s3495_s10 + $0xd8] sm:$0xff]   ;;  %v3225_v11 = vld [vmem:[%s3495_s10 + $0x208] sm:$0xff]   ;;  %v3226_v12 = vld [vmem:[%s3495_s10 + $0xe0] sm:$0xff]  }
  0x57   : > { %2964 = vmatprep.subr.bf16.mxu0 %v3168_v20  ;;  %3126 = vmatprep.subr.bf16.mxu1 %v3168_v20  ;;  %v3227_v13 = vld [vmem:[%s3495_s10 + $0x210] sm:$0xff]   ;;  %v3228_v14 = vld [vmem:[%s3495_s10 + $0xe8] sm:$0xff]   ;;  %v3229_v15 = vld [vmem:[%s3495_s10 + $0x218] sm:$0xff]  }
  0x58   : > { %v3230_v16 = vld [vmem:[%s3495_s10 + $0xf0] sm:$0xff]   ;;  %v3231_v17 = vld [vmem:[%s3495_s10 + $0x220] sm:$0xff]   ;;  %v3232_v18 = vld [vmem:[%s3495_s10 + $0xf8] sm:$0xff]  }
  0x59   : > { %v3233_v19 = vld [vmem:[%s3495_s10 + $0x228] sm:$0xff]  }
  0x5a   : > { %2965 = vmatpush3.bf16.msra.mxu0 %v3168_v20  ;;  %3134 = vmatpush3.bf16.msra.mxu1 %v3168_v20  ;;  %v3234_v20 = vld [vmem:[%s3495_s10 + $0x100] sm:$0xff]  }
  0x5b   : > { %2966 = vmatprep.subr.bf16.mxu0 %v3169_v21  ;;  %3127 = vmatprep.subr.bf16.mxu1 %v3169_v21 }
  0x5e   : > { %2967 = vmatpush3.bf16.msra.mxu0 %v3169_v21  ;;  %3135 = vmatpush3.bf16.msra.mxu1 %v3169_v21  ;;  %v3235_v21 = vld [vmem:[%s3495_s10 + $0x230] sm:$0xff]  }
  0x61   : > { %2969 = vmatmul.mubr.bf16.vlgmr.msra.gmra.mxu0 %v3172_v22  ;;  %3045 = vmatmul.mubr.bf16.vlgmr.msra.gmra.mxu1 %v3173_v23  ;;  %v3236_v22 = vld [vmem:[%s3495_s10 + $0x108] sm:$0xff]   ;;  %v3237_v23 = vld [vmem:[%s3495_s10 + $0x238] sm:$0xff]  }
  0x62   : > { %2972 = vmatprep.mubr.bf16.mxu0 %v3174_v24  ;;  %3048 = vmatprep.mubr.bf16.mxu1 %v3175_v25  ;;  %v3238_v24 = vld [vmem:[%s3495_s10 + $0x110] sm:$0xff]   ;;  %v3239_v25 = vld [vmem:[%s3495_s10 + $0x240] sm:$0xff]  }
  0x69   : > { %2973 = vmatmul.mubr.bf16.gmra.mxu0 %v3176_v26  ;;  %3049 = vmatmul.mubr.bf16.gmra.mxu1 %v3177_v27  ;;  %v3240_v26 = vld [vmem:[%s3495_s10 + $0x118] sm:$0xff]   ;;  %v3241_v27 = vld [vmem:[%s3495_s10 + $0x248] sm:$0xff]  }
  0x6a   : > { %2976 = vmatprep.mubr.bf16.mxu0 %v3178_v28  ;;  %3052 = vmatprep.mubr.bf16.mxu1 %v3179_v29  ;;  %v3242_v28 = vld [vmem:[%s3495_s10 + $0x120] sm:$0xff]   ;;  %v3243_v29 = vld [vmem:[%s3495_s10 + $0x250] sm:$0xff]  }
  0x71   : > { %2977 = vmatmul.mubr.bf16.gmra.mxu0 %v3180_v30  ;;  %3053 = vmatmul.mubr.bf16.gmra.mxu1 %v3181_v31  ;;  %v3244_v30 = vld [vmem:[%s3495_s10 + $0x128] sm:$0xff]   ;;  %v3245_v31 = vld [vmem:[%s3495_s10 + $0x258] sm:$0xff]  }
  0x72   : > { %2980 = vmatprep.mubr.bf16.mxu0 %v3182_v32  ;;  %3056 = vmatprep.mubr.bf16.mxu1 %v3183_v33 }
  0x79   : > { %2981 = vmatmul.mubr.bf16.gmra.mxu0 %v3184_v34  ;;  %3057 = vmatmul.mubr.bf16.gmra.mxu1 %v3185_v35 }
  0x7a   : > { %2984 = vmatprep.mubr.bf16.mxu0 %v3186_v36  ;;  %3060 = vmatprep.mubr.bf16.mxu1 %v3187_v37 }
  0x81   : > { %2985 = vmatmul.mubr.bf16.gmra.mxu0 %v3188_v38  ;;  %3061 = vmatmul.mubr.bf16.gmra.mxu1 %v3189_v39 }
  0x82   : > { %2988 = vmatprep.mubr.bf16.mxu0 %v3190_v40  ;;  %3064 = vmatprep.mubr.bf16.mxu1 %v3191_v41 }
  0x89   : > { %2989 = vmatmul.mubr.bf16.gmra.mxu0 %v3192_v42  ;;  %3065 = vmatmul.mubr.bf16.gmra.mxu1 %v3193_v43 }
  0x8a   : > { %2992 = vmatprep.mubr.bf16.mxu0 %v3194_v44  ;;  %3068 = vmatprep.mubr.bf16.mxu1 %v3195_v45 }
  0x91   : > { %2993 = vmatmul.mubr.bf16.gmra.mxu0 %v3196_v46  ;;  %3069 = vmatmul.mubr.bf16.gmra.mxu1 %v3197_v47 }
  0x92   : > { %2996 = vmatprep.mubr.bf16.mxu0 %v3198_v48  ;;  %3072 = vmatprep.mubr.bf16.mxu1 %v3199_v49 }
  0x99   : > { %2997 = vmatmul.mubr.bf16.gmra.mxu0 %v3200_v50  ;;  %3073 = vmatmul.mubr.bf16.gmra.mxu1 %v3201_v51 }
  0x9a   : > { %3000 = vmatprep.mubr.bf16.mxu0 %v3202_v52  ;;  %3076 = vmatprep.mubr.bf16.mxu1 %v3203_v53 }
  0xa1   : > { %3001 = vmatmul.mubr.bf16.gmra.mxu0 %v3204_v54  ;;  %3077 = vmatmul.mubr.bf16.gmra.mxu1 %v3205_v55 }
  0xa2   : > { %3004 = vmatprep.mubr.bf16.mxu0 %v3206_v56  ;;  %3080 = vmatprep.mubr.bf16.mxu1 %v3207_v57 }
  0xa9   : > { %3005 = vmatmul.mubr.bf16.gmra.mxu0 %v3208_v58  ;;  %3081 = vmatmul.mubr.bf16.gmra.mxu1 %v3209_v59 }
  0xaa   : > { %3008 = vmatprep.mubr.bf16.mxu0 %v3210_v60  ;;  %3084 = vmatprep.mubr.bf16.mxu1 %v3211_v61 }
  0xb1   : > { %3009 = vmatmul.mubr.bf16.gmra.mxu0 %v3212_v62  ;;  %3085 = vmatmul.mubr.bf16.gmra.mxu1 %v3213_v63 }
  0xb2   : > { %3012 = vmatprep.mubr.bf16.mxu0 %v3214_v0  ;;  %3088 = vmatprep.mubr.bf16.mxu1 %v3215_v1 }
  0xb9   : > { %3013 = vmatmul.mubr.bf16.gmra.mxu0 %v3216_v2  ;;  %3089 = vmatmul.mubr.bf16.gmra.mxu1 %v3217_v3 }
  0xba   : > { %3016 = vmatprep.mubr.bf16.mxu0 %v3218_v4  ;;  %3092 = vmatprep.mubr.bf16.mxu1 %v3219_v5 }
  0xc1   : > { %3017 = vmatmul.mubr.bf16.gmra.mxu0 %v3220_v6  ;;  %3093 = vmatmul.mubr.bf16.gmra.mxu1 %v3221_v7 }
  0xc2   : > { %3020 = vmatprep.mubr.bf16.mxu0 %v3222_v8  ;;  %3096 = vmatprep.mubr.bf16.mxu1 %v3223_v9 }
  0xc9   : > { %3021 = vmatmul.mubr.bf16.gmra.mxu0 %v3224_v10  ;;  %3097 = vmatmul.mubr.bf16.gmra.mxu1 %v3225_v11 }
  0xca   : > { %3024 = vmatprep.mubr.bf16.mxu0 %v3226_v12  ;;  %3100 = vmatprep.mubr.bf16.mxu1 %v3227_v13 }
  0xd1   : > { %3025 = vmatmul.mubr.bf16.gmra.mxu0 %v3228_v14  ;;  %3101 = vmatmul.mubr.bf16.gmra.mxu1 %v3229_v15 }
  0xd2   : > { %3028 = vmatprep.mubr.bf16.mxu0 %v3230_v16  ;;  %3104 = vmatprep.mubr.bf16.mxu1 %v3231_v17 }
  0xd9   : > { %3029 = vmatmul.mubr.bf16.gmra.mxu0 %v3232_v18  ;;  %3105 = vmatmul.mubr.bf16.gmra.mxu1 %v3233_v19 }
  0xda   : > { %3032 = vmatprep.mubr.bf16.mxu0 %v3234_v20  ;;  %3108 = vmatprep.mubr.bf16.mxu1 %v3235_v21 }
  0xe1   : > { %3033 = vmatmul.mubr.bf16.gmra.mxu0 %v3236_v22  ;;  %3109 = vmatmul.mubr.bf16.gmra.mxu1 %v3237_v23 }
  0xe2   : > { %3036 = vmatprep.mubr.bf16.mxu0 %v3238_v24  ;;  %3112 = vmatprep.mubr.bf16.mxu1 %v3239_v25 }
  0xe9   : > { %3037 = vmatmul.mubr.bf16.gmra.mxu0 %v3240_v26  ;;  %3113 = vmatmul.mubr.bf16.gmra.mxu1 %v3241_v27 }
  0xea   : > { %3040 = vmatprep.mubr.bf16.mxu0 %v3242_v28  ;;  %3116 = vmatprep.mubr.bf16.mxu1 %v3243_v29 }
  0xf1   : > { %3041 = vmatmul.mubr.bf16.gmra.mxu0 %v3244_v30  ;;  %3117 = vmatmul.mubr.bf16.gmra.mxu1 %v3245_v31 }
 0x121   : > { %v3585_v32 = vpop.f32.mrf.mxu0  ;;  %v3587_v33 = vpop.f32.mrf.mxu1 }
 0x123   : > { %v3589_v34 = vpop.f32.mrf.mxu0  ;;  %v3591_v35 = vpop.f32.mrf.mxu1 }
 0x125   : > { %v3593_v36 = vpop.f32.mrf.mxu0  ;;  %v3595_v37 = vpop.f32.mrf.mxu1 }
 0x127   : > { %v3597_v38 = vpop.f32.mrf.mxu0  ;;  %v3599_v39 = vpop.f32.mrf.mxu1 }
 0x129   : > { %v3601_v40 = vpop.f32.mrf.mxu0  ;;  %v3603_v41 = vpop.f32.mrf.mxu1 }
 0x12b   : > { %v3605_v42 = vpop.f32.mrf.mxu0  ;;  %v3607_v43 = vpop.f32.mrf.mxu1 }
 0x12d   : > { %v3609_v44 = vpop.f32.mrf.mxu0  ;;  %v3611_v45 = vpop.f32.mrf.mxu1 }
 0x12f   : > { %v3613_v46 = vpop.f32.mrf.mxu0  ;;  %v3615_v47 = vpop.f32.mrf.mxu1 }
 0x131   : > { %v3617_v48 = vpop.f32.mrf.mxu0  ;;  %v3619_v49 = vpop.f32.mrf.mxu1 }
 0x133   : > { %v3621_v50 = vpop.f32.mrf.mxu0  ;;  %v3623_v51 = vpop.f32.mrf.mxu1 }
 0x135   : > { %v3625_v52 = vpop.f32.mrf.mxu0  ;;  %v3627_v53 = vpop.f32.mrf.mxu1 }
 0x137   : > { %v3629_v54 = vpop.f32.mrf.mxu0  ;;  %v3631_v55 = vpop.f32.mrf.mxu1 }
 0x139   : > { %v3633_v56 = vpop.f32.mrf.mxu0  ;;  %v3635_v57 = vpop.f32.mrf.mxu1 }
 0x13b   : > { %v3637_v58 = vpop.f32.mrf.mxu0  ;;  %v3639_v59 = vpop.f32.mrf.mxu1 }
 0x13d   : > { %v3641_v60 = vpop.f32.mrf.mxu0  ;;  %v3643_v61 = vpop.f32.mrf.mxu1 }
 0x13f   : > { %v3645_v62 = vpop.f32.mrf.mxu0  ;;  %v3647_v63 = vpop.f32.mrf.mxu1 }
 0x141   : > { %v3649_v0 = vpop.f32.mrf.mxu0  ;;  %v3651_v1 = vpop.f32.mrf.mxu1 }
 0x143   : > { %v3653_v2 = vpop.f32.mrf.mxu0  ;;  %v3655_v3 = vpop.f32.mrf.mxu1 }
 0x145   : > { %v3657_v4 = vpop.f32.mrf.mxu0  ;;  %v3659_v5 = vpop.f32.mrf.mxu1 }
 0x147   : > { %v3661_v6 = vpop.f32.mrf.mxu0  ;;  %v3663_v7 = vpop.f32.mrf.mxu1 }
 0x149   : > { %v3665_v8 = vpop.f32.mrf.mxu0  ;;  %v3667_v9 = vpop.f32.mrf.mxu1 }
 0x14b   : > { %v3669_v10 = vpop.f32.mrf.mxu0  ;;  %v3671_v11 = vpop.f32.mrf.mxu1 }
 0x14d   : > { %v3673_v12 = vpop.f32.mrf.mxu0  ;;  %v3675_v13 = vpop.f32.mrf.mxu1 }
 0x14e   : > { %3896 = vst [vmem:[#allocation3_spill] sm:$0xff] %v3673_v12  ;;  %3897 = vst [vmem:[#allocation4_spill] sm:$0xff] %v3675_v13 }
 0x14f   : > { %v3677_v14 = vpop.f32.mrf.mxu0  ;;  %v3679_v15 = vpop.f32.mrf.mxu1 }
 0x151   : > { %v3681_v16 = vpop.f32.mrf.mxu0  ;;  %v3683_v17 = vpop.f32.mrf.mxu1 }
 0x152   : > { %3898 = vst [vmem:[#allocation5_spill] sm:$0xff] %v3681_v16  ;;  %3899 = vst [vmem:[#allocation6_spill] sm:$0xff] %v3683_v17 }
 0x153   : > { %v3685_v18 = vpop.f32.mrf.mxu0  ;;  %v3687_v19 = vpop.f32.mrf.mxu1 }
 0x155   : > { %v3689_v20 = vpop.f32.mrf.mxu0  ;;  %v3691_v21 = vpop.f32.mrf.mxu1 }
 0x156   : > { %3900 = vst [vmem:[#allocation7_spill] sm:$0xff] %v3689_v20  ;;  %3901 = vst [vmem:[#allocation8_spill] sm:$0xff] %v3691_v21 }
 0x157   : > { %v3693_v22 = vpop.f32.mrf.mxu0  ;;  %v3695_v23 = vpop.f32.mrf.mxu1 }
 0x159   : > { %v3697_v24 = vpop.f32.mrf.mxu0  ;;  %v3699_v25 = vpop.f32.mrf.mxu1 }
 0x15a   : > { %3902 = vst [vmem:[#allocation9_spill] sm:$0xff] %v3697_v24  ;;  %3903 = vst [vmem:[#allocation10_spill] sm:$0xff] %v3699_v25 }
 0x15b   : > { %v3701_v26 = vpop.f32.mrf.mxu0  ;;  %v3703_v27 = vpop.f32.mrf.mxu1 }
 0x15c   : > { %3904 = vst [vmem:[#allocation11_spill] sm:$0xff] %v3701_v26  ;;  %3905 = vst [vmem:[#allocation12_spill] sm:$0xff] %v3703_v27 }
 0x15d   : > { %v3705_v28 = vpop.f32.mrf.mxu0  ;;  %v3707_v29 = vpop.f32.mrf.mxu1 }
 0x15e   : > { %3906 = vst [vmem:[#allocation13_spill] sm:$0xff] %v3705_v28  ;;  %3907 = vst [vmem:[#allocation14_spill] sm:$0xff] %v3707_v29 }
 0x15f   : > { %v3709_v30 = vpop.f32.mrf.mxu0  ;;  %v3711_v31 = vpop.f32.mrf.mxu1 }
 0x160   : > { %3908 = vst [vmem:[#allocation15_spill] sm:$0xff] %v3709_v30  ;;  %3909 = vst [vmem:[#allocation16_spill] sm:$0xff] %v3711_v31 }
 0x161   : > { %v3713_v21 = vpop.f32.mrf.mxu0  ;;  %v3715_v20 = vpop.f32.mrf.mxu1 }
 0x162   : > { %3910 = vst [vmem:[#allocation17_spill] sm:$0xff] %v3713_v21  ;;  %3911 = vst [vmem:[#allocation18_spill] sm:$0xff] %v3715_v20 }
 0x163   : > { %v3717_v17 = vpop.f32.mrf.mxu0  ;;  %v3719_v24 = vpop.f32.mrf.mxu1 }
 0x164   : > { %3912 = vst [vmem:[#allocation19_spill] sm:$0xff] %v3717_v17  ;;  %3913 = vst [vmem:[#allocation20_spill] sm:$0xff] %v3719_v24 }
 0x165   : > { %v3721_v25 = vpop.f32.mrf.mxu0  ;;  %v3723_v16 = vpop.f32.mrf.mxu1 }
 0x166   : > { %3914 = vst [vmem:[#allocation21_spill] sm:$0xff] %v3721_v25  ;;  %3915 = vst [vmem:[#allocation22_spill] sm:$0xff] %v3723_v16  ;;  %v3740_v16 = vld [vmem:[%s3894_s2] ss:$0 sm:$0xff] }
 0x167   : > { %v3727_v28 = vpop.f32.mrf.mxu0  ;;  %v3729_v29 = vpop.f32.mrf.mxu1 }
 0x168   : > { %3916 = vst [vmem:[#allocation23_spill] sm:$0xff] %v3727_v28  ;;  %3917 = vst [vmem:[#allocation24_spill] sm:$0xff] %v3729_v29 }
 0x169   : > { %v3006_v30 = vpop.f32.mrf.mxu0  ;;  %v3082_v31 = vpop.f32.mrf.mxu1 }
 0x16a   : > { %v2135_v21 = vmax.f32 %v3589_v34, %v3006_v30  ;;  %v2173_v20 = vmax.f32 %v3591_v35, %v3082_v31 }
 0x16b   : > { %v3733_v17 = vpop.f32.mrf.mxu0  ;;  %v3735_v24 = vpop.f32.mrf.mxu1 }
 0x16c   : > { %3918 = vst [vmem:[#allocation25_spill] sm:$0xff] %v3733_v17  ;;  %3919 = vst [vmem:[#allocation26_spill] sm:$0xff] %v3735_v24  ;;  %v2211_v25 = vmax.f32 %v2135_v21, %v2173_v20 }
 0x16d   : > { %v3007_v28 = vpop.f32.mrf.mxu0  ;;  %v3083_v27 = vpop.f32.mrf.mxu1 }
 0x16e   : > { %v2136_v29 = vmax.f32 %v3597_v38, %v3007_v28  ;;  %v2174_v34 = vmax.f32 %v3599_v39, %v3083_v27  ;;  %v2256_v31 = vadd.f32 %v3740_v16, %v2211_v25 }
 0x16f   : > { %v3744_v30 = vpop.f32.mrf.mxu0  ;;  %v3746_v35 = vpop.f32.mrf.mxu1 }
 0x170   : > { %3920 = vst [vmem:[#allocation27_spill] sm:$0xff] %v3746_v35  ;;  %v2212_v24 = vmax.f32 %v2136_v29, %v2174_v34  ;;  %v2294_v12 = vmax.f32 %v2256_v31, 0.0 }
 0x171   : > { %v3010_v20 = vpop.f32.mrf.mxu0  ;;  %v3086_v21 = vpop.f32.mrf.mxu1 }
 0x172   : > { %v2257_v17 = vadd.f32 %v3740_v16, %v2212_v24  ;;  %v2139_v26 = vmax.f32 %v3605_v42, %v3010_v20  ;;  %v2177_v13 = vmax.f32 %v3607_v43, %v3086_v21 }
 0x173   : > { %v1688_v38 = vpop.f32.mrf.mxu0  ;;  %v1992_v28 = vpop.f32.mrf.mxu1 }
 0x174   : > { %v2295_v39 = vmax.f32 %v2257_v17, 0.0  ;;  %v2137_v27 = vmax.f32 %v3585_v32, %v1688_v38  ;;  %v2175_v35 = vmax.f32 %v3587_v33, %v1992_v28  ;;  %v2215_v25 = vmax.f32 %v2139_v26, %v2177_v13 }
 0x175   : > { %v3011_v24 = vpop.f32.mrf.mxu0  ;;  %v3087_v29 = vpop.f32.mrf.mxu1 }
 0x176   : > { %v2758_v42 = vpack.c.bf16 %v2295_v39, %v2294_v12  ;;  %v2213_v34 = vmax.f32 %v2137_v27, %v2175_v35  ;;  %v2140_v43 = vmax.f32 %v3613_v46, %v3011_v24  ;;  %v2178_v31 = vmax.f32 %v3615_v47, %v3087_v29 }
 0x177   : > { %v1691_v17 = vpop.f32.mrf.mxu0  ;;  %v1995_v20 = vpop.f32.mrf.mxu1  ;;  %v2260_v21 = vadd.f32 %v3740_v16, %v2215_v25 }
 0x178   : > { %2759 = vst [vmem:[%s3757_s28] sm:$0xff] %v2758_v42   ;;  %v2138_v32 = vmax.f32 %v3593_v36, %v1691_v17  ;;  %v2176_v33 = vmax.f32 %v3595_v37, %v1995_v20  ;;  %v2216_v38 = vmax.f32 %v2140_v43, %v2178_v31  ;;  %v2258_v26 = vadd.f32 %v3740_v16, %v2213_v34 }
 0x179   : > { %v3014_v28 = vpop.f32.mrf.mxu0  ;;  %v3090_v13 = vpop.f32.mrf.mxu1  ;;  %v2298_v24 = vmax.f32 %v2260_v21, 0.0 }
 0x17a   : > { %v2214_v12 = vmax.f32 %v2138_v32, %v2176_v33  ;;  %v2143_v35 = vmax.f32 %v3621_v50, %v3014_v28  ;;  %v2181_v46 = vmax.f32 %v3623_v51, %v3090_v13  ;;  %v2261_v47 = vadd.f32 %v3740_v16, %v2216_v38 }
 0x17b   : > { %v1704_v39 = vpop.f32.mrf.mxu0  ;;  %v2008_v27 = vpop.f32.mrf.mxu1  ;;  %v2296_v31 = vmax.f32 %v2258_v26, 0.0 }
 0x17c   : > { %v2259_v36 = vadd.f32 %v3740_v16, %v2214_v12  ;;  %v2141_v37 = vmax.f32 %v3601_v40, %v1704_v39  ;;  %v2179_v25 = vmax.f32 %v3603_v41, %v2008_v27  ;;  %v2299_v29 = vmax.f32 %v2261_v47, 0.0 }
 0x17d   : > { %v2219_v42 = vmax.f32 %v2143_v35, %v2181_v46  ;;  %v3015_v34 = vpop.f32.mrf.mxu0  ;;  %v3091_v43 = vpop.f32.mrf.mxu1 }
 0x17e   : > { %v2297_v50 = vmax.f32 %v2259_v36, 0.0  ;;  %v2144_v51 = vmax.f32 %v3629_v54, %v3015_v34  ;;  %v2768_v17 = vpack.c.bf16 %v2299_v29, %v2298_v24  ;;  %v2217_v20 = vmax.f32 %v2141_v37, %v2179_v25 }
 0x17f   : > { %v2182_v32 = vmax.f32 %v3631_v55, %v3091_v43  ;;  %v1707_v33 = vpop.f32.mrf.mxu0  ;;  %v2011_v38 = vpop.f32.mrf.mxu1  ;;  %v2264_v21 = vadd.f32 %v3740_v16, %v2219_v42 }
 0x180   : > { %v2763_v40 = vpack.c.bf16 %v2297_v50, %v2296_v31  ;;  %v2142_v41 = vmax.f32 %v3609_v44, %v1707_v33  ;;  %2851 = vst [vmem:[%s3757_s28 + $0x10] sm:$0xff] %v2768_v17   ;;  %v2180_v13 = vmax.f32 %v3611_v45, %v2011_v38  ;;  %v2262_v55 = vadd.f32 %v3740_v16, %v2217_v20 }
 0x181   : > { %v2220_v28 = vmax.f32 %v2144_v51, %v2182_v32  ;;  %v3018_v26 = vpop.f32.mrf.mxu0  ;;  %v3094_v12 = vpop.f32.mrf.mxu1  ;;  %v2302_v45 = vmax.f32 %v2264_v21, 0.0 }
 0x182   : > { %2850 = vst [vmem:[%s3757_s28 + $0x8] sm:$0xff] %v2763_v40   ;;  %v2147_v54 = vmax.f32 %v3637_v58, %v3018_v26  ;;  %v2185_v35 = vmax.f32 %v3639_v59, %v3094_v12  ;;  %v2218_v47 = vmax.f32 %v2142_v41, %v2180_v13  ;;  %v2300_v34 = vmax.f32 %v2262_v55, 0.0 }
 0x183   : > { %v2265_v46 = vadd.f32 %v3740_v16, %v2220_v28  ;;  %v1720_v39 = vpop.f32.mrf.mxu0  ;;  %v2024_v44 = vpop.f32.mrf.mxu1 }
 0x184   : > { %v2223_v27 = vmax.f32 %v2147_v54, %v2185_v35  ;;  %v2145_v36 = vmax.f32 %v3617_v48, %v1720_v39  ;;  %v2183_v37 = vmax.f32 %v3619_v49, %v2024_v44  ;;  %v2263_v24 = vadd.f32 %v3740_v16, %v2218_v47 }
 0x185   : > { %v2303_v25 = vmax.f32 %v2265_v46, 0.0  ;;  %v3019_v58 = vpop.f32.mrf.mxu0  ;;  %v3095_v29 = vpop.f32.mrf.mxu1 }
 0x186   : > { %v2148_v59 = vmax.f32 %v3645_v62, %v3019_v58  ;;  %v2186_v42 = vmax.f32 %v3647_v63, %v3095_v29  ;;  %v2301_v31 = vmax.f32 %v2263_v24, 0.0  ;;  %v2221_v50 = vmax.f32 %v2145_v36, %v2183_v37 }
 0x187   : > { %v2778_v43 = vpack.c.bf16 %v2303_v25, %v2302_v45  ;;  %v1723_v51 = vpop.f32.mrf.mxu0  ;;  %v2027_v48 = vpop.f32.mrf.mxu1  ;;  %v2268_v49 = vadd.f32 %v3740_v16, %v2223_v27 }
 0x188   : > { %v2224_v17 = vmax.f32 %v2148_v59, %v2186_v42  ;;  %v2146_v20 = vmax.f32 %v3625_v52, %v1723_v51  ;;  %v2773_v32 = vpack.c.bf16 %v2301_v31, %v2300_v34  ;;  %v2184_v33 = vmax.f32 %v3627_v53, %v2027_v48 }
 0x189   : > { %2853 = vst [vmem:[%s3757_s28 + $0x20] sm:$0xff] %v2778_v43   ;;  %v3022_v38 = vpop.f32.mrf.mxu0  ;;  %v3098_v62 = vpop.f32.mrf.mxu1  ;;  %v2266_v21 = vadd.f32 %v3740_v16, %v2221_v50  ;;  %v2306_v12 = vmax.f32 %v2268_v49, 0.0 }
 0x18a   : > { %v2269_v63 = vadd.f32 %v3740_v16, %v2224_v17  ;;  %v2151_v40 = vmax.f32 %v3653_v2, %v3022_v38  ;;  %v2189_v41 = vmax.f32 %v3655_v3, %v3098_v62  ;;  %2852 = vst [vmem:[%s3757_s28 + $0x18] sm:$0xff] %v2773_v32   ;;  %v2222_v28 = vmax.f32 %v2146_v20, %v2184_v33 }
 0x18b   : > { %v1736_v13 = vpop.f32.mrf.mxu0  ;;  %v2040_v26 = vpop.f32.mrf.mxu1  ;;  %v2304_v44 = vmax.f32 %v2266_v21, 0.0 }
 0x18c   : > { %v2307_v52 = vmax.f32 %v2269_v63, 0.0  ;;  %v2149_v54 = vmax.f32 %v3633_v56, %v1736_v13  ;;  %v2187_v53 = vmax.f32 %v3635_v57, %v2040_v26  ;;  %v2267_v35 = vadd.f32 %v3740_v16, %v2222_v28 }
 0x18d   : > { %v2227_v55 = vmax.f32 %v2151_v40, %v2189_v41  ;;  %v3023_v46 = vpop.f32.mrf.mxu0  ;;  %v3099_v2 = vpop.f32.mrf.mxu1 }
 0x18e   : > { %v2788_v47 = vpack.c.bf16 %v2307_v52, %v2306_v12  ;;  %v2225_v3 = vmax.f32 %v2149_v54, %v2187_v53  ;;  %v2152_v39 = vmax.f32 %v3661_v6, %v3023_v46  ;;  %v2305_v27 = vmax.f32 %v2267_v35, 0.0 }
 0x18f   : > { %v2190_v36 = vmax.f32 %v3663_v7, %v3099_v2  ;;  %v1739_v37 = vpop.f32.mrf.mxu0  ;;  %v2043_v45 = vpop.f32.mrf.mxu1  ;;  %v2272_v24 = vadd.f32 %v3740_v16, %v2227_v55 }
 0x190   : > { %2855 = vst [vmem:[%s3757_s28 + $0x30] sm:$0xff] %v2788_v47   ;;  %v2150_v56 = vmax.f32 %v3641_v60, %v1739_v37  ;;  %v2188_v57 = vmax.f32 %v3643_v61, %v2043_v45  ;;  %v2783_v25 = vpack.c.bf16 %v2305_v27, %v2304_v44  ;;  %v2270_v6 = vadd.f32 %v3740_v16, %v2225_v3 }
 0x191   : > { %v2228_v58 = vmax.f32 %v2152_v39, %v2190_v36  ;;  %v3026_v29 = vpop.f32.mrf.mxu0  ;;  %v3102_v59 = vpop.f32.mrf.mxu1  ;;  %v2310_v48 = vmax.f32 %v2272_v24, 0.0 }
 0x192   : > { %v2226_v42 = vmax.f32 %v2150_v56, %v2188_v57  ;;  %v2155_v34 = vmax.f32 %v3669_v10, %v3026_v29  ;;  %v2193_v7 = vmax.f32 %v3671_v11, %v3102_v59  ;;  %2854 = vst [vmem:[%s3757_s28 + $0x28] sm:$0xff] %v2783_v25   ;;  %v2308_v10 = vmax.f32 %v2270_v6, 0.0  ;;  %v3921_v25 = vld [vmem:[#allocation3_spill] sm:$0xff]  ;;  %v3922_v29 = vld [vmem:[#allocation4_spill] sm:$0xff] }
 0x193   : > { %v2273_v43 = vadd.f32 %v3740_v16, %v2228_v58  ;;  %v1752_v31 = vpop.f32.mrf.mxu0  ;;  %v2056_v60 = vpop.f32.mrf.mxu1 }
 0x194   : > { %v2271_v61 = vadd.f32 %v3740_v16, %v2226_v42  ;;  %v2153_v50 = vmax.f32 %v3649_v0, %v1752_v31  ;;  %v2191_v51 = vmax.f32 %v3651_v1, %v2056_v60  ;;  %v2231_v17 = vmax.f32 %v2155_v34, %v2193_v7  ;;  %v3923_v42 = vld [vmem:[#allocation11_spill] sm:$0xff]  ;;  %v3924_v7 = vld [vmem:[#allocation12_spill] sm:$0xff] }
 0x195   : > { %v2311_v49 = vmax.f32 %v2273_v43, 0.0  ;;  %v3027_v20 = vpop.f32.mrf.mxu0  ;;  %v3103_v32 = vpop.f32.mrf.mxu1 }
 0x196   : > { %v2309_v11 = vmax.f32 %v2271_v61, 0.0  ;;  %v2156_v33 = vmax.f32 %v3677_v14, %v3027_v20  ;;  %v2229_v62 = vmax.f32 %v2153_v50, %v2191_v51  ;;  %v2194_v63 = vmax.f32 %v3679_v15, %v3103_v32  ;;  %v3926_v20 = vld [vmem:[#allocation6_spill] sm:$0xff] }
 0x197   : > { %v2798_v38 = vpack.c.bf16 %v2311_v49, %v2310_v48  ;;  %v1755_v40 = vpop.f32.mrf.mxu0  ;;  %v2059_v41 = vpop.f32.mrf.mxu1  ;;  %v2276_v21 = vadd.f32 %v3740_v16, %v2231_v17  ;;  %v3925_v49 = vld [vmem:[#allocation5_spill] sm:$0xff] }
 0x198   : > { %v2793_v0 = vpack.c.bf16 %v2309_v11, %v2308_v10  ;;  %v2154_v1 = vmax.f32 %v3657_v4, %v1755_v40  ;;  %v2232_v28 = vmax.f32 %v2156_v33, %v2194_v63  ;;  %v2192_v13 = vmax.f32 %v3659_v5, %v2059_v41  ;;  %v3927_v40 = vld [vmem:[#allocation15_spill] sm:$0xff] }
 0x199   : > { %2857 = vst [vmem:[%s3757_s28 + $0x40] sm:$0xff] %v2798_v38   ;;  %v3030_v26 = vpop.f32.mrf.mxu0  ;;  %v3106_v12 = vpop.f32.mrf.mxu1  ;;  %v2274_v15 = vadd.f32 %v3740_v16, %v2229_v62  ;;  %v2314_v5 = vmax.f32 %v2276_v21, 0.0  ;;  %v3928_v21 = vld [vmem:[#allocation16_spill] sm:$0xff] }
 0x19a   : > { %2856 = vst [vmem:[%s3757_s28 + $0x38] sm:$0xff] %v2793_v0   ;;  %v2159_v14 = vmax.f32 %v3685_v18, %v3030_v26  ;;  %v2197_v52 = vmax.f32 %v3687_v19, %v3106_v12  ;;  %v2277_v54 = vadd.f32 %v3740_v16, %v2232_v28  ;;  %v2230_v53 = vmax.f32 %v2154_v1, %v2192_v13  ;;  %v3929_v12 = vld [vmem:[#allocation7_spill] sm:$0xff] }
 0x19b   : > { %v1768_v35 = vpop.f32.mrf.mxu0  ;;  %v2072_v4 = vpop.f32.mrf.mxu1  ;;  %v2312_v27 = vmax.f32 %v2274_v15, 0.0 }
 0x19c   : > { %v2235_v55 = vmax.f32 %v2159_v14, %v2197_v52  ;;  %v2157_v46 = vmax.f32 %v3665_v8, %v1768_v35  ;;  %v2195_v2 = vmax.f32 %v3667_v9, %v2072_v4  ;;  %v2315_v47 = vmax.f32 %v2277_v54, 0.0  ;;  %v3930_v52 = vld [vmem:[#allocation8_spill] sm:$0xff] }
 0x19d   : > { %v2275_v3 = vadd.f32 %v3740_v16, %v2230_v53  ;;  %v3031_v18 = vpop.f32.mrf.mxu0  ;;  %v3107_v39 = vpop.f32.mrf.mxu1 }
 0x19e   : > { %v2160_v19 = vmax.f32 %v3693_v22, %v3031_v18  ;;  %v2198_v44 = vmax.f32 %v3695_v23, %v3107_v39  ;;  %v2808_v36 = vpack.c.bf16 %v2315_v47, %v2314_v5  ;;  %v2233_v45 = vmax.f32 %v2157_v46, %v2195_v2  ;;  %v3931_v5 = vld [vmem:[#allocation19_spill] sm:$0xff] }
 0x19f   : > { %v2313_v37 = vmax.f32 %v2275_v3, 0.0  ;;  %v1771_v56 = vpop.f32.mrf.mxu0  ;;  %v2075_v8 = vpop.f32.mrf.mxu1  ;;  %v2280_v9 = vadd.f32 %v3740_v16, %v2235_v55  ;;  %v3932_v3 = vld [vmem:[#allocation20_spill] sm:$0xff] }
 0x1a0   : > { %v2236_v57 = vmax.f32 %v2160_v19, %v2198_v44  ;;  %v2158_v24 = vmax.f32 %v3921_v25, %v1771_v56  ;;  %2859 = vst [vmem:[%s3757_s28 + $0x50] sm:$0xff] %v2808_v36   ;;  %v2196_v59 = vmax.f32 %v3922_v29, %v2075_v8  ;;  %v2278_v31 = vadd.f32 %v3740_v16, %v2233_v45  ;;  %v3933_v36 = vld [vmem:[#allocation9_spill] sm:$0xff]  ;;  %v3934_v45 = vld [vmem:[#allocation10_spill] sm:$0xff] }
 0x1a1   : > { %v2803_v58 = vpack.c.bf16 %v2313_v37, %v2312_v27  ;;  %v3034_v6 = vpop.f32.mrf.mxu0  ;;  %v3110_v22 = vpop.f32.mrf.mxu1  ;;  %v2318_v51 = vmax.f32 %v2280_v9, 0.0 }
 0x1a2   : > { %v2281_v23 = vadd.f32 %v3740_v16, %v2236_v57  ;;  %v2163_v34 = vmax.f32 %v3923_v42, %v3034_v6  ;;  %v2201_v43 = vmax.f32 %v3924_v7, %v3110_v22  ;;  %v2234_v60 = vmax.f32 %v2158_v24, %v2196_v59  ;;  %v3935_v59 = vld [vmem:[#allocation23_spill] sm:$0xff]  ;;  %v3936_v42 = vld [vmem:[#allocation24_spill] sm:$0xff] }
 0x1a3   : > { %2858 = vst [vmem:[%s3757_s28 + $0x48] sm:$0xff] %v2803_v58   ;;  %v1784_v61 = vpop.f32.mrf.mxu0  ;;  %v2088_v50 = vpop.f32.mrf.mxu1  ;;  %v2316_v0 = vmax.f32 %v2278_v31, 0.0 }
 0x1a4   : > { %v2319_v48 = vmax.f32 %v2281_v23, 0.0  ;;  %v2161_v17 = vmax.f32 %v3925_v49, %v1784_v61  ;;  %v2199_v32 = vmax.f32 %v3926_v20, %v2088_v50  ;;  %v2279_v10 = vadd.f32 %v3740_v16, %v2234_v60  ;;  %v3937_v60 = vld [vmem:[#allocation13_spill] sm:$0xff] }
 0x1a5   : > { %v2239_v11 = vmax.f32 %v2163_v34, %v2201_v43  ;;  %v3035_v33 = vpop.f32.mrf.mxu0  ;;  %v3111_v38 = vpop.f32.mrf.mxu1 }
 0x1a6   : > { %v2818_v62 = vpack.c.bf16 %v2319_v48, %v2318_v51  ;;  %v2237_v63 = vmax.f32 %v2161_v17, %v2199_v32  ;;  %v2164_v41 = vmax.f32 %v3927_v40, %v3035_v33  ;;  %v2317_v1 = vmax.f32 %v2279_v10, 0.0  ;;  %v3938_v48 = vld [vmem:[#allocation14_spill] sm:$0xff]  ;;  %v3939_v32 = vld [vmem:[#allocation25_spill] sm:$0xff] }
 0x1a7   : > { %v2202_v28 = vmax.f32 %v3928_v21, %v3111_v38  ;;  %v1787_v13 = vpop.f32.mrf.mxu0  ;;  %v2091_v26 = vpop.f32.mrf.mxu1  ;;  %v2284_v53 = vadd.f32 %v3740_v16, %v2239_v11  ;;  %v3940_v11 = vld [vmem:[#allocation26_spill] sm:$0xff] }
 0x1a8   : > { %2861 = vst [vmem:[%s3757_s28 + $0x60] sm:$0xff] %v2818_v62   ;;  %v2162_v14 = vmax.f32 %v3929_v12, %v1787_v13  ;;  %v2200_v15 = vmax.f32 %v3930_v52, %v2091_v26  ;;  %v2813_v54 = vpack.c.bf16 %v2317_v1, %v2316_v0  ;;  %v2282_v46 = vadd.f32 %v3740_v16, %v2237_v63  ;;  %v3941_v1 = vld [vmem:[#allocation17_spill] sm:$0xff] }
 0x1a9   : > { %v2240_v35 = vmax.f32 %v2164_v41, %v2202_v28  ;;  %v3038_v4 = vpop.f32.mrf.mxu0  ;;  %v3114_v55 = vpop.f32.mrf.mxu1  ;;  %v2322_v8 = vmax.f32 %v2284_v53, 0.0  ;;  %v3942_v28 = vld [vmem:[#allocation18_spill] sm:$0xff]  ;;  %v3943_v53 = vld [vmem:[#allocation27_spill] sm:$0xff] }
 0x1aa   : > { %v2238_v2 = vmax.f32 %v2162_v14, %v2200_v15  ;;  %v2167_v47 = vmax.f32 %v3931_v5, %v3038_v4  ;;  %v2205_v18 = vmax.f32 %v3932_v3, %v3114_v55  ;;  %2860 = vst [vmem:[%s3757_s28 + $0x58] sm:$0xff] %v2813_v54   ;;  %v2320_v58 = vmax.f32 %v2282_v46, 0.0 }
 0x1ab   : > { %v2285_v39 = vadd.f32 %v3740_v16, %v2240_v35  ;;  %v1800_v19 = vpop.f32.mrf.mxu0  ;;  %v2104_v44 = vpop.f32.mrf.mxu1 }
 0x1ac   : > { %v2283_v27 = vadd.f32 %v3740_v16, %v2238_v2  ;;  %v2165_v37 = vmax.f32 %v3933_v36, %v1800_v19  ;;  %v2203_v56 = vmax.f32 %v3934_v45, %v2104_v44  ;;  %v2243_v57 = vmax.f32 %v2167_v47, %v2205_v18 }
 0x1ad   : > { %v2323_v9 = vmax.f32 %v2285_v39, 0.0  ;;  %v3039_v25 = vpop.f32.mrf.mxu0  ;;  %v3115_v24 = vpop.f32.mrf.mxu1  ;;  %v3944_v39 = vld [vmem:[#allocation21_spill] sm:$0xff] }
 0x1ae   : > { %v2321_v29 = vmax.f32 %v2283_v27, 0.0  ;;  %v2168_v6 = vmax.f32 %v3935_v59, %v3039_v25  ;;  %v2241_v23 = vmax.f32 %v2165_v37, %v2203_v56  ;;  %v2206_v34 = vmax.f32 %v3936_v42, %v3115_v24  ;;  %v3945_v27 = vld [vmem:[#allocation22_spill] sm:$0xff] }
 0x1af   : > { %v2828_v22 = vpack.c.bf16 %v2323_v9, %v2322_v8  ;;  %v1803_v7 = vpop.f32.mrf.mxu0  ;;  %v2107_v43 = vpop.f32.mrf.mxu1  ;;  %v2288_v50 = vadd.f32 %v3740_v16, %v2243_v57 }
 0x1b0   : > { %v2823_v31 = vpack.c.bf16 %v2321_v29, %v2320_v58  ;;  %v2166_v61 = vmax.f32 %v3937_v60, %v1803_v7  ;;  %v2244_v51 = vmax.f32 %v2168_v6, %v2206_v34  ;;  %v2204_v49 = vmax.f32 %v3938_v48, %v2107_v43 }
 0x1b1   : > { %2863 = vst [vmem:[%s3757_s28 + $0x70] sm:$0xff] %v2828_v22   ;;  %v3042_v17 = vpop.f32.mrf.mxu0  ;;  %v3118_v20 = vpop.f32.mrf.mxu1  ;;  %v2286_v38 = vadd.f32 %v3740_v16, %v2241_v23  ;;  %v2326_v26 = vmax.f32 %v2288_v50, 0.0 }
 0x1b2   : > { %2862 = vst [vmem:[%s3757_s28 + $0x68] sm:$0xff] %v2823_v31   ;;  %v2171_v10 = vmax.f32 %v3939_v32, %v3042_v17  ;;  %v2209_v33 = vmax.f32 %v3940_v11, %v3118_v20  ;;  %v2289_v62 = vadd.f32 %v3740_v16, %v2244_v51  ;;  %v2242_v63 = vmax.f32 %v2166_v61, %v2204_v49 }
 0x1b3   : > { %v1816_v40 = vpop.f32.mrf.mxu0  ;;  %v2120_v41 = vpop.f32.mrf.mxu1  ;;  %v2324_v4 = vmax.f32 %v2286_v38, 0.0 }
 0x1b4   : > { %v2247_v0 = vmax.f32 %v2171_v10, %v2209_v33  ;;  %v2169_v21 = vmax.f32 %v3941_v1, %v1816_v40  ;;  %v2207_v13 = vmax.f32 %v3942_v28, %v2120_v41  ;;  %v2327_v12 = vmax.f32 %v2289_v62, 0.0 }
 0x1b5   : > { %v2287_v14 = vadd.f32 %v3740_v16, %v2242_v63  ;;  %v3043_v52 = vpop.f32.mrf.mxu0  ;;  %v3119_v15 = vpop.f32.mrf.mxu1 }
 0x1b6   : > { %v2172_v54 = vmax.f32 %v3744_v30, %v3043_v52  ;;  %v2210_v35 = vmax.f32 %v3943_v53, %v3119_v15  ;;  %v2838_v55 = vpack.c.bf16 %v2327_v12, %v2326_v26  ;;  %v2245_v2 = vmax.f32 %v2169_v21, %v2207_v13 }
 0x1b7   : > { %v2325_v46 = vmax.f32 %v2287_v14, 0.0  ;;  %v1819_v5 = vpop.f32.mrf.mxu0  ;;  %v2123_v47 = vpop.f32.mrf.mxu1  ;;  %v2292_v3 = vadd.f32 %v3740_v16, %v2247_v0 }
 0x1b8   : > { %v2248_v18 = vmax.f32 %v2172_v54, %v2210_v35  ;;  %v2170_v19 = vmax.f32 %v3944_v39, %v1819_v5  ;;  %2865 = vst [vmem:[%s3757_s28 + $0x80] sm:$0xff] %v2838_v55   ;;  %v2208_v36 = vmax.f32 %v3945_v27, %v2123_v47  ;;  %v2290_v37 = vadd.f32 %v3740_v16, %v2245_v2 }
 0x1b9   : > { %v2833_v44 = vpack.c.bf16 %v2325_v46, %v2324_v4  ;;  %v2330_v56 = vmax.f32 %v2292_v3, 0.0 }
 0x1ba   : > { %v2293_v30 = vadd.f32 %v3740_v16, %v2248_v18  ;;  %v2246_v45 = vmax.f32 %v2170_v19, %v2208_v36  ;;  %v2328_v25 = vmax.f32 %v2290_v37, 0.0 }
 0x1bb   : > { %2864 = vst [vmem:[%s3757_s28 + $0x78] sm:$0xff] %v2833_v44  }
 0x1bc   : > { %v2331_v8 = vmax.f32 %v2293_v30, 0.0  ;;  %v2291_v9 = vadd.f32 %v3740_v16, %v2246_v45 }
 0x1be   : > { %v2848_v57 = vpack.c.bf16 %v2331_v8, %v2330_v56  ;;  %v2329_v24 = vmax.f32 %v2291_v9, 0.0 }
 0x1c0   : > { %2867 = vst [vmem:[%s3757_s28 + $0x90] sm:$0xff] %v2848_v57   ;;  %v2843_v58 = vpack.c.bf16 %v2329_v24, %v2328_v25 }
 0x1c2   : > { %2866 = vst [vmem:[%s3757_s28 + $0x88] sm:$0xff] %v2843_v58  }
 0x1c3 PF: > { %p10_p9 = scmp.ge.s32.totalorder %s3307_s16, 4   ;;  %s3946_s12 = smov %s3264_s13 }
 0x1c4   : > { %s3947_s13 = smov %s3316_s19  ;;  %s3948_s14 = smov %s3307_s16 }
 0x1c5   :  { %12 = sbr.rel (!%p10_p9) target bundleno = 2 (0x2), region = 108 }

// kernel: classifier_forward.6
= control target key start
LH: loop header
LB: loop body
LE: loop exit
PB: predicated region body
PF: predicated region fallthrough
CT: control target
= control target key end

     0   :  { %v2943_v0 = vmov 0   ;;  %s3944_s1 = inlined_call_operand.vmem [shape: bf16[512,128], index: 1, kind: input, shape index: {}]   ;;  %s3945_s0 = inlined_call_operand.vmem [shape: bf16[4,176,512], index: 0, kind: input, shape index: {}]   ;;  %s3946_s2 = inlined_call_operand.vmem [shape: f32[1,128], index: 2, kind: input, shape index: {}]   ;;  %s3947_s3 = inlined_call_operand.vmem [shape: bf16[176,128], index: 3, kind: output, shape index: {}]  }
   0x1   :  { %1327 = vmatprep.subr.bf16.mxu0 %v2943_v0  ;;  %1712 = vmatprep.subr.bf16.mxu1 %v2943_v0  ;;  %v2647_v1 = vld [vmem:[%s3944_s1 + $0x38] sm:$0xff]   ;;  %v2649_v3 = vld [vmem:[%s3944_s1 + $0x30] sm:$0xff]   ;;  %v2651_v5 = vld [vmem:[%s3944_s1 + $0x28] sm:$0xff]  }
   0x2   :  { %v2648_v2 = vld [vmem:[%s3944_s1 + $0xb8] sm:$0xff]   ;;  %1328 = vmatpush1.bf16.msra.mxu0 %v2647_v1  ;;  %v2650_v4 = vld [vmem:[%s3944_s1 + $0xb0] sm:$0xff]   ;;  %v2652_v6 = vld [vmem:[%s3944_s1 + $0xa8] sm:$0xff]  }
   0x3   :  { %1713 = vmatpush1.bf16.msra.mxu1 %v2648_v2  ;;  %1329 = vmatprep.subr.bf16.mxu0 %v2943_v0  ;;  %v2653_v7 = vld [vmem:[%s3944_s1 + $0x20] sm:$0xff]   ;;  %v2655_v9 = vld [vmem:[%s3944_s1 + $0x18] sm:$0xff]   ;;  %v2657_v11 = vld [vmem:[%s3944_s1 + $0x10] sm:$0xff]  }
   0x4   :  { %1714 = vmatprep.subr.bf16.mxu1 %v2943_v0  ;;  %v2654_v8 = vld [vmem:[%s3944_s1 + $0xa0] sm:$0xff]   ;;  %v2656_v10 = vld [vmem:[%s3944_s1 + $0x98] sm:$0xff]   ;;  %v2658_v12 = vld [vmem:[%s3944_s1 + $0x90] sm:$0xff]  }
   0x5   :  { %v2659_v13 = vld [vmem:[%s3944_s1 + $0x8] sm:$0xff]   ;;  %v2661_v15 = vld [vmem:[%s3944_s1] sm:$0xff]   ;;  %v2663_v17 = vld [vmem:[%s3944_s1 + $0x78] sm:$0xff]  }
   0x6   :  { %1330 = vmatpush1.bf16.msra.mxu0 %v2649_v3  ;;  %v2660_v14 = vld [vmem:[%s3944_s1 + $0x88] sm:$0xff]   ;;  %v2662_v16 = vld [vmem:[%s3944_s1 + $0x80] sm:$0xff]   ;;  %v2664_v18 = vld [vmem:[%s3944_s1 + $0xf8] sm:$0xff]  }
   0x7   :  { %1715 = vmatpush1.bf16.msra.mxu1 %v2650_v4  ;;  %1331 = vmatprep.subr.bf16.mxu0 %v2943_v0  ;;  %v2681_v19 = vld [vmem:[%s3945_s0 + $0x4] ss:$16 sps:$4 sm:$0xff]   ;;  %v2684_v21 = vld [vmem:[%s3945_s0 + $0xc] ss:$16 sps:$4 sm:$0xff]   ;;  %v2679_v35 = vld [vmem:[%s3945_s0] ss:$16 sps:$4 sm:$0xff]  }
   0x8   :  { %1716 = vmatprep.subr.bf16.mxu1 %v2943_v0  ;;  %v2665_v20 = vld [vmem:[%s3944_s1 + $0x70] sm:$0xff]   ;;  %1359 = vmatprep.mubr.bf16.mxu0 %v2681_v19  ;;  %v2667_v23 = vld [vmem:[%s3944_s1 + $0x68] sm:$0xff]   ;;  %v2669_v25 = vld [vmem:[%s3944_s1 + $0x60] sm:$0xff]  }
   0x9   :  { %v2666_v22 = vld [vmem:[%s3944_s1 + $0xf0] sm:$0xff]   ;;  %1744 = vmatprep.mubr.bf16.mxu1 %v2684_v21  ;;  %v2668_v24 = vld [vmem:[%s3944_s1 + $0xe8] sm:$0xff]   ;;  %v2670_v26 = vld [vmem:[%s3944_s1 + $0xe0] sm:$0xff]  }
   0xa   :  { %1332 = vmatpush1.bf16.msra.mxu0 %v2651_v5  ;;  %v2671_v27 = vld [vmem:[%s3944_s1 + $0x58] sm:$0xff]   ;;  %v2673_v29 = vld [vmem:[%s3944_s1 + $0x50] sm:$0xff]   ;;  %v2675_v31 = vld [vmem:[%s3944_s1 + $0x48] sm:$0xff]  }
   0xb   :  { %1717 = vmatpush1.bf16.msra.mxu1 %v2652_v6  ;;  %1333 = vmatprep.subr.bf16.mxu0 %v2943_v0  ;;  %v2672_v28 = vld [vmem:[%s3944_s1 + $0xd8] sm:$0xff]   ;;  %v2674_v30 = vld [vmem:[%s3944_s1 + $0xd0] sm:$0xff]   ;;  %v2676_v32 = vld [vmem:[%s3944_s1 + $0xc8] sm:$0xff]  }
   0xc   :  { %1718 = vmatprep.subr.bf16.mxu1 %v2943_v0  ;;  %v2677_v33 = vld [vmem:[%s3944_s1 + $0x40] sm:$0xff]   ;;  %v2682_v36 = vld [vmem:[%s3945_s0 + $0x8] ss:$16 sps:$4 sm:$0xff]   ;;  %v2687_v38 = vld [vmem:[%s3945_s0 + $0x2c] ss:$16 sps:$4 sm:$0xff]  }
   0xd   :  { %v2678_v34 = vld [vmem:[%s3944_s1 + $0xc0] sm:$0xff]   ;;  %v2690_v40 = vld [vmem:[%s3945_s0 + $0x28] ss:$16 sps:$4 sm:$0xff]   ;;  %v2693_v42 = vld [vmem:[%s3945_s0 + $0x4c] ss:$16 sps:$4 sm:$0xff]  }
   0xe   :  { %1334 = vmatpush1.bf16.msra.mxu0 %v2653_v7  ;;  %v2685_v37 = vld [vmem:[%s3945_s0 + $0x24] ss:$16 sps:$4 sm:$0xff]   ;;  %v2689_v39 = vld [vmem:[%s3945_s0 + $0x20] ss:$16 sps:$4 sm:$0xff]   ;;  %v2696_v44 = vld [vmem:[%s3945_s0 + $0x48] ss:$16 sps:$4 sm:$0xff]  }
   0xf   :  { %1719 = vmatpush1.bf16.msra.mxu1 %v2654_v8  ;;  %1335 = vmatprep.subr.bf16.mxu0 %v2943_v0  ;;  %v2691_v41 = vld [vmem:[%s3945_s0 + $0x44] ss:$16 sps:$4 sm:$0xff]   ;;  %v2695_v43 = vld [vmem:[%s3945_s0 + $0x40] ss:$16 sps:$4 sm:$0xff]   ;;  %v2699_v46 = vld [vmem:[%s3945_s0 + $0x6c] ss:$16 sps:$4 sm:$0xff]  }
  0x10   :  { %1720 = vmatprep.subr.bf16.mxu1 %v2943_v0  ;;  %v2697_v45 = vld [vmem:[%s3945_s0 + $0x64] ss:$16 sps:$4 sm:$0xff]   ;;  %v2701_v47 = vld [vmem:[%s3945_s0 + $0x60] ss:$16 sps:$4 sm:$0xff]   ;;  %v2702_v48 = vld [vmem:[%s3945_s0 + $0x68] ss:$16 sps:$4 sm:$0xff]  }
  0x11   :  { %v2703_v49 = vld [vmem:[%s3945_s0 + $0x84] ss:$16 sps:$4 sm:$0xff]   ;;  %v2705_v50 = vld [vmem:[%s3945_s0 + $0x8c] ss:$16 sps:$4 sm:$0xff]   ;;  %v2707_v51 = vld [vmem:[%s3945_s0 + $0x80] ss:$16 sps:$4 sm:$0xff]  }
  0x12   :  { %1336 = vmatpush1.bf16.msra.mxu0 %v2655_v9  ;;  %v2708_v52 = vld [vmem:[%s3945_s0 + $0x88] ss:$16 sps:$4 sm:$0xff]   ;;  %v2709_v53 = vld [vmem:[%s3945_s0 + $0xa4] ss:$16 sps:$4 sm:$0xff]   ;;  %v2711_v54 = vld [vmem:[%s3945_s0 + $0xac] ss:$16 sps:$4 sm:$0xff]  }
  0x13   :  { %1721 = vmatpush1.bf16.msra.mxu1 %v2656_v10  ;;  %1337 = vmatprep.subr.bf16.mxu0 %v2943_v0  ;;  %v2713_v55 = vld [vmem:[%s3945_s0 + $0xa0] ss:$16 sps:$4 sm:$0xff]   ;;  %v2714_v56 = vld [vmem:[%s3945_s0 + $0xa8] ss:$16 sps:$4 sm:$0xff]   ;;  %v2715_v57 = vld [vmem:[%s3945_s0 + $0xc4] ss:$16 sps:$4 sm:$0xff]  }
  0x14   :  { %1722 = vmatprep.subr.bf16.mxu1 %v2943_v0  ;;  %v2717_v58 = vld [vmem:[%s3945_s0 + $0xcc] ss:$16 sps:$4 sm:$0xff]   ;;  %v2719_v59 = vld [vmem:[%s3945_s0 + $0xc0] ss:$16 sps:$4 sm:$0xff]   ;;  %v2720_v60 = vld [vmem:[%s3945_s0 + $0xc8] ss:$16 sps:$4 sm:$0xff]  }
  0x15   :  { %v2721_v61 = vld [vmem:[%s3945_s0 + $0xe4] ss:$16 sps:$4 sm:$0xff]   ;;  %v2723_v62 = vld [vmem:[%s3945_s0 + $0xec] ss:$16 sps:$4 sm:$0xff]   ;;  %v2725_v63 = vld [vmem:[%s3945_s0 + $0xe0] ss:$16 sps:$4 sm:$0xff]  }
  0x16   :  { %1338 = vmatpush1.bf16.msra.mxu0 %v2657_v11  ;;  %v2727_v1 = vld [vmem:[%s3945_s0 + $0x104] ss:$16 sps:$4 sm:$0xff]   ;;  %v2729_v2 = vld [vmem:[%s3945_s0 + $0x10c] ss:$16 sps:$4 sm:$0xff]   ;;  %v2731_v3 = vld [vmem:[%s3945_s0 + $0x100] ss:$16 sps:$4 sm:$0xff]  }
  0x17   :  { %1723 = vmatpush1.bf16.msra.mxu1 %v2658_v12  ;;  %1339 = vmatprep.subr.bf16.mxu0 %v2943_v0  ;;  %v2732_v4 = vld [vmem:[%s3945_s0 + $0x108] ss:$16 sps:$4 sm:$0xff]   ;;  %v2733_v5 = vld [vmem:[%s3945_s0 + $0x124] ss:$16 sps:$4 sm:$0xff]   ;;  %v2735_v6 = vld [vmem:[%s3945_s0 + $0x12c] ss:$16 sps:$4 sm:$0xff]  }
  0x18   :  { %1724 = vmatprep.subr.bf16.mxu1 %v2943_v0  ;;  %v2737_v7 = vld [vmem:[%s3945_s0 + $0x120] ss:$16 sps:$4 sm:$0xff]   ;;  %v2738_v8 = vld [vmem:[%s3945_s0 + $0x128] ss:$16 sps:$4 sm:$0xff]   ;;  %v2739_v9 = vld [vmem:[%s3945_s0 + $0x144] ss:$16 sps:$4 sm:$0xff]  }
  0x19   :  { %v2741_v10 = vld [vmem:[%s3945_s0 + $0x14c] ss:$16 sps:$4 sm:$0xff]   ;;  %v2743_v11 = vld [vmem:[%s3945_s0 + $0x140] ss:$16 sps:$4 sm:$0xff]   ;;  %v2744_v12 = vld [vmem:[%s3945_s0 + $0x148] ss:$16 sps:$4 sm:$0xff]  }
  0x1a   :  { %1340 = vmatpush1.bf16.msra.mxu0 %v2659_v13  ;;  %v2745_v13 = vld [vmem:[%s3945_s0 + $0x164] ss:$16 sps:$4 sm:$0xff]   ;;  %v2755_v19 = vld [vmem:[%s3945_s0 + $0x180] ss:$16 sps:$4 sm:$0xff]  }
  0x1b   :  { %1725 = vmatpush1.bf16.msra.mxu1 %v2660_v14  ;;  %1341 = vmatprep.subr.bf16.mxu0 %v2943_v0  ;;  %v2747_v14 = vld [vmem:[%s3945_s0 + $0x16c] ss:$16 sps:$4 sm:$0xff]   ;;  %v2757_v21 = vld [vmem:[%s3945_s0 + $0x1a4] ss:$16 sps:$4 sm:$0xff]  }
  0x1c   :  { %1726 = vmatprep.subr.bf16.mxu1 %v2943_v0 }
  0x1e   :  { %1342 = vmatpush1.bf16.msra.mxu0 %v2661_v15  ;;  %v2749_v15 = vld [vmem:[%s3945_s0 + $0x160] ss:$16 sps:$4 sm:$0xff]  }
  0x1f   :  { %1727 = vmatpush1.bf16.msra.mxu1 %v2662_v16  ;;  %1343 = vmatprep.subr.bf16.mxu0 %v2943_v0  ;;  %v2750_v16 = vld [vmem:[%s3945_s0 + $0x168] ss:$16 sps:$4 sm:$0xff]  }
  0x20   :  { %1728 = vmatprep.subr.bf16.mxu1 %v2943_v0 }
  0x22   :  { %1344 = vmatpush2.bf16.msra.mxu0 %v2663_v17  ;;  %v2751_v17 = vld [vmem:[%s3945_s0 + $0x184] ss:$16 sps:$4 sm:$0xff]  }
  0x23   :  { %1729 = vmatpush2.bf16.msra.mxu1 %v2664_v18  ;;  %1345 = vmatprep.subr.bf16.mxu0 %v2943_v0  ;;  %v2753_v18 = vld [vmem:[%s3945_s0 + $0x18c] ss:$16 sps:$4 sm:$0xff]  }
  0x24   :  { %1730 = vmatprep.subr.bf16.mxu1 %v2943_v0 }
  0x26   :  { %1346 = vmatpush2.bf16.msra.mxu0 %v2665_v20  ;;  %v2756_v20 = vld [vmem:[%s3945_s0 + $0x188] ss:$16 sps:$4 sm:$0xff]  }
  0x27   :  { %1731 = vmatpush2.bf16.msra.mxu1 %v2666_v22  ;;  %1347 = vmatprep.subr.bf16.mxu0 %v2943_v0  ;;  %v2759_v22 = vld [vmem:[%s3945_s0 + $0x1ac] ss:$16 sps:$4 sm:$0xff]  }
  0x28   :  { %1732 = vmatprep.subr.bf16.mxu1 %v2943_v0 }
  0x2a   :  { %1348 = vmatpush2.bf16.msra.mxu0 %v2667_v23  ;;  %v2761_v23 = vld [vmem:[%s3945_s0 + $0x1a0] ss:$16 sps:$4 sm:$0xff]  }
  0x2b   :  { %1733 = vmatpush2.bf16.msra.mxu1 %v2668_v24  ;;  %1349 = vmatprep.subr.bf16.mxu0 %v2943_v0  ;;  %v2762_v24 = vld [vmem:[%s3945_s0 + $0x1a8] ss:$16 sps:$4 sm:$0xff]  }
  0x2c   :  { %1734 = vmatprep.subr.bf16.mxu1 %v2943_v0 }
  0x2e   :  { %1350 = vmatpush2.bf16.msra.mxu0 %v2669_v25  ;;  %v2763_v25 = vld [vmem:[%s3945_s0 + $0x1c4] ss:$16 sps:$4 sm:$0xff]  }
  0x2f   :  { %1735 = vmatpush2.bf16.msra.mxu1 %v2670_v26  ;;  %1351 = vmatprep.subr.bf16.mxu0 %v2943_v0  ;;  %v2765_v26 = vld [vmem:[%s3945_s0 + $0x1cc] ss:$16 sps:$4 sm:$0xff]  }
  0x30   :  { %1736 = vmatprep.subr.bf16.mxu1 %v2943_v0 }
  0x32   :  { %1352 = vmatpush2.bf16.msra.mxu0 %v2671_v27  ;;  %v2767_v27 = vld [vmem:[%s3945_s0 + $0x1c0] ss:$16 sps:$4 sm:$0xff]  }
  0x33   :  { %1737 = vmatpush2.bf16.msra.mxu1 %v2672_v28  ;;  %1353 = vmatprep.subr.bf16.mxu0 %v2943_v0  ;;  %v2768_v28 = vld [vmem:[%s3945_s0 + $0x1c8] ss:$16 sps:$4 sm:$0xff]  }
  0x34   :  { %1738 = vmatprep.subr.bf16.mxu1 %v2943_v0 }
  0x36   :  { %1354 = vmatpush2.bf16.msra.mxu0 %v2673_v29  ;;  %v2769_v29 = vld [vmem:[%s3945_s0 + $0x1e4] ss:$16 sps:$4 sm:$0xff]  }
  0x37   :  { %1739 = vmatpush2.bf16.msra.mxu1 %v2674_v30  ;;  %1355 = vmatprep.subr.bf16.mxu0 %v2943_v0  ;;  %v2771_v30 = vld [vmem:[%s3945_s0 + $0x1ec] ss:$16 sps:$4 sm:$0xff]  }
  0x38   :  { %1740 = vmatprep.subr.bf16.mxu1 %v2943_v0 }
  0x3a   :  { %1356 = vmatpush2.bf16.msra.mxu0 %v2675_v31  ;;  %v2773_v31 = vld [vmem:[%s3945_s0 + $0x1e0] ss:$16 sps:$4 sm:$0xff]  }
  0x3b   :  { %1741 = vmatpush2.bf16.msra.mxu1 %v2676_v32  ;;  %1357 = vmatprep.subr.bf16.mxu0 %v2943_v0  ;;  %v2774_v32 = vld [vmem:[%s3945_s0 + $0x1e8] ss:$16 sps:$4 sm:$0xff]  }
  0x3c   :  { %1742 = vmatprep.subr.bf16.mxu1 %v2943_v0  ;;  %v2726_v0 = vld [vmem:[%s3945_s0 + $0xe8] ss:$16 sps:$4 sm:$0xff]  }
  0x3e   :  { %1358 = vmatpush2.bf16.msra.mxu0 %v2677_v33  ;;  %v2775_v33 = vld [vmem:[%s3945_s0 + $0x204] ss:$16 sps:$4 sm:$0xff]  }
  0x3f   :  { %1743 = vmatpush2.bf16.msra.mxu1 %v2678_v34  ;;  %v2777_v34 = vld [vmem:[%s3945_s0 + $0x20c] ss:$16 sps:$4 sm:$0xff]  }
  0x41   :  { %1360 = vmatmul.mubr.bf16.vlgmr.msra.gmra.mxu0 %v2679_v35  ;;  %v2779_v35 = vld [vmem:[%s3945_s0 + $0x200] ss:$16 sps:$4 sm:$0xff]  }
  0x42   :  { %1745 = vmatmul.mubr.bf16.vlgmr.msra.gmra.mxu1 %v2682_v36  ;;  %1367 = vmatprep.mubr.bf16.mxu0 %v2685_v37  ;;  %v2780_v36 = vld [vmem:[%s3945_s0 + $0x208] ss:$16 sps:$4 sm:$0xff]   ;;  %v2781_v37 = vld [vmem:[%s3945_s0 + $0x224] ss:$16 sps:$4 sm:$0xff]  }
  0x43   :  { %1752 = vmatprep.mubr.bf16.mxu1 %v2687_v38  ;;  %v2783_v38 = vld [vmem:[%s3945_s0 + $0x22c] ss:$16 sps:$4 sm:$0xff]  }
  0x49   :  { %1368 = vmatmul.mubr.bf16.gmra.mxu0 %v2689_v39  ;;  %v2785_v39 = vld [vmem:[%s3945_s0 + $0x220] ss:$16 sps:$4 sm:$0xff]  }
  0x4a   :  { %1753 = vmatmul.mubr.bf16.gmra.mxu1 %v2690_v40  ;;  %1375 = vmatprep.mubr.bf16.mxu0 %v2691_v41  ;;  %v2786_v40 = vld [vmem:[%s3945_s0 + $0x228] ss:$16 sps:$4 sm:$0xff]   ;;  %v2787_v41 = vld [vmem:[%s3945_s0 + $0x244] ss:$16 sps:$4 sm:$0xff]  }
  0x4b   :  { %1760 = vmatprep.mubr.bf16.mxu1 %v2693_v42  ;;  %v2789_v42 = vld [vmem:[%s3945_s0 + $0x24c] ss:$16 sps:$4 sm:$0xff]  }
  0x51   :  { %1376 = vmatmul.mubr.bf16.gmra.mxu0 %v2695_v43  ;;  %v2791_v43 = vld [vmem:[%s3945_s0 + $0x240] ss:$16 sps:$4 sm:$0xff]  }
  0x52   :  { %1761 = vmatmul.mubr.bf16.gmra.mxu1 %v2696_v44  ;;  %1383 = vmatprep.mubr.bf16.mxu0 %v2697_v45  ;;  %v2792_v44 = vld [vmem:[%s3945_s0 + $0x248] ss:$16 sps:$4 sm:$0xff]   ;;  %v2793_v45 = vld [vmem:[%s3945_s0 + $0x264] ss:$16 sps:$4 sm:$0xff]  }
  0x53   :  { %1768 = vmatprep.mubr.bf16.mxu1 %v2699_v46  ;;  %v2795_v46 = vld [vmem:[%s3945_s0 + $0x26c] ss:$16 sps:$4 sm:$0xff]  }
  0x59   :  { %1384 = vmatmul.mubr.bf16.gmra.mxu0 %v2701_v47  ;;  %v2797_v47 = vld [vmem:[%s3945_s0 + $0x260] ss:$16 sps:$4 sm:$0xff]  }
  0x5a   :  { %1769 = vmatmul.mubr.bf16.gmra.mxu1 %v2702_v48  ;;  %1391 = vmatprep.mubr.bf16.mxu0 %v2703_v49  ;;  %v2798_v48 = vld [vmem:[%s3945_s0 + $0x268] ss:$16 sps:$4 sm:$0xff]   ;;  %v2799_v49 = vld [vmem:[%s3945_s0 + $0x284] ss:$16 sps:$4 sm:$0xff]  }
  0x5b   :  { %1776 = vmatprep.mubr.bf16.mxu1 %v2705_v50  ;;  %v2801_v50 = vld [vmem:[%s3945_s0 + $0x28c] ss:$16 sps:$4 sm:$0xff]  }
  0x61   :  { %1392 = vmatmul.mubr.bf16.gmra.mxu0 %v2707_v51  ;;  %v2803_v51 = vld [vmem:[%s3945_s0 + $0x280] ss:$16 sps:$4 sm:$0xff]  }
  0x62   :  { %1777 = vmatmul.mubr.bf16.gmra.mxu1 %v2708_v52  ;;  %1399 = vmatprep.mubr.bf16.mxu0 %v2709_v53  ;;  %v2804_v52 = vld [vmem:[%s3945_s0 + $0x288] ss:$16 sps:$4 sm:$0xff]   ;;  %v2805_v53 = vld [vmem:[%s3945_s0 + $0x2a4] ss:$16 sps:$4 sm:$0xff]  }
  0x63   :  { %1784 = vmatprep.mubr.bf16.mxu1 %v2711_v54  ;;  %v2807_v54 = vld [vmem:[%s3945_s0 + $0x2ac] ss:$16 sps:$4 sm:$0xff]  }
  0x69   :  { %1400 = vmatmul.mubr.bf16.gmra.mxu0 %v2713_v55  ;;  %v2809_v55 = vld [vmem:[%s3945_s0 + $0x2a0] ss:$16 sps:$4 sm:$0xff]  }
  0x6a   :  { %1785 = vmatmul.mubr.bf16.gmra.mxu1 %v2714_v56  ;;  %1407 = vmatprep.mubr.bf16.mxu0 %v2715_v57  ;;  %v2810_v56 = vld [vmem:[%s3945_s0 + $0x2a8] ss:$16 sps:$4 sm:$0xff]   ;;  %v2811_v57 = vld [vmem:[%s3945_s0 + $0x2c4] ss:$16 sps:$4 sm:$0xff]  }
  0x6b   :  { %1792 = vmatprep.mubr.bf16.mxu1 %v2717_v58  ;;  %v2813_v58 = vld [vmem:[%s3945_s0 + $0x2cc] ss:$16 sps:$4 sm:$0xff]  }
  0x71   :  { %1408 = vmatmul.mubr.bf16.gmra.mxu0 %v2719_v59  ;;  %v2815_v59 = vld [vmem:[%s3945_s0 + $0x2c0] ss:$16 sps:$4 sm:$0xff]  }
  0x72   :  { %1793 = vmatmul.mubr.bf16.gmra.mxu1 %v2720_v60  ;;  %1415 = vmatprep.mubr.bf16.mxu0 %v2721_v61  ;;  %v2816_v60 = vld [vmem:[%s3945_s0 + $0x2c8] ss:$16 sps:$4 sm:$0xff]   ;;  %v2817_v61 = vld [vmem:[%s3945_s0 + $0x2e4] ss:$16 sps:$4 sm:$0xff]  }
  0x73   :  { %1800 = vmatprep.mubr.bf16.mxu1 %v2723_v62  ;;  %v2819_v62 = vld [vmem:[%s3945_s0 + $0x2ec] ss:$16 sps:$4 sm:$0xff]  }
  0x79   :  { %1416 = vmatmul.mubr.bf16.gmra.mxu0 %v2725_v63  ;;  %v2821_v63 = vld [vmem:[%s3945_s0 + $0x2e0] ss:$16 sps:$4 sm:$0xff]  }
  0x7a   :  { %1801 = vmatmul.mubr.bf16.gmra.mxu1 %v2726_v0  ;;  %1423 = vmatprep.mubr.bf16.mxu0 %v2727_v1  ;;  %v2822_v0 = vld [vmem:[%s3945_s0 + $0x2e8] ss:$16 sps:$4 sm:$0xff]   ;;  %v2823_v1 = vld [vmem:[%s3945_s0 + $0x304] ss:$16 sps:$4 sm:$0xff]  }
  0x7b   :  { %1808 = vmatprep.mubr.bf16.mxu1 %v2729_v2  ;;  %v2825_v2 = vld [vmem:[%s3945_s0 + $0x30c] ss:$16 sps:$4 sm:$0xff]  }
  0x81   :  { %1424 = vmatmul.mubr.bf16.gmra.mxu0 %v2731_v3  ;;  %v2827_v3 = vld [vmem:[%s3945_s0 + $0x300] ss:$16 sps:$4 sm:$0xff]  }
  0x82   :  { %1809 = vmatmul.mubr.bf16.gmra.mxu1 %v2732_v4  ;;  %1431 = vmatprep.mubr.bf16.mxu0 %v2733_v5  ;;  %v2828_v4 = vld [vmem:[%s3945_s0 + $0x308] ss:$16 sps:$4 sm:$0xff]   ;;  %v2829_v5 = vld [vmem:[%s3945_s0 + $0x324] ss:$16 sps:$4 sm:$0xff]  }
  0x83   :  { %1816 = vmatprep.mubr.bf16.mxu1 %v2735_v6  ;;  %v2831_v6 = vld [vmem:[%s3945_s0 + $0x32c] ss:$16 sps:$4 sm:$0xff]  }
  0x89   :  { %1432 = vmatmul.mubr.bf16.gmra.mxu0 %v2737_v7 }
  0x8a   :  { %1817 = vmatmul.mubr.bf16.gmra.mxu1 %v2738_v8  ;;  %1439 = vmatprep.mubr.bf16.mxu0 %v2739_v9 }
  0x8b   :  { %1824 = vmatprep.mubr.bf16.mxu1 %v2741_v10 }
  0x91   :  { %1440 = vmatmul.mubr.bf16.gmra.mxu0 %v2743_v11 }
  0x92   :  { %1825 = vmatmul.mubr.bf16.gmra.mxu1 %v2744_v12  ;;  %1447 = vmatprep.mubr.bf16.mxu0 %v2745_v13  ;;  %v2833_v13 = vld [vmem:[%s3945_s0 + $0x320] ss:$16 sps:$4 sm:$0xff]  }
  0x93   :  { %1832 = vmatprep.mubr.bf16.mxu1 %v2747_v14 }
  0x99   :  { %1448 = vmatmul.mubr.bf16.gmra.mxu0 %v2749_v15  ;;  %v2834_v15 = vld [vmem:[%s3945_s0 + $0x328] ss:$16 sps:$4 sm:$0xff]  }
  0x9a   :  { %1833 = vmatmul.mubr.bf16.gmra.mxu1 %v2750_v16  ;;  %1455 = vmatprep.mubr.bf16.mxu0 %v2751_v17  ;;  %v2835_v16 = vld [vmem:[%s3945_s0 + $0x344] ss:$16 sps:$4 sm:$0xff]  }
  0x9b   :  { %1840 = vmatprep.mubr.bf16.mxu1 %v2753_v18 }
  0xa1   :  { %1456 = vmatmul.mubr.bf16.gmra.mxu0 %v2755_v19  ;;  %v2837_v19 = vld [vmem:[%s3945_s0 + $0x34c] ss:$16 sps:$4 sm:$0xff]  }
  0xa2   :  { %1841 = vmatmul.mubr.bf16.gmra.mxu1 %v2756_v20  ;;  %1463 = vmatprep.mubr.bf16.mxu0 %v2757_v21 }
  0xa3   :  { %1848 = vmatprep.mubr.bf16.mxu1 %v2759_v22 }
  0xa9   :  { %1464 = vmatmul.mubr.bf16.gmra.mxu0 %v2761_v23 }
  0xaa   :  { %1849 = vmatmul.mubr.bf16.gmra.mxu1 %v2762_v24  ;;  %1471 = vmatprep.mubr.bf16.mxu0 %v2763_v25 }
  0xab   :  { %1856 = vmatprep.mubr.bf16.mxu1 %v2765_v26 }
  0xb1   :  { %1472 = vmatmul.mubr.bf16.gmra.mxu0 %v2767_v27  ;;  %v2839_v27 = vld [vmem:[%s3945_s0 + $0x340] ss:$16 sps:$4 sm:$0xff]  }
  0xb2   :  { %1857 = vmatmul.mubr.bf16.gmra.mxu1 %v2768_v28  ;;  %1479 = vmatprep.mubr.bf16.mxu0 %v2769_v29  ;;  %v2840_v29 = vld [vmem:[%s3945_s0 + $0x348] ss:$16 sps:$4 sm:$0xff]  }
  0xb3   :  { %1864 = vmatprep.mubr.bf16.mxu1 %v2771_v30  ;;  %v2841_v30 = vld [vmem:[%s3945_s0 + $0x364] ss:$16 sps:$4 sm:$0xff]  }
  0xb9   :  { %1480 = vmatmul.mubr.bf16.gmra.mxu0 %v2773_v31 }
  0xba   :  { %1865 = vmatmul.mubr.bf16.gmra.mxu1 %v2774_v32  ;;  %1487 = vmatprep.mubr.bf16.mxu0 %v2775_v33  ;;  %v2843_v33 = vld [vmem:[%s3945_s0 + $0x36c] ss:$16 sps:$4 sm:$0xff]  }
  0xbb   :  { %1872 = vmatprep.mubr.bf16.mxu1 %v2777_v34 }
  0xc1   :  { %1488 = vmatmul.mubr.bf16.gmra.mxu0 %v2779_v35 }
  0xc2   :  { %1873 = vmatmul.mubr.bf16.gmra.mxu1 %v2780_v36  ;;  %1495 = vmatprep.mubr.bf16.mxu0 %v2781_v37 }
  0xc3   :  { %1880 = vmatprep.mubr.bf16.mxu1 %v2783_v38 }
  0xc9   :  { %1496 = vmatmul.mubr.bf16.gmra.mxu0 %v2785_v39 }
  0xca   :  { %1881 = vmatmul.mubr.bf16.gmra.mxu1 %v2786_v40  ;;  %1503 = vmatprep.mubr.bf16.mxu0 %v2787_v41  ;;  %v2845_v41 = vld [vmem:[%s3945_s0 + $0x360] ss:$16 sps:$4 sm:$0xff]  }
  0xcb   :  { %1888 = vmatprep.mubr.bf16.mxu1 %v2789_v42 }
  0xd1   :  { %1504 = vmatmul.mubr.bf16.gmra.mxu0 %v2791_v43  ;;  %v2846_v43 = vld [vmem:[%s3945_s0 + $0x368] ss:$16 sps:$4 sm:$0xff]  }
  0xd2   :  { %1889 = vmatmul.mubr.bf16.gmra.mxu1 %v2792_v44  ;;  %1511 = vmatprep.mubr.bf16.mxu0 %v2793_v45  ;;  %v2849_v44 = vld [vmem:[%s3945_s0 + $0x384] ss:$16 sps:$4 sm:$0xff]  }
  0xd3   :  { %1896 = vmatprep.mubr.bf16.mxu1 %v2795_v46 }
  0xd9   :  { %1512 = vmatmul.mubr.bf16.gmra.mxu0 %v2797_v47  ;;  %v2852_v47 = vld [vmem:[%s3945_s0 + $0x38c] ss:$16 sps:$4 sm:$0xff]  }
  0xda   :  { %1897 = vmatmul.mubr.bf16.gmra.mxu1 %v2798_v48  ;;  %1519 = vmatprep.mubr.bf16.mxu0 %v2799_v49 }
  0xdb   :  { %1904 = vmatprep.mubr.bf16.mxu1 %v2801_v50 }
  0xe1   :  { %1520 = vmatmul.mubr.bf16.gmra.mxu0 %v2803_v51 }
  0xe2   :  { %1905 = vmatmul.mubr.bf16.gmra.mxu1 %v2804_v52  ;;  %1527 = vmatprep.mubr.bf16.mxu0 %v2805_v53 }
  0xe3   :  { %1912 = vmatprep.mubr.bf16.mxu1 %v2807_v54 }
  0xe9   :  { %1528 = vmatmul.mubr.bf16.gmra.mxu0 %v2809_v55  ;;  %v2847_v55 = vld [vmem:[%s3945_s0 + $0x380] ss:$16 sps:$4 sm:$0xff]  }
  0xea   :  { %1913 = vmatmul.mubr.bf16.gmra.mxu1 %v2810_v56  ;;  %1535 = vmatprep.mubr.bf16.mxu0 %v2811_v57  ;;  %v2850_v57 = vld [vmem:[%s3945_s0 + $0x388] ss:$16 sps:$4 sm:$0xff]  }
  0xeb   :  { %1920 = vmatprep.mubr.bf16.mxu1 %v2813_v58  ;;  %v2855_v58 = vld [vmem:[%s3945_s0 + $0x3a4] ss:$16 sps:$4 sm:$0xff]  }
  0xf1   :  { %1536 = vmatmul.mubr.bf16.gmra.mxu0 %v2815_v59 }
  0xf2   :  { %1921 = vmatmul.mubr.bf16.gmra.mxu1 %v2816_v60  ;;  %1543 = vmatprep.mubr.bf16.mxu0 %v2817_v61  ;;  %v2858_v61 = vld [vmem:[%s3945_s0 + $0x3ac] ss:$16 sps:$4 sm:$0xff]  }
  0xf3   :  { %1928 = vmatprep.mubr.bf16.mxu1 %v2819_v62 }
  0xf9   :  { %1544 = vmatmul.mubr.bf16.gmra.mxu0 %v2821_v63 }
  0xfa   :  { %1929 = vmatmul.mubr.bf16.gmra.mxu1 %v2822_v0  ;;  %1551 = vmatprep.mubr.bf16.mxu0 %v2823_v1 }
  0xfb   :  { %1936 = vmatprep.mubr.bf16.mxu1 %v2825_v2 }
 0x101   :  { %v1361_v7 = vpop.f32.mrf.mxu0  ;;  %1552 = vmatmul.mubr.bf16.gmra.mxu0 %v2827_v3 }
 0x102   :  { %v1746_v8 = vpop.f32.mrf.mxu1  ;;  %1937 = vmatmul.mubr.bf16.gmra.mxu1 %v2828_v4  ;;  %1559 = vmatprep.mubr.bf16.mxu0 %v2829_v5  ;;  %v2853_v5 = vld [vmem:[%s3945_s0 + $0x3a0] ss:$16 sps:$4 sm:$0xff]  }
 0x103   :  { %v3398_v9 = vadd.f32 %v1746_v8, %v1361_v7  ;;  %v1363_v10 = vpop.f32.mrf.mxu0  ;;  %1944 = vmatprep.mubr.bf16.mxu1 %v2831_v6  ;;  %v2856_v7 = vld [vmem:[%s3945_s0 + $0x3a8] ss:$16 sps:$4 sm:$0xff]   ;;  %v2861_v8 = vld [vmem:[%s3945_s0 + $0x3c4] ss:$16 sps:$4 sm:$0xff]  }
 0x104   :  { %v1748_v11 = vpop.f32.mrf.mxu1 }
 0x105   :  { %v1364_v12 = vpop.f32.mrf.mxu0 }
 0x106   :  { %v1749_v14 = vpop.f32.mrf.mxu1 }
 0x107   :  { %v3409_v17 = vadd.f32 %v1749_v14, %v1364_v12  ;;  %v1366_v18 = vpop.f32.mrf.mxu0  ;;  %v2864_v12 = vld [vmem:[%s3945_s0 + $0x3cc] ss:$16 sps:$4 sm:$0xff]  }
 0x108   :  { %v1751_v20 = vpop.f32.mrf.mxu1 }
 0x109   :  { %v1369_v21 = vpop.f32.mrf.mxu0  ;;  %1560 = vmatmul.mubr.bf16.gmra.mxu0 %v2833_v13 }
 0x10a   :  { %v1754_v22 = vpop.f32.mrf.mxu1  ;;  %1945 = vmatmul.mubr.bf16.gmra.mxu1 %v2834_v15  ;;  %1567 = vmatprep.mubr.bf16.mxu0 %v2835_v16 }
 0x10b   :  { %v3414_v23 = vadd.f32 %v1754_v22, %v1369_v21  ;;  %v1371_v24 = vpop.f32.mrf.mxu0  ;;  %1952 = vmatprep.mubr.bf16.mxu1 %v2837_v19  ;;  %v2859_v21 = vld [vmem:[%s3945_s0 + $0x3c0] ss:$16 sps:$4 sm:$0xff]  }
 0x10c   :  { %v1756_v25 = vpop.f32.mrf.mxu1  ;;  %v2862_v24 = vld [vmem:[%s3945_s0 + $0x3c8] ss:$16 sps:$4 sm:$0xff]  }
 0x10d   :  { %v1372_v26 = vpop.f32.mrf.mxu0  ;;  %v2867_v25 = vld [vmem:[%s3945_s0 + $0x3e4] ss:$16 sps:$4 sm:$0xff]  }
 0x10e   :  { %v1757_v28 = vpop.f32.mrf.mxu1 }
 0x10f   :  { %v3425_v31 = vadd.f32 %v1757_v28, %v1372_v26  ;;  %v1374_v32 = vpop.f32.mrf.mxu0  ;;  %v2870_v28 = vld [vmem:[%s3945_s0 + $0x3ec] ss:$16 sps:$4 sm:$0xff]  }
 0x110   :  { %v1759_v34 = vpop.f32.mrf.mxu1 }
 0x111   :  { %v1377_v35 = vpop.f32.mrf.mxu0  ;;  %1568 = vmatmul.mubr.bf16.gmra.mxu0 %v2839_v27 }
 0x112   :  { %v1762_v36 = vpop.f32.mrf.mxu1  ;;  %1953 = vmatmul.mubr.bf16.gmra.mxu1 %v2840_v29  ;;  %1575 = vmatprep.mubr.bf16.mxu0 %v2841_v30 }
 0x113   :  { %v3430_v37 = vadd.f32 %v1762_v36, %v1377_v35  ;;  %v1379_v38 = vpop.f32.mrf.mxu0  ;;  %1960 = vmatprep.mubr.bf16.mxu1 %v2843_v33 }
 0x114   :  { %v1764_v39 = vpop.f32.mrf.mxu1  ;;  %v2865_v38 = vld [vmem:[%s3945_s0 + $0x3e0] ss:$16 sps:$4 sm:$0xff]  }
 0x115   :  { %v1380_v40 = vpop.f32.mrf.mxu0 }
 0x116   :  { %v1765_v42 = vpop.f32.mrf.mxu1 }
 0x117   :  { %v3441_v45 = vadd.f32 %v1765_v42, %v1380_v40  ;;  %v1382_v46 = vpop.f32.mrf.mxu0  ;;  %v2868_v40 = vld [vmem:[%s3945_s0 + $0x3e8] ss:$16 sps:$4 sm:$0xff]  }
 0x118   :  { %v1767_v48 = vpop.f32.mrf.mxu1 }
 0x119   :  { %v1385_v49 = vpop.f32.mrf.mxu0  ;;  %1576 = vmatmul.mubr.bf16.gmra.mxu0 %v2845_v41  ;;  %v2873_v41 = vld [vmem:[%s3945_s0 + $0x404] ss:$16 sps:$4 sm:$0xff]  }
 0x11a   :  { %v1770_v50 = vpop.f32.mrf.mxu1  ;;  %1961 = vmatmul.mubr.bf16.gmra.mxu1 %v2846_v43  ;;  %1583 = vmatprep.mubr.bf16.mxu0 %v2849_v44  ;;  %v2876_v44 = vld [vmem:[%s3945_s0 + $0x40c] ss:$16 sps:$4 sm:$0xff]  }
 0x11b   :  { %v3446_v51 = vadd.f32 %v1770_v50, %v1385_v49  ;;  %v1387_v52 = vpop.f32.mrf.mxu0  ;;  %1968 = vmatprep.mubr.bf16.mxu1 %v2852_v47 }
 0x11c   :  { %v1772_v53 = vpop.f32.mrf.mxu1 }
 0x11d   :  { %v1388_v54 = vpop.f32.mrf.mxu0 }
 0x11e   :  { %v1773_v56 = vpop.f32.mrf.mxu1 }
 0x11f   :  { %v3457_v59 = vadd.f32 %v1773_v56, %v1388_v54  ;;  %v1390_v60 = vpop.f32.mrf.mxu0  ;;  %v2871_v54 = vld [vmem:[%s3945_s0 + $0x400] ss:$16 sps:$4 sm:$0xff]   ;;  %v2874_v56 = vld [vmem:[%s3945_s0 + $0x408] ss:$16 sps:$4 sm:$0xff]  }
 0x120   :  { %v1775_v62 = vpop.f32.mrf.mxu1 }
 0x121   :  { %v1393_v63 = vpop.f32.mrf.mxu0  ;;  %1584 = vmatmul.mubr.bf16.gmra.mxu0 %v2847_v55 }
 0x122   :  { %v1778_v0 = vpop.f32.mrf.mxu1  ;;  %1969 = vmatmul.mubr.bf16.gmra.mxu1 %v2850_v57  ;;  %1591 = vmatprep.mubr.bf16.mxu0 %v2855_v58  ;;  %v2879_v57 = vld [vmem:[%s3945_s0 + $0x424] ss:$16 sps:$4 sm:$0xff]  }
 0x123   :  { %v3462_v1 = vadd.f32 %v1778_v0, %v1393_v63  ;;  %v1395_v2 = vpop.f32.mrf.mxu0  ;;  %1976 = vmatprep.mubr.bf16.mxu1 %v2858_v61  ;;  %v2882_v61 = vld [vmem:[%s3945_s0 + $0x42c] ss:$16 sps:$4 sm:$0xff]  }
 0x124   :  { %v1780_v3 = vpop.f32.mrf.mxu1 }
 0x125   :  { %v1396_v4 = vpop.f32.mrf.mxu0 }
 0x126   :  { %v1781_v6 = vpop.f32.mrf.mxu1 }
 0x127   :  { %v3473_v10 = vadd.f32 %v1781_v6, %v1396_v4  ;;  %v1398_v11 = vpop.f32.mrf.mxu0  ;;  %v2877_v6 = vld [vmem:[%s3945_s0 + $0x420] ss:$16 sps:$4 sm:$0xff]  }
 0x128   :  { %v1783_v13 = vpop.f32.mrf.mxu1  ;;  %v2885_v11 = vld [vmem:[%s3945_s0 + $0x444] ss:$16 sps:$4 sm:$0xff]  }
 0x129   :  { %v1401_v14 = vpop.f32.mrf.mxu0  ;;  %1592 = vmatmul.mubr.bf16.gmra.mxu0 %v2853_v5 }
 0x12a   :  { %v1786_v15 = vpop.f32.mrf.mxu1  ;;  %1977 = vmatmul.mubr.bf16.gmra.mxu1 %v2856_v7  ;;  %1599 = vmatprep.mubr.bf16.mxu0 %v2861_v8  ;;  %v2880_v8 = vld [vmem:[%s3945_s0 + $0x428] ss:$16 sps:$4 sm:$0xff]  }
 0x12b   :  { %v3478_v16 = vadd.f32 %v1786_v15, %v1401_v14  ;;  %v1403_v18 = vpop.f32.mrf.mxu0  ;;  %1984 = vmatprep.mubr.bf16.mxu1 %v2864_v12  ;;  %v2888_v14 = vld [vmem:[%s3945_s0 + $0x44c] ss:$16 sps:$4 sm:$0xff]  }
 0x12c   :  { %v1788_v19 = vpop.f32.mrf.mxu1 }
 0x12d   :  { %v1404_v20 = vpop.f32.mrf.mxu0 }
 0x12e   :  { %v1789_v22 = vpop.f32.mrf.mxu1 }
 0x12f   :  { %v3489_v26 = vadd.f32 %v1789_v22, %v1404_v20  ;;  %v1406_v27 = vpop.f32.mrf.mxu0 }
 0x130   :  { %v1791_v29 = vpop.f32.mrf.mxu1 }
 0x131   :  { %v1409_v30 = vpop.f32.mrf.mxu0  ;;  %1600 = vmatmul.mubr.bf16.gmra.mxu0 %v2859_v21  ;;  %v2891_v29 = vld [vmem:[%s3945_s0 + $0x464] ss:$16 sps:$4 sm:$0xff]  }
 0x132   :  { %v1794_v32 = vpop.f32.mrf.mxu1  ;;  %1985 = vmatmul.mubr.bf16.gmra.mxu1 %v2862_v24  ;;  %1607 = vmatprep.mubr.bf16.mxu0 %v2867_v25  ;;  %v2883_v25 = vld [vmem:[%s3945_s0 + $0x440] ss:$16 sps:$4 sm:$0xff]  }
 0x133   :  { %v3494_v33 = vadd.f32 %v1794_v32, %v1409_v30  ;;  %v1411_v34 = vpop.f32.mrf.mxu0  ;;  %1992 = vmatprep.mubr.bf16.mxu1 %v2870_v28  ;;  %v2886_v28 = vld [vmem:[%s3945_s0 + $0x448] ss:$16 sps:$4 sm:$0xff]  }
 0x134   :  { %v1796_v35 = vpop.f32.mrf.mxu1  ;;  %v2894_v34 = vld [vmem:[%s3945_s0 + $0x46c] ss:$16 sps:$4 sm:$0xff]  }
 0x135   :  { %v1412_v36 = vpop.f32.mrf.mxu0 }
 0x136   :  { %v1797_v39 = vpop.f32.mrf.mxu1 }
 0x137   :  { %v3505_v42 = vadd.f32 %v1797_v39, %v1412_v36  ;;  %v1414_v43 = vpop.f32.mrf.mxu0 }
 0x138   :  { %v1799_v46 = vpop.f32.mrf.mxu1 }
 0x139   :  { %v1417_v47 = vpop.f32.mrf.mxu0  ;;  %1608 = vmatmul.mubr.bf16.gmra.mxu0 %v2865_v38 }
 0x13a   :  { %v1802_v48 = vpop.f32.mrf.mxu1  ;;  %1993 = vmatmul.mubr.bf16.gmra.mxu1 %v2868_v40  ;;  %1615 = vmatprep.mubr.bf16.mxu0 %v2873_v41 }
 0x13b   :  { %v3510_v49 = vadd.f32 %v1802_v48, %v1417_v47  ;;  %v1419_v50 = vpop.f32.mrf.mxu0  ;;  %2000 = vmatprep.mubr.bf16.mxu1 %v2876_v44  ;;  %v2889_v44 = vld [vmem:[%s3945_s0 + $0x460] ss:$16 sps:$4 sm:$0xff]   ;;  %v2892_v47 = vld [vmem:[%s3945_s0 + $0x468] ss:$16 sps:$4 sm:$0xff]   ;;  %v2897_v48 = vld [vmem:[%s3945_s0 + $0x484] ss:$16 sps:$4 sm:$0xff]  }
 0x13c   :  { %v1804_v52 = vpop.f32.mrf.mxu1 }
 0x13d   :  { %v1420_v53 = vpop.f32.mrf.mxu0 }
 0x13e   :  { %v1805_v55 = vpop.f32.mrf.mxu1 }
 0x13f   :  { %v3521_v58 = vadd.f32 %v1805_v55, %v1420_v53  ;;  %v1422_v60 = vpop.f32.mrf.mxu0  ;;  %v2900_v53 = vld [vmem:[%s3945_s0 + $0x48c] ss:$16 sps:$4 sm:$0xff]  }
 0x140   :  { %v1807_v62 = vpop.f32.mrf.mxu1 }
 0x141   :  { %3962 = vst [vmem:[#allocation2_spill] sm:$0xff] %v3521_v58  ;;  %v1425_v63 = vpop.f32.mrf.mxu0  ;;  %1616 = vmatmul.mubr.bf16.gmra.mxu0 %v2871_v54 }
 0x142   :  { %v1810_v0 = vpop.f32.mrf.mxu1  ;;  %2001 = vmatmul.mubr.bf16.gmra.mxu1 %v2874_v56  ;;  %1623 = vmatprep.mubr.bf16.mxu0 %v2879_v57 }
 0x143   :  { %v3526_v2 = vadd.f32 %v1810_v0, %v1425_v63  ;;  %v1427_v3 = vpop.f32.mrf.mxu0  ;;  %2008 = vmatprep.mubr.bf16.mxu1 %v2882_v61  ;;  %v2895_v0 = vld [vmem:[%s3945_s0 + $0x480] ss:$16 sps:$4 sm:$0xff]  }
 0x144   :  { %v1812_v4 = vpop.f32.mrf.mxu1 }
 0x145   :  { %3963 = vst [vmem:[#allocation3_spill] sm:$0xff] %v3526_v2  ;;  %v1428_v5 = vpop.f32.mrf.mxu0  ;;  %v2898_v4 = vld [vmem:[%s3945_s0 + $0x488] ss:$16 sps:$4 sm:$0xff]  }
 0x146   :  { %v1813_v7 = vpop.f32.mrf.mxu1 }
 0x147   :  { %v3537_v12 = vadd.f32 %v1813_v7, %v1428_v5  ;;  %v1430_v13 = vpop.f32.mrf.mxu0  ;;  %v2903_v5 = vld [vmem:[%s3945_s0 + $0x4a4] ss:$16 sps:$4 sm:$0xff]  }
 0x148   :  { %v1815_v15 = vpop.f32.mrf.mxu1 }
 0x149   :  { %3964 = vst [vmem:[#allocation4_spill] sm:$0xff] %v3537_v12  ;;  %v1433_v18 = vpop.f32.mrf.mxu0  ;;  %1624 = vmatmul.mubr.bf16.gmra.mxu0 %v2877_v6 }
 0x14a   :  { %v1818_v19 = vpop.f32.mrf.mxu1  ;;  %2009 = vmatmul.mubr.bf16.gmra.mxu1 %v2880_v8  ;;  %1631 = vmatprep.mubr.bf16.mxu0 %v2885_v11  ;;  %v2906_v8 = vld [vmem:[%s3945_s0 + $0x4ac] ss:$16 sps:$4 sm:$0xff]  }
 0x14b   :  { %v3542_v20 = vadd.f32 %v1818_v19, %v1433_v18  ;;  %v1435_v21 = vpop.f32.mrf.mxu0  ;;  %2016 = vmatprep.mubr.bf16.mxu1 %v2888_v14 }
 0x14c   :  { %v1820_v22 = vpop.f32.mrf.mxu1 }
 0x14d   :  { %3965 = vst [vmem:[#allocation5_spill] sm:$0xff] %v3542_v20  ;;  %v1436_v24 = vpop.f32.mrf.mxu0 }
 0x14e   :  { %v1821_v27 = vpop.f32.mrf.mxu1 }
 0x14f   :  { %v3553_v30 = vadd.f32 %v1821_v27, %v1436_v24  ;;  %v1438_v32 = vpop.f32.mrf.mxu0 }
 0x150   :  { %v1823_v35 = vpop.f32.mrf.mxu1 }
 0x151   :  { %3966 = vst [vmem:[#allocation6_spill] sm:$0xff] %v3553_v30  ;;  %v1441_v36 = vpop.f32.mrf.mxu0  ;;  %1632 = vmatmul.mubr.bf16.gmra.mxu0 %v2883_v25  ;;  %v2901_v25 = vld [vmem:[%s3945_s0 + $0x4a0] ss:$16 sps:$4 sm:$0xff]   ;;  %v2912_v35 = vld [vmem:[%s3945_s0 + $0x4cc] ss:$16 sps:$4 sm:$0xff]  }
 0x152   :  { %v1826_v38 = vpop.f32.mrf.mxu1  ;;  %2017 = vmatmul.mubr.bf16.gmra.mxu1 %v2886_v28  ;;  %1639 = vmatprep.mubr.bf16.mxu0 %v2891_v29  ;;  %v2904_v28 = vld [vmem:[%s3945_s0 + $0x4a8] ss:$16 sps:$4 sm:$0xff]   ;;  %v2909_v29 = vld [vmem:[%s3945_s0 + $0x4c4] ss:$16 sps:$4 sm:$0xff]  }
 0x153   :  { %v3558_v39 = vadd.f32 %v1826_v38, %v1441_v36  ;;  %v1443_v40 = vpop.f32.mrf.mxu0  ;;  %2024 = vmatprep.mubr.bf16.mxu1 %v2894_v34 }
 0x154   :  { %v1828_v41 = vpop.f32.mrf.mxu1 }
 0x155   :  { %3967 = vst [vmem:[#allocation7_spill] sm:$0xff] %v3558_v39  ;;  %v1444_v43 = vpop.f32.mrf.mxu0 }
 0x156   :  { %v1829_v46 = vpop.f32.mrf.mxu1 }
 0x157   :  { %v3569_v50 = vadd.f32 %v1829_v46, %v1444_v43  ;;  %v1446_v52 = vpop.f32.mrf.mxu0 }
 0x158   :  { %v1831_v54 = vpop.f32.mrf.mxu1  ;;  %v2907_v52 = vld [vmem:[%s3945_s0 + $0x4c0] ss:$16 sps:$4 sm:$0xff]  }
 0x159   :  { %3968 = vst [vmem:[#allocation8_spill] sm:$0xff] %v3569_v50  ;;  %v1449_v55 = vpop.f32.mrf.mxu0  ;;  %1640 = vmatmul.mubr.bf16.gmra.mxu0 %v2889_v44  ;;  %v2910_v54 = vld [vmem:[%s3945_s0 + $0x4c8] ss:$16 sps:$4 sm:$0xff]  }
 0x15a   :  { %v1834_v56 = vpop.f32.mrf.mxu1  ;;  %2025 = vmatmul.mubr.bf16.gmra.mxu1 %v2892_v47  ;;  %1647 = vmatprep.mubr.bf16.mxu0 %v2897_v48 }
 0x15b   :  { %v3574_v57 = vadd.f32 %v1834_v56, %v1449_v55  ;;  %v1451_v60 = vpop.f32.mrf.mxu0  ;;  %2032 = vmatprep.mubr.bf16.mxu1 %v2900_v53  ;;  %v2915_v55 = vld [vmem:[%s3945_s0 + $0x4e4] ss:$16 sps:$4 sm:$0xff]  }
 0x15c   :  { %v1836_v61 = vpop.f32.mrf.mxu1 }
 0x15d   :  { %v1452_v63 = vpop.f32.mrf.mxu0  ;;  %v2918_v61 = vld [vmem:[%s3945_s0 + $0x4ec] ss:$16 sps:$4 sm:$0xff]  }
 0x15e   :  { %v1837_v3 = vpop.f32.mrf.mxu1 }
 0x15f   :  { %v3587_v6 = vadd.f32 %v1837_v3, %v1452_v63  ;;  %v1454_v7 = vpop.f32.mrf.mxu0 }
 0x160   :  { %v1839_v11 = vpop.f32.mrf.mxu1 }
 0x161   :  { %v1457_v14 = vpop.f32.mrf.mxu0  ;;  %1648 = vmatmul.mubr.bf16.gmra.mxu0 %v2895_v0 }
 0x162   :  { %v1842_v15 = vpop.f32.mrf.mxu1  ;;  %2033 = vmatmul.mubr.bf16.gmra.mxu1 %v2898_v4  ;;  %1655 = vmatprep.mubr.bf16.mxu0 %v2903_v5 }
 0x163   :  { %v3594_v18 = vadd.f32 %v1842_v15, %v1457_v14  ;;  %v1459_v19 = vpop.f32.mrf.mxu0  ;;  %2040 = vmatprep.mubr.bf16.mxu1 %v2906_v8  ;;  %v2913_v15 = vld [vmem:[%s3945_s0 + $0x4e0] ss:$16 sps:$4 sm:$0xff]  }
 0x164   :  { %v1844_v21 = vpop.f32.mrf.mxu1 }
 0x165   :  { %v1460_v24 = vpop.f32.mrf.mxu0  ;;  %v2916_v21 = vld [vmem:[%s3945_s0 + $0x4e8] ss:$16 sps:$4 sm:$0xff]  }
 0x166   :  { %v1845_v27 = vpop.f32.mrf.mxu1 }
 0x167   :  { %v3607_v32 = vadd.f32 %v1845_v27, %v1460_v24  ;;  %v1462_v34 = vpop.f32.mrf.mxu0  ;;  %v2921_v24 = vld [vmem:[%s3945_s0 + $0x504] ss:$16 sps:$4 sm:$0xff]  }
 0x168   :  { %v1847_v36 = vpop.f32.mrf.mxu1 }
 0x169   :  { %v1465_v40 = vpop.f32.mrf.mxu0  ;;  %1656 = vmatmul.mubr.bf16.gmra.mxu0 %v2901_v25 }
 0x16a   :  { %v1850_v41 = vpop.f32.mrf.mxu1  ;;  %2041 = vmatmul.mubr.bf16.gmra.mxu1 %v2904_v28  ;;  %1663 = vmatprep.mubr.bf16.mxu0 %v2909_v29  ;;  %v2924_v28 = vld [vmem:[%s3945_s0 + $0x50c] ss:$16 sps:$4 sm:$0xff]  }
 0x16b   :  { %v3614_v43 = vadd.f32 %v1850_v41, %v1465_v40  ;;  %v1467_v44 = vpop.f32.mrf.mxu0  ;;  %2048 = vmatprep.mubr.bf16.mxu1 %v2912_v35 }
 0x16c   :  { %v1852_v46 = vpop.f32.mrf.mxu1 }
 0x16d   :  { %v1468_v48 = vpop.f32.mrf.mxu0 }
 0x16e   :  { %v1853_v53 = vpop.f32.mrf.mxu1 }
 0x16f   :  { %v3627_v56 = vadd.f32 %v1853_v53, %v1468_v48  ;;  %v1470_v60 = vpop.f32.mrf.mxu0 }
 0x170   :  { %v1855_v63 = vpop.f32.mrf.mxu1 }
 0x171   :  { %v1473_v3 = vpop.f32.mrf.mxu0  ;;  %1664 = vmatmul.mubr.bf16.gmra.mxu0 %v2907_v52  ;;  %v2919_v52 = vld [vmem:[%s3945_s0 + $0x500] ss:$16 sps:$4 sm:$0xff]   ;;  %v2930_v63 = vld [vmem:[%s3945_s0 + $0x52c] ss:$16 sps:$4 sm:$0xff]  }
 0x172   :  { %v1858_v4 = vpop.f32.mrf.mxu1  ;;  %2049 = vmatmul.mubr.bf16.gmra.mxu1 %v2910_v54  ;;  %1671 = vmatprep.mubr.bf16.mxu0 %v2915_v55  ;;  %v2922_v54 = vld [vmem:[%s3945_s0 + $0x508] ss:$16 sps:$4 sm:$0xff]   ;;  %v2927_v55 = vld [vmem:[%s3945_s0 + $0x524] ss:$16 sps:$4 sm:$0xff]  }
 0x173   :  { %v3634_v5 = vadd.f32 %v1858_v4, %v1473_v3  ;;  %v1475_v7 = vpop.f32.mrf.mxu0  ;;  %2056 = vmatprep.mubr.bf16.mxu1 %v2918_v61 }
 0x174   :  { %v1860_v8 = vpop.f32.mrf.mxu1 }
 0x175   :  { %v1476_v14 = vpop.f32.mrf.mxu0 }
 0x176   :  { %v1861_v19 = vpop.f32.mrf.mxu1 }
 0x177   :  { %v3647_v25 = vadd.f32 %v1861_v19, %v1476_v14  ;;  %v1478_v27 = vpop.f32.mrf.mxu0 }
 0x178   :  { %v1863_v29 = vpop.f32.mrf.mxu1  ;;  %v2925_v27 = vld [vmem:[%s3945_s0 + $0x520] ss:$16 sps:$4 sm:$0xff]  }
 0x179   :  { %v1481_v35 = vpop.f32.mrf.mxu0  ;;  %1672 = vmatmul.mubr.bf16.gmra.mxu0 %v2913_v15  ;;  %v2928_v29 = vld [vmem:[%s3945_s0 + $0x528] ss:$16 sps:$4 sm:$0xff]  }
 0x17a   :  { %v1866_v36 = vpop.f32.mrf.mxu1  ;;  %2057 = vmatmul.mubr.bf16.gmra.mxu1 %v2916_v21  ;;  %1679 = vmatprep.mubr.bf16.mxu0 %v2921_v24 }
 0x17b   :  { %v3654_v40 = vadd.f32 %v1866_v36, %v1481_v35  ;;  %v1483_v41 = vpop.f32.mrf.mxu0  ;;  %2064 = vmatprep.mubr.bf16.mxu1 %v2924_v28  ;;  %v2933_v35 = vld [vmem:[%s3945_s0 + $0x544] ss:$16 sps:$4 sm:$0xff]  }
 0x17c   :  { %v1868_v44 = vpop.f32.mrf.mxu1 }
 0x17d   :  { %v1484_v48 = vpop.f32.mrf.mxu0  ;;  %v2936_v44 = vld [vmem:[%s3945_s0 + $0x54c] ss:$16 sps:$4 sm:$0xff]  }
 0x17e   :  { %v1869_v53 = vpop.f32.mrf.mxu1 }
 0x17f   :  { %v3667_v60 = vadd.f32 %v1869_v53, %v1484_v48  ;;  %v1486_v61 = vpop.f32.mrf.mxu0 }
 0x180   :  { %v1871_v3 = vpop.f32.mrf.mxu1 }
 0x181   :  { %v1489_v7 = vpop.f32.mrf.mxu0  ;;  %1680 = vmatmul.mubr.bf16.gmra.mxu0 %v2919_v52 }
 0x182   :  { %v1874_v8 = vpop.f32.mrf.mxu1  ;;  %2065 = vmatmul.mubr.bf16.gmra.mxu1 %v2922_v54  ;;  %1687 = vmatprep.mubr.bf16.mxu0 %v2927_v55 }
 0x183   :  { %v3674_v14 = vadd.f32 %v1874_v8, %v1489_v7  ;;  %v1491_v15 = vpop.f32.mrf.mxu0  ;;  %2072 = vmatprep.mubr.bf16.mxu1 %v2930_v63  ;;  %v2931_v8 = vld [vmem:[%s3945_s0 + $0x540] ss:$16 sps:$4 sm:$0xff]  }
 0x184   :  { %v1876_v19 = vpop.f32.mrf.mxu1 }
 0x185   :  { %v1492_v24 = vpop.f32.mrf.mxu0  ;;  %v2934_v19 = vld [vmem:[%s3945_s0 + $0x548] ss:$16 sps:$4 sm:$0xff]  }
 0x186   :  { %v1877_v28 = vpop.f32.mrf.mxu1 }
 0x187   :  { %v3687_v36 = vadd.f32 %v1877_v28, %v1492_v24  ;;  %v1494_v41 = vpop.f32.mrf.mxu0  ;;  %v2939_v24 = vld [vmem:[%s3945_s0 + $0x564] ss:$16 sps:$4 sm:$0xff]  }
 0x188   :  { %v1879_v48 = vpop.f32.mrf.mxu1 }
 0x189   :  { %v1497_v53 = vpop.f32.mrf.mxu0  ;;  %1688 = vmatmul.mubr.bf16.gmra.mxu0 %v2925_v27 }
 0x18a   :  { %v1882_v54 = vpop.f32.mrf.mxu1  ;;  %2073 = vmatmul.mubr.bf16.gmra.mxu1 %v2928_v29  ;;  %1695 = vmatprep.mubr.bf16.mxu0 %v2933_v35  ;;  %v2942_v29 = vld [vmem:[%s3945_s0 + $0x56c] ss:$16 sps:$4 sm:$0xff]  }
 0x18b   :  { %v3694_v55 = vadd.f32 %v1882_v54, %v1497_v53  ;;  %v1499_v61 = vpop.f32.mrf.mxu0  ;;  %2080 = vmatprep.mubr.bf16.mxu1 %v2936_v44 }
 0x18c   :  { %v1884_v63 = vpop.f32.mrf.mxu1 }
 0x18d   :  { %v1500_v7 = vpop.f32.mrf.mxu0 }
 0x18e   :  { %v1885_v15 = vpop.f32.mrf.mxu1 }
 0x18f   :  { %v3707_v27 = vadd.f32 %v1885_v15, %v1500_v7  ;;  %v1502_v28 = vpop.f32.mrf.mxu0  ;;  %v2937_v15 = vld [vmem:[%s3945_s0 + $0x560] ss:$16 sps:$4 sm:$0xff]  }
 0x190   :  { %v1887_v35 = vpop.f32.mrf.mxu1 }
 0x191   :  { %v1505_v44 = vpop.f32.mrf.mxu0  ;;  %1696 = vmatmul.mubr.bf16.gmra.mxu0 %v2931_v8  ;;  %v2940_v8 = vld [vmem:[%s3945_s0 + $0x568] ss:$16 sps:$4 sm:$0xff]  }
 0x192   :  { %v1890_v48 = vpop.f32.mrf.mxu1  ;;  %2081 = vmatmul.mubr.bf16.gmra.mxu1 %v2934_v19  ;;  %1703 = vmatprep.mubr.bf16.mxu0 %v2939_v24 }
 0x193   :  { %v3714_v53 = vadd.f32 %v1890_v48, %v1505_v44  ;;  %v1507_v54 = vpop.f32.mrf.mxu0  ;;  %2088 = vmatprep.mubr.bf16.mxu1 %v2942_v29 }
 0x194   :  { %v1892_v61 = vpop.f32.mrf.mxu1 }
 0x195   :  { %v1508_v7 = vpop.f32.mrf.mxu0 }
 0x196   :  { %v1893_v28 = vpop.f32.mrf.mxu1 }
 0x197   :  { %v3724_v19 = vadd.f32 %v1893_v28, %v1508_v7  ;;  %v1510_v24 = vpop.f32.mrf.mxu0 }
 0x198   :  { %v1895_v35 = vpop.f32.mrf.mxu1 }
 0x199   :  { %3969 = vst [vmem:[#allocation9_spill] sm:$0xff] %v3724_v19  ;;  %v1513_v44 = vpop.f32.mrf.mxu0  ;;  %1704 = vmatmul.mubr.bf16.gmra.mxu0 %v2937_v15 }
 0x19a   :  { %v1898_v48 = vpop.f32.mrf.mxu1  ;;  %2089 = vmatmul.mubr.bf16.gmra.mxu1 %v2940_v8 }
 0x19b   :  { %v3728_v54 = vadd.f32 %v1898_v48, %v1513_v44  ;;  %v1515_v61 = vpop.f32.mrf.mxu0 }
 0x19c   :  { %v1900_v63 = vpop.f32.mrf.mxu1 }
 0x19d   :  { %3970 = vst [vmem:[#allocation10_spill] sm:$0xff] %v3728_v54  ;;  %v1516_v3 = vpop.f32.mrf.mxu0 }
 0x19e   :  { %v1901_v52 = vpop.f32.mrf.mxu1 }
 0x19f   :  { %v3732_v7 = vadd.f32 %v1901_v52, %v1516_v3  ;;  %v1518_v28 = vpop.f32.mrf.mxu0 }
 0x1a0   :  { %v1903_v24 = vpop.f32.mrf.mxu1 }
 0x1a1   :  { %3971 = vst [vmem:[#allocation11_spill] sm:$0xff] %v3732_v7  ;;  %v1521_v29 = vpop.f32.mrf.mxu0 }
 0x1a2   :  { %v1906_v15 = vpop.f32.mrf.mxu1 }
 0x1a3   :  { %v3736_v21 = vadd.f32 %v1906_v15, %v1521_v29  ;;  %v1523_v8 = vpop.f32.mrf.mxu0 }
 0x1a4   :  { %v1908_v44 = vpop.f32.mrf.mxu1 }
 0x1a5   :  { %3972 = vst [vmem:[#allocation12_spill] sm:$0xff] %v3736_v21  ;;  %v1524_v48 = vpop.f32.mrf.mxu0 }
 0x1a6   :  { %v1909_v61 = vpop.f32.mrf.mxu1 }
 0x1a7   :  { %v3740_v41 = vadd.f32 %v1909_v61, %v1524_v48  ;;  %v1526_v52 = vpop.f32.mrf.mxu0 }
 0x1a8   :  { %v1911_v3 = vpop.f32.mrf.mxu1 }
 0x1a9   :  { %3973 = vst [vmem:[#allocation13_spill] sm:$0xff] %v3740_v41  ;;  %v1529_v24 = vpop.f32.mrf.mxu0 }
 0x1aa   :  { %v1914_v35 = vpop.f32.mrf.mxu1 }
 0x1ab   :  { %v3744_v4 = vadd.f32 %v1914_v35, %v1529_v24  ;;  %v1531_v29 = vpop.f32.mrf.mxu0 }
 0x1ac   :  { %v1916_v15 = vpop.f32.mrf.mxu1 }
 0x1ad   :  { %3974 = vst [vmem:[#allocation14_spill] sm:$0xff] %v3744_v4  ;;  %v1532_v44 = vpop.f32.mrf.mxu0 }
 0x1ae   :  { %v1917_v63 = vpop.f32.mrf.mxu1 }
 0x1af   :  { %v3748_v46 = vadd.f32 %v1917_v63, %v1532_v44  ;;  %v1534_v48 = vpop.f32.mrf.mxu0 }
 0x1b0   :  { %v1919_v61 = vpop.f32.mrf.mxu1 }
 0x1b1   :  { %3975 = vst [vmem:[#allocation15_spill] sm:$0xff] %v3748_v46  ;;  %v1537_v3 = vpop.f32.mrf.mxu0 }
 0x1b2   :  { %v1922_v28 = vpop.f32.mrf.mxu1 }
 0x1b3   :  { %v3752_v34 = vadd.f32 %v1922_v28, %v1537_v3  ;;  %v1539_v35 = vpop.f32.mrf.mxu0 }
 0x1b4   :  { %v1924_v24 = vpop.f32.mrf.mxu1 }
 0x1b5   :  { %v1540_v29 = vpop.f32.mrf.mxu0 }
 0x1b6   :  { %v1925_v15 = vpop.f32.mrf.mxu1 }
 0x1b7   :  { %v3754_v11 = vadd.f32 %v1925_v15, %v1540_v29  ;;  %v1542_v8 = vpop.f32.mrf.mxu0 }
 0x1b8   :  { %v1927_v0 = vpop.f32.mrf.mxu1 }
 0x1b9   :  { %v1545_v47 = vpop.f32.mrf.mxu0 }
 0x1ba   :  { %v1930_v63 = vpop.f32.mrf.mxu1 }
 0x1bb   :  { %v3756_v44 = vadd.f32 %v1930_v63, %v1545_v47  ;;  %v1547_v48 = vpop.f32.mrf.mxu0 }
 0x1bc   :  { %v1932_v61 = vpop.f32.mrf.mxu1 }
 0x1bd   :  { %v1548_v38 = vpop.f32.mrf.mxu0 }
 0x1be   :  { %v1933_v52 = vpop.f32.mrf.mxu1 }
 0x1bf   :  { %v3758_v22 = vadd.f32 %v1933_v52, %v1548_v38  ;;  %v1550_v28 = vpop.f32.mrf.mxu0 }
 0x1c0   :  { %v1935_v3 = vpop.f32.mrf.mxu1 }
 0x1c1   :  { %v1553_v35 = vpop.f32.mrf.mxu0 }
 0x1c2   :  { %v1938_v24 = vpop.f32.mrf.mxu1 }
 0x1c3   :  { %v3760_v13 = vadd.f32 %v1938_v24, %v1553_v35  ;;  %v1555_v29 = vpop.f32.mrf.mxu0 }
 0x1c4   :  { %v1940_v15 = vpop.f32.mrf.mxu1 }
 0x1c5   :  { %v1556_v8 = vpop.f32.mrf.mxu0 }
 0x1c6   :  { %v1941_v0 = vpop.f32.mrf.mxu1 }
 0x1c7   :  { %v3762_v62 = vadd.f32 %v1941_v0, %v1556_v8  ;;  %v1558_v47 = vpop.f32.mrf.mxu0 }
 0x1c8   :  { %v1943_v63 = vpop.f32.mrf.mxu1 }
 0x1c9   :  { %v1561_v48 = vpop.f32.mrf.mxu0 }
 0x1ca   :  { %v1946_v61 = vpop.f32.mrf.mxu1 }
 0x1cb   :  { %v3764_v46 = vadd.f32 %v1946_v61, %v1561_v48  ;;  %v1563_v38 = vpop.f32.mrf.mxu0 }
 0x1cc   :  { %v1948_v52 = vpop.f32.mrf.mxu1 }
 0x1cd   :  { %v1564_v28 = vpop.f32.mrf.mxu0 }
 0x1ce   :  { %v1949_v3 = vpop.f32.mrf.mxu1 }
 0x1cf   :  { %v3766_v50 = vadd.f32 %v1949_v3, %v1564_v28  ;;  %v1566_v35 = vpop.f32.mrf.mxu0 }
 0x1d0   :  { %v1951_v24 = vpop.f32.mrf.mxu1 }
 0x1d1   :  { %v1569_v29 = vpop.f32.mrf.mxu0 }
 0x1d2   :  { %v1954_v15 = vpop.f32.mrf.mxu1 }
 0x1d3   :  { %v3768_v4 = vadd.f32 %v1954_v15, %v1569_v29  ;;  %v1571_v8 = vpop.f32.mrf.mxu0 }
 0x1d4   :  { %v1956_v0 = vpop.f32.mrf.mxu1 }
 0x1d5   :  { %v1572_v47 = vpop.f32.mrf.mxu0 }
 0x1d6   :  { %v1957_v63 = vpop.f32.mrf.mxu1 }
 0x1d7   :  { %v3770_v39 = vadd.f32 %v1957_v63, %v1572_v47  ;;  %v1574_v48 = vpop.f32.mrf.mxu0 }
 0x1d8   :  { %v1959_v61 = vpop.f32.mrf.mxu1 }
 0x1d9   :  { %v1577_v38 = vpop.f32.mrf.mxu0 }
 0x1da   :  { %v1962_v52 = vpop.f32.mrf.mxu1 }
 0x1db   :  { %v3772_v41 = vadd.f32 %v1962_v52, %v1577_v38  ;;  %v1579_v28 = vpop.f32.mrf.mxu0 }
 0x1dc   :  { %v1964_v3 = vpop.f32.mrf.mxu1 }
 0x1dd   :  { %v1580_v35 = vpop.f32.mrf.mxu0 }
 0x1de   :  { %v1965_v24 = vpop.f32.mrf.mxu1 }
 0x1df   :  { %v3774_v30 = vadd.f32 %v1965_v24, %v1580_v35  ;;  %v1582_v29 = vpop.f32.mrf.mxu0 }
 0x1e0   :  { %v1967_v15 = vpop.f32.mrf.mxu1 }
 0x1e1   :  { %v1585_v8 = vpop.f32.mrf.mxu0 }
 0x1e2   :  { %v1970_v0 = vpop.f32.mrf.mxu1 }
 0x1e3   :  { %v3776_v21 = vadd.f32 %v1970_v0, %v1585_v8  ;;  %v1587_v47 = vpop.f32.mrf.mxu0 }
 0x1e4   :  { %v1972_v63 = vpop.f32.mrf.mxu1 }
 0x1e5   :  { %v1588_v48 = vpop.f32.mrf.mxu0 }
 0x1e6   :  { %v1973_v61 = vpop.f32.mrf.mxu1 }
 0x1e7   :  { %v3778_v20 = vadd.f32 %v1973_v61, %v1588_v48  ;;  %v1590_v38 = vpop.f32.mrf.mxu0 }
 0x1e8   :  { %v1975_v52 = vpop.f32.mrf.mxu1 }
 0x1e9   :  { %v1593_v28 = vpop.f32.mrf.mxu0 }
 0x1ea   :  { %v1978_v3 = vpop.f32.mrf.mxu1 }
 0x1eb   :  { %v3780_v7 = vadd.f32 %v1978_v3, %v1593_v28  ;;  %v1595_v35 = vpop.f32.mrf.mxu0 }
 0x1ec   :  { %v1980_v24 = vpop.f32.mrf.mxu1 }
 0x1ed   :  { %v1596_v29 = vpop.f32.mrf.mxu0 }
 0x1ee   :  { %v1981_v15 = vpop.f32.mrf.mxu1 }
 0x1ef   :  { %v3782_v12 = vadd.f32 %v1981_v15, %v1596_v29  ;;  %v1598_v8 = vpop.f32.mrf.mxu0 }
 0x1f0   :  { %v1983_v0 = vpop.f32.mrf.mxu1 }
 0x1f1   :  { %3976 = vst [vmem:[#allocation16_spill] sm:$0xff] %v3782_v12  ;;  %v1601_v47 = vpop.f32.mrf.mxu0 }
 0x1f2   :  { %v1986_v63 = vpop.f32.mrf.mxu1 }
 0x1f3   :  { %v3784_v54 = vadd.f32 %v1986_v63, %v1601_v47  ;;  %v1603_v48 = vpop.f32.mrf.mxu0 }
 0x1f4   :  { %v1988_v61 = vpop.f32.mrf.mxu1 }
 0x1f5   :  { %3977 = vst [vmem:[#allocation17_spill] sm:$0xff] %v3784_v54  ;;  %v1604_v38 = vpop.f32.mrf.mxu0 }
 0x1f6   :  { %v1989_v52 = vpop.f32.mrf.mxu1 }
 0x1f7   :  { %v3786_v2 = vadd.f32 %v1989_v52, %v1604_v38  ;;  %v1606_v28 = vpop.f32.mrf.mxu0 }
 0x1f8   :  { %v1991_v3 = vpop.f32.mrf.mxu1 }
 0x1f9   :  { %3978 = vst [vmem:[#allocation18_spill] sm:$0xff] %v3786_v2  ;;  %v1609_v35 = vpop.f32.mrf.mxu0 }
 0x1fa   :  { %v1994_v24 = vpop.f32.mrf.mxu1 }
 0x1fb   :  { %v3788_v19 = vadd.f32 %v1994_v24, %v1609_v35  ;;  %v1611_v29 = vpop.f32.mrf.mxu0 }
 0x1fc   :  { %v1996_v15 = vpop.f32.mrf.mxu1 }
 0x1fd   :  { %3979 = vst [vmem:[#allocation19_spill] sm:$0xff] %v3788_v19  ;;  %v1612_v8 = vpop.f32.mrf.mxu0 }
 0x1fe   :  { %v1997_v0 = vpop.f32.mrf.mxu1 }
 0x1ff   :  { %v3790_v58 = vadd.f32 %v1997_v0, %v1612_v8  ;;  %v1614_v47 = vpop.f32.mrf.mxu0 }
 0x200   :  { %v1999_v63 = vpop.f32.mrf.mxu1 }
 0x201   :  { %v1617_v48 = vpop.f32.mrf.mxu0 }
 0x202   :  { %v2002_v61 = vpop.f32.mrf.mxu1 }
 0x203   :  { %v3792_v54 = vadd.f32 %v2002_v61, %v1617_v48  ;;  %v1619_v38 = vpop.f32.mrf.mxu0  ;;  %v3981_v48 = vmax.f32 %v3398_v9, %v3574_v57 }
 0x204   :  { %v2004_v52 = vpop.f32.mrf.mxu1 }
 0x205   :  { %v1620_v28 = vpop.f32.mrf.mxu0 }
 0x206   :  { %v2005_v3 = vpop.f32.mrf.mxu1 }
 0x207   :  { %v3794_v2 = vadd.f32 %v2005_v3, %v1620_v28  ;;  %v1622_v35 = vpop.f32.mrf.mxu0  ;;  %v3803_v28 = vld [vmem:[%s3946_s2] ss:$0 sm:$0xff] }
 0x208   :  { %v2007_v24 = vpop.f32.mrf.mxu1 }
 0x209   :  { %3980 = vst [vmem:[#allocation20_spill] sm:$0xff] %v3794_v2  ;;  %v1625_v29 = vpop.f32.mrf.mxu0 }
 0x20a   :  { %v2010_v15 = vpop.f32.mrf.mxu1 }
 0x20b   :  { %v2011_v19 = vadd.f32 %v2010_v15, %v1625_v29  ;;  %v1627_v12 = vpop.f32.mrf.mxu0 }
 0x20c   :  { %v2012_v8 = vpop.f32.mrf.mxu1 }
 0x20d   :  { %v2119_v0 = vmax.f32 %v3752_v34, %v2011_v19  ;;  %v1628_v47 = vpop.f32.mrf.mxu0  ;;  %v3982_v19 = vmax.f32 %v3409_v17, %v3587_v6 }
 0x20e   :  { %v2013_v63 = vpop.f32.mrf.mxu1 }
 0x20f   :  { %v2141_v61 = vmax.f32 %v3981_v48, %v2119_v0  ;;  %v2014_v38 = vadd.f32 %v2013_v63, %v1628_v47  ;;  %v1630_v52 = vpop.f32.mrf.mxu0 }
 0x210   :  { %v2015_v3 = vpop.f32.mrf.mxu1 }
 0x211   :  { %v2120_v35 = vmax.f32 %v3754_v11, %v2014_v38  ;;  %v1633_v12 = vpop.f32.mrf.mxu0  ;;  %v2170_v34 = vadd.f32 %v3803_v28, %v2141_v61  ;;  %v3983_v11 = vmax.f32 %v3414_v23, %v3594_v18 }
 0x212   :  { %v2018_v24 = vpop.f32.mrf.mxu1 }
 0x213   :  { %v2142_v29 = vmax.f32 %v3982_v19, %v2120_v35  ;;  %v2019_v9 = vadd.f32 %v2018_v24, %v1633_v12  ;;  %v1635_v57 = vpop.f32.mrf.mxu0  ;;  %v2192_v48 = vmax.f32 %v2170_v34, 0.0  ;;  %v3984_v24 = vmax.f32 %v3425_v31, %v3607_v32 }
 0x214   :  { %v2020_v15 = vpop.f32.mrf.mxu1 }
 0x215   :  { %v2171_v8 = vadd.f32 %v3803_v28, %v2142_v29  ;;  %v2121_v0 = vmax.f32 %v3756_v44, %v2019_v9  ;;  %v1636_v47 = vpop.f32.mrf.mxu0 }
 0x216   :  { %v2021_v63 = vpop.f32.mrf.mxu1 }
 0x217   :  { %v2193_v52 = vmax.f32 %v2171_v8, 0.0  ;;  %v2143_v38 = vmax.f32 %v3983_v11, %v2121_v0  ;;  %v2022_v61 = vadd.f32 %v2021_v63, %v1636_v47  ;;  %v1638_v3 = vpop.f32.mrf.mxu0  ;;  %v3985_v8 = vmax.f32 %v3430_v37, %v3614_v43 }
 0x218   :  { %v2023_v2 = vpop.f32.mrf.mxu1 }
 0x219   :  { %v2584_v17 = vpack.c.bf16 %v2193_v52, %v2192_v48  ;;  %v2122_v6 = vmax.f32 %v3758_v22, %v2022_v61  ;;  %v1641_v35 = vpop.f32.mrf.mxu0  ;;  %v2172_v44 = vadd.f32 %v3803_v28, %v2143_v38  ;;  %v3986_v38 = vmax.f32 %v3441_v45, %v3627_v56 }
 0x21a   :  { %v2026_v12 = vpop.f32.mrf.mxu1 }
 0x21b   :  { %2585 = vst [vmem:[%s3947_s3] sm:$0xff] %v2584_v17   ;;  %v2144_v34 = vmax.f32 %v3984_v24, %v2122_v6  ;;  %v2027_v23 = vadd.f32 %v2026_v12, %v1641_v35  ;;  %v1643_v18 = vpop.f32.mrf.mxu0  ;;  %v2194_v57 = vmax.f32 %v2172_v44, 0.0  ;;  %v3987_v24 = vmax.f32 %v3446_v51, %v3634_v5 }
 0x21c   :  { %v2028_v19 = vpop.f32.mrf.mxu1 }
 0x21d   :  { %v2173_v2 = vadd.f32 %v3803_v28, %v2144_v34  ;;  %v2123_v29 = vmax.f32 %v3760_v13, %v2027_v23  ;;  %v1644_v22 = vpop.f32.mrf.mxu0 }
 0x21e   :  { %v2029_v9 = vpop.f32.mrf.mxu1 }
 0x21f   :  { %v2195_v15 = vmax.f32 %v2173_v2, 0.0  ;;  %v2145_v0 = vmax.f32 %v3985_v8, %v2123_v29  ;;  %v2030_v47 = vadd.f32 %v2029_v9, %v1644_v22  ;;  %v1646_v63 = vpop.f32.mrf.mxu0  ;;  %v3988_v22 = vmax.f32 %v3457_v59, %v3647_v25 }
 0x220   :  { %v2031_v48 = vpop.f32.mrf.mxu1 }
 0x221   :  { %v2589_v31 = vpack.c.bf16 %v2195_v15, %v2194_v57  ;;  %v2124_v32 = vmax.f32 %v3762_v62, %v2030_v47  ;;  %v1649_v52 = vpop.f32.mrf.mxu0  ;;  %v2174_v13 = vadd.f32 %v3803_v28, %v2145_v0  ;;  %v3989_v48 = vmax.f32 %v3462_v1, %v3654_v40 }
 0x222   :  { %v2034_v11 = vpop.f32.mrf.mxu1 }
 0x223   :  { %2636 = vst [vmem:[%s3947_s3 + $0x8] sm:$0xff] %v2589_v31   ;;  %v2146_v61 = vmax.f32 %v3986_v38, %v2124_v32  ;;  %v2035_v37 = vadd.f32 %v2034_v11, %v1649_v52  ;;  %v1651_v43 = vpop.f32.mrf.mxu0  ;;  %v2196_v12 = vmax.f32 %v2174_v13, 0.0 }
 0x224   :  { %v2036_v3 = vpop.f32.mrf.mxu1 }
 0x225   :  { %v2175_v17 = vadd.f32 %v3803_v28, %v2146_v61  ;;  %v2125_v6 = vmax.f32 %v3764_v46, %v2035_v37  ;;  %v1652_v62 = vpop.f32.mrf.mxu0  ;;  %v3990_v61 = vmax.f32 %v3473_v10, %v3667_v60 }
 0x226   :  { %v2037_v35 = vpop.f32.mrf.mxu1 }
 0x227   :  { %v2197_v44 = vmax.f32 %v2175_v17, 0.0  ;;  %v2147_v34 = vmax.f32 %v3987_v24, %v2125_v6  ;;  %v2038_v23 = vadd.f32 %v2037_v35, %v1652_v62  ;;  %v1654_v18 = vpop.f32.mrf.mxu0 }
 0x228   :  { %v2039_v19 = vpop.f32.mrf.mxu1 }
 0x229   :  { %v2594_v45 = vpack.c.bf16 %v2197_v44, %v2196_v12  ;;  %v2126_v56 = vmax.f32 %v3766_v50, %v2038_v23  ;;  %v1657_v2 = vpop.f32.mrf.mxu0  ;;  %v2176_v46 = vadd.f32 %v3803_v28, %v2147_v34  ;;  %v3991_v12 = vmax.f32 %v3478_v16, %v3674_v14 }
 0x22a   :  { %v2042_v29 = vpop.f32.mrf.mxu1 }
 0x22b   :  { %2637 = vst [vmem:[%s3947_s3 + $0x10] sm:$0xff] %v2594_v45   ;;  %v2148_v9 = vmax.f32 %v3988_v22, %v2126_v56  ;;  %v2043_v51 = vadd.f32 %v2042_v29, %v1657_v2  ;;  %v1659_v5 = vpop.f32.mrf.mxu0  ;;  %v2198_v47 = vmax.f32 %v2176_v46, 0.0  ;;  %v3992_v45 = vmax.f32 %v3489_v26, %v3687_v36 }
 0x22c   :  { %v2044_v57 = vpop.f32.mrf.mxu1  ;;  %v3993_v5 = vmax.f32 %v3494_v33, %v3694_v55 }
 0x22d   :  { %v2177_v15 = vadd.f32 %v3803_v28, %v2148_v9  ;;  %v2127_v8 = vmax.f32 %v3768_v4, %v2043_v51  ;;  %v1660_v50 = vpop.f32.mrf.mxu0 }
 0x22e   :  { %v2045_v0 = vpop.f32.mrf.mxu1 }
 0x22f   :  { %v2199_v63 = vmax.f32 %v2177_v15, 0.0  ;;  %v2149_v31 = vmax.f32 %v3989_v48, %v2127_v8  ;;  %v2046_v32 = vadd.f32 %v2045_v0, %v1660_v50  ;;  %v1662_v52 = vpop.f32.mrf.mxu0 }
 0x230   :  { %v2047_v11 = vpop.f32.mrf.mxu1 }
 0x231   :  { %v2599_v59 = vpack.c.bf16 %v2199_v63, %v2198_v47  ;;  %v2128_v25 = vmax.f32 %v3770_v39, %v2046_v32  ;;  %v1665_v13 = vpop.f32.mrf.mxu0  ;;  %v2178_v4 = vadd.f32 %v3803_v28, %v2149_v31  ;;  %v3994_v63 = vmax.f32 %v3505_v42, %v3707_v27  ;;  %v3996_v27 = vld [vmem:[#allocation16_spill] sm:$0xff] }
 0x232   :  { %v2050_v38 = vpop.f32.mrf.mxu1 }
 0x233   :  { %2638 = vst [vmem:[%s3947_s3 + $0x18] sm:$0xff] %v2599_v59   ;;  %v2150_v37 = vmax.f32 %v3990_v61, %v2128_v25  ;;  %v2051_v1 = vadd.f32 %v2050_v38, %v1665_v13  ;;  %v1667_v40 = vpop.f32.mrf.mxu0  ;;  %v2200_v62 = vmax.f32 %v2178_v4, 0.0  ;;  %v3995_v13 = vmax.f32 %v3510_v49, %v3714_v53 }
 0x234   :  { %v2052_v43 = vpop.f32.mrf.mxu1 }
 0x235   :  { %v2179_v3 = vadd.f32 %v3803_v28, %v2150_v37  ;;  %v2129_v17 = vmax.f32 %v3772_v41, %v2051_v1  ;;  %v1668_v39 = vpop.f32.mrf.mxu0 }
 0x236   :  { %v2053_v6 = vpop.f32.mrf.mxu1 }
 0x237   :  { %v2201_v35 = vmax.f32 %v2179_v3, 0.0  ;;  %v2151_v44 = vmax.f32 %v3991_v12, %v2129_v17  ;;  %v2054_v24 = vadd.f32 %v2053_v6, %v1668_v39  ;;  %v1670_v34 = vpop.f32.mrf.mxu0  ;;  %v3997_v3 = vld [vmem:[#allocation2_spill] sm:$0xff]  ;;  %v3998_v17 = vld [vmem:[#allocation9_spill] sm:$0xff] }
 0x238   :  { %v2055_v23 = vpop.f32.mrf.mxu1  ;;  %v3999_v39 = vmax.f32 %v3997_v3, %v3998_v17  ;;  %v4000_v12 = vld [vmem:[#allocation17_spill] sm:$0xff] }
 0x239   :  { %v2604_v10 = vpack.c.bf16 %v2201_v35, %v2200_v62  ;;  %v2130_v60 = vmax.f32 %v3774_v30, %v2054_v24  ;;  %v1673_v18 = vpop.f32.mrf.mxu0  ;;  %v2180_v41 = vadd.f32 %v3803_v28, %v2151_v44 }
 0x23a   :  { %v2058_v19 = vpop.f32.mrf.mxu1 }
 0x23b   :  { %2639 = vst [vmem:[%s3947_s3 + $0x20] sm:$0xff] %v2604_v10   ;;  %v2152_v56 = vmax.f32 %v3992_v45, %v2130_v60  ;;  %v2059_v16 = vadd.f32 %v2058_v19, %v1673_v18  ;;  %v1675_v14 = vpop.f32.mrf.mxu0  ;;  %v2202_v9 = vmax.f32 %v2180_v41, 0.0  ;;  %v4001_v60 = vld [vmem:[#allocation3_spill] sm:$0xff]  ;;  %v4002_v18 = vld [vmem:[#allocation10_spill] sm:$0xff] }
 0x23c   :  { %v2060_v2 = vpop.f32.mrf.mxu1  ;;  %v4003_v19 = vmax.f32 %v4001_v60, %v4002_v18  ;;  %v4019_v60 = vld [vmem:[#allocation8_spill] sm:$0xff]  ;;  %v4020_v18 = vld [vmem:[#allocation15_spill] sm:$0xff] }
 0x23d   :  { %v2181_v29 = vadd.f32 %v3803_v28, %v2152_v56  ;;  %v2131_v46 = vmax.f32 %v3776_v21, %v2059_v16  ;;  %v1676_v30 = vpop.f32.mrf.mxu0  ;;  %v4004_v2 = vld [vmem:[#allocation18_spill] sm:$0xff] }
 0x23e   :  { %v2061_v22 = vpop.f32.mrf.mxu1 }
 0x23f   :  { %v2203_v51 = vmax.f32 %v2181_v29, 0.0  ;;  %v2153_v57 = vmax.f32 %v3993_v5, %v2131_v46  ;;  %v2062_v15 = vadd.f32 %v2061_v22, %v1676_v30  ;;  %v1678_v8 = vpop.f32.mrf.mxu0 }
 0x240   :  { %v2063_v50 = vpop.f32.mrf.mxu1 }
 0x241   :  { %v2609_v26 = vpack.c.bf16 %v2203_v51, %v2202_v9  ;;  %v2132_v36 = vmax.f32 %v3778_v20, %v2062_v15  ;;  %v1681_v0 = vpop.f32.mrf.mxu0  ;;  %v2182_v21 = vadd.f32 %v3803_v28, %v2153_v57  ;;  %v4005_v9 = vld [vmem:[#allocation4_spill] sm:$0xff]  ;;  %v4006_v51 = vld [vmem:[#allocation11_spill] sm:$0xff] }
 0x242   :  { %v2066_v47 = vpop.f32.mrf.mxu1  ;;  %v4007_v5 = vmax.f32 %v4005_v9, %v4006_v51 }
 0x243   :  { %2640 = vst [vmem:[%s3947_s3 + $0x28] sm:$0xff] %v2609_v26   ;;  %v2154_v48 = vmax.f32 %v3994_v63, %v2132_v36  ;;  %v2067_v33 = vadd.f32 %v2066_v47, %v1681_v0  ;;  %v1683_v55 = vpop.f32.mrf.mxu0  ;;  %v2204_v59 = vmax.f32 %v2182_v21, 0.0  ;;  %v4008_v36 = vld [vmem:[#allocation19_spill] sm:$0xff] }
 0x244   :  { %v2068_v31 = vpop.f32.mrf.mxu1  ;;  %v4010_v55 = vld [vmem:[#allocation12_spill] sm:$0xff] }
 0x245   :  { %v2183_v32 = vadd.f32 %v3803_v28, %v2154_v48  ;;  %v2133_v52 = vmax.f32 %v3780_v7, %v2067_v33  ;;  %v1684_v20 = vpop.f32.mrf.mxu0  ;;  %v4009_v33 = vld [vmem:[#allocation5_spill] sm:$0xff] }
 0x246   :  { %v2069_v11 = vpop.f32.mrf.mxu1  ;;  %v4011_v31 = vmax.f32 %v4009_v33, %v4010_v55 }
 0x247   :  { %v2205_v25 = vmax.f32 %v2183_v32, 0.0  ;;  %v2155_v38 = vmax.f32 %v3995_v13, %v2133_v52  ;;  %v2070_v4 = vadd.f32 %v2069_v11, %v1684_v20  ;;  %v1686_v61 = vpop.f32.mrf.mxu0 }
 0x248   :  { %v2071_v37 = vpop.f32.mrf.mxu1  ;;  %v4012_v61 = vld [vmem:[#allocation6_spill] sm:$0xff] }
 0x249   :  { %v2614_v42 = vpack.c.bf16 %v2205_v25, %v2204_v59  ;;  %v2134_v1 = vmax.f32 %v3996_v27, %v2070_v4  ;;  %v1689_v40 = vpop.f32.mrf.mxu0  ;;  %v2184_v7 = vadd.f32 %v3803_v28, %v2155_v38  ;;  %v4013_v37 = vld [vmem:[#allocation13_spill] sm:$0xff] }
 0x24a   :  { %v2074_v43 = vpop.f32.mrf.mxu1 }
 0x24b   :  { %2641 = vst [vmem:[%s3947_s3 + $0x30] sm:$0xff] %v2614_v42   ;;  %v2156_v6 = vmax.f32 %v3999_v39, %v2134_v1  ;;  %v2075_v49 = vadd.f32 %v2074_v43, %v1689_v40  ;;  %v1691_v53 = vpop.f32.mrf.mxu0  ;;  %v2206_v23 = vmax.f32 %v2184_v7, 0.0  ;;  %v4014_v42 = vmax.f32 %v4012_v61, %v4013_v37 }
 0x24c   :  { %v2076_v62 = vpop.f32.mrf.mxu1  ;;  %v4016_v53 = vld [vmem:[#allocation14_spill] sm:$0xff] }
 0x24d   :  { %v2185_v35 = vadd.f32 %v3803_v28, %v2156_v6  ;;  %v2135_v44 = vmax.f32 %v4000_v12, %v2075_v49  ;;  %v1692_v24 = vpop.f32.mrf.mxu0  ;;  %v4015_v49 = vld [vmem:[#allocation7_spill] sm:$0xff] }
 0x24e   :  { %v2077_v34 = vpop.f32.mrf.mxu1  ;;  %v4017_v62 = vmax.f32 %v4015_v49, %v4016_v53 }
 0x24f   :  { %v2207_v10 = vmax.f32 %v2185_v35, 0.0  ;;  %v2157_v41 = vmax.f32 %v4003_v19, %v2135_v44  ;;  %v2078_v45 = vadd.f32 %v2077_v34, %v1692_v24  ;;  %v1694_v56 = vpop.f32.mrf.mxu0  ;;  %v4021_v19 = vmax.f32 %v4019_v60, %v4020_v18 }
 0x250   :  { %v2079_v16 = vpop.f32.mrf.mxu1 }
 0x251   :  { %v2619_v14 = vpack.c.bf16 %v2207_v10, %v2206_v23  ;;  %v2136_v29 = vmax.f32 %v4004_v2, %v2078_v45  ;;  %v1697_v46 = vpop.f32.mrf.mxu0  ;;  %v2186_v22 = vadd.f32 %v3803_v28, %v2157_v41  ;;  %v4018_v23 = vld [vmem:[#allocation20_spill] sm:$0xff] }
 0x252   :  { %v2082_v30 = vpop.f32.mrf.mxu1 }
 0x253   :  { %2642 = vst [vmem:[%s3947_s3 + $0x38] sm:$0xff] %v2619_v14   ;;  %v2158_v57 = vmax.f32 %v4007_v5, %v2136_v29  ;;  %v2083_v15 = vadd.f32 %v2082_v30, %v1697_v46  ;;  %v1699_v8 = vpop.f32.mrf.mxu0  ;;  %v2208_v63 = vmax.f32 %v2186_v22, 0.0 }
 0x254   :  { %v2084_v50 = vpop.f32.mrf.mxu1 }
 0x255   :  { %v2187_v26 = vadd.f32 %v3803_v28, %v2158_v57  ;;  %v2137_v0 = vmax.f32 %v4008_v36, %v2083_v15  ;;  %v1700_v47 = vpop.f32.mrf.mxu0 }
 0x256   :  { %v2085_v21 = vpop.f32.mrf.mxu1 }
 0x257   :  { %v2209_v48 = vmax.f32 %v2187_v26, 0.0  ;;  %v2159_v32 = vmax.f32 %v4011_v31, %v2137_v0  ;;  %v2086_v52 = vadd.f32 %v2085_v21, %v1700_v47  ;;  %v1702_v20 = vpop.f32.mrf.mxu0 }
 0x258   :  { %v2087_v11 = vpop.f32.mrf.mxu1 }
 0x259   :  { %v2624_v59 = vpack.c.bf16 %v2209_v48, %v2208_v63  ;;  %v2138_v25 = vmax.f32 %v3790_v58, %v2086_v52  ;;  %v1705_v13 = vpop.f32.mrf.mxu0  ;;  %v2188_v4 = vadd.f32 %v3803_v28, %v2159_v32 }
 0x25a   :  { %v2090_v38 = vpop.f32.mrf.mxu1 }
 0x25b   :  { %2643 = vst [vmem:[%s3947_s3 + $0x40] sm:$0xff] %v2624_v59   ;;  %v2160_v27 = vmax.f32 %v4014_v42, %v2138_v25  ;;  %v2091_v1 = vadd.f32 %v2090_v38, %v1705_v13  ;;  %v1707_v40 = vpop.f32.mrf.mxu0  ;;  %v2210_v39 = vmax.f32 %v2188_v4, 0.0 }
 0x25c   :  { %v2092_v43 = vpop.f32.mrf.mxu1 }
 0x25d   :  { %v2189_v7 = vadd.f32 %v3803_v28, %v2160_v27  ;;  %v2139_v3 = vmax.f32 %v3792_v54, %v2091_v1  ;;  %v1708_v58 = vpop.f32.mrf.mxu0 }
 0x25e   :  { %v2093_v17 = vpop.f32.mrf.mxu1 }
 0x25f   :  { %v2211_v6 = vmax.f32 %v2189_v7, 0.0  ;;  %v2161_v35 = vmax.f32 %v4017_v62, %v2139_v3  ;;  %v2094_v12 = vadd.f32 %v2093_v17, %v1708_v58  ;;  %v1710_v44 = vpop.f32.mrf.mxu0 }
 0x260   :  { %v2095_v24 = vpop.f32.mrf.mxu1 }
 0x261   :  { %v2629_v34 = vpack.c.bf16 %v2211_v6, %v2210_v39  ;;  %v2140_v10 = vmax.f32 %v4018_v23, %v2094_v12  ;;  %v2190_v54 = vadd.f32 %v3803_v28, %v2161_v35 }
 0x263   :  { %2644 = vst [vmem:[%s3947_s3 + $0x48] sm:$0xff] %v2629_v34   ;;  %v2162_v41 = vmax.f32 %v4021_v19, %v2140_v10  ;;  %v2212_v56 = vmax.f32 %v2190_v54, 0.0 }
 0x265   :  { %v2191_v45 = vadd.f32 %v3803_v28, %v2162_v41 }
 0x267   :  { %v2213_v16 = vmax.f32 %v2191_v45, 0.0 }
 0x269   :  { %v2634_v14 = vpack.c.bf16 %v2213_v16, %v2212_v56 }
 0x26b   :  { %2645 = vst [vmem:[%s3947_s3 + $0x50] sm:$0xff] %v2634_v14  }

// kernel: classifier_forward.7
= control target key start
LH: loop header
LB: loop body
LE: loop exit
PB: predicated region body
PF: predicated region fallthrough
CT: control target
= control target key end

     0   :  { %s2970_s1 = inlined_call_operand.vmem [shape: bf16[768,128], index: 1, kind: input, shape index: {}]   ;;  %s2971_s0 = inlined_call_operand.vmem [shape: bf16[4,64,768], index: 0, kind: input, shape index: {}]   ;;  %s2972_s2 = inlined_call_operand.vmem [shape: f32[1,128], index: 2, kind: input, shape index: {}]   ;;  %s2973_s3 = inlined_call_operand.vmem [shape: bf16[64,128], index: 3, kind: output, shape index: {}]  }
   0x1   :  { %v2085_v0 = vld [vmem:[%s2970_s1 + $0x78] sm:$0xff]   ;;  %v2087_v2 = vld [vmem:[%s2970_s1 + $0x70] sm:$0xff]   ;;  %v2089_v4 = vld [vmem:[%s2970_s1 + $0x68] sm:$0xff]  }
   0x2   :  { %v2086_v1 = vld [vmem:[%s2970_s1 + $0x38] sm:$0xff]   ;;  %1733 = vmatprep.subr.bf16.mxu0 %v2085_v0  ;;  %2069 = vmatprep.subr.bf16.mxu1 %v2085_v0  ;;  %v2088_v3 = vld [vmem:[%s2970_s1 + $0x30] sm:$0xff]   ;;  %v2090_v5 = vld [vmem:[%s2970_s1 + $0x28] sm:$0xff]  }
   0x3   :  { %1734 = vmatpush3.bf16.msra.mxu0 %v2086_v1  ;;  %2077 = vmatpush3.bf16.msra.mxu1 %v2086_v1  ;;  %v2091_v6 = vld [vmem:[%s2970_s1 + $0x60] sm:$0xff]   ;;  %v2093_v8 = vld [vmem:[%s2970_s1 + $0x58] sm:$0xff]   ;;  %v2095_v10 = vld [vmem:[%s2970_s1 + $0x50] sm:$0xff]  }
   0x4   :  { %1735 = vmatprep.subr.bf16.mxu0 %v2087_v2  ;;  %2070 = vmatprep.subr.bf16.mxu1 %v2087_v2  ;;  %v2092_v7 = vld [vmem:[%s2970_s1 + $0x20] sm:$0xff]   ;;  %v2094_v9 = vld [vmem:[%s2970_s1 + $0x18] sm:$0xff]   ;;  %v2096_v13 = vld [vmem:[%s2970_s1 + $0x10] sm:$0xff]  }
   0x5   :  { %v2103_v11 = vld [vmem:[%s2971_s0 + $0x4] ss:$24 sps:$4 sm:$0xff]   ;;  %v2097_v14 = vld [vmem:[%s2970_s1 + $0x48] sm:$0xff]   ;;  %v2101_v19 = vld [vmem:[%s2971_s0] ss:$24 sps:$4 sm:$0xff]  }
   0x6   :  { %v2106_v12 = vld [vmem:[%s2971_s0 + $0x184] ss:$24 sps:$4 sm:$0xff]   ;;  %1007 = vmatprep.mubr.bf16.mxu0 %v2103_v11  ;;  %v2098_v15 = vld [vmem:[%s2970_s1 + $0x8] sm:$0xff]   ;;  %v2104_v21 = vld [vmem:[%s2971_s0 + $0x180] ss:$24 sps:$4 sm:$0xff]  }
   0x7   :  { %1736 = vmatpush3.bf16.msra.mxu0 %v2088_v3  ;;  %2078 = vmatpush3.bf16.msra.mxu1 %v2088_v3  ;;  %v2099_v16 = vld [vmem:[%s2970_s1 + $0x40] sm:$0xff]   ;;  %v2107_v18 = vld [vmem:[%s2970_s1 + $0xf8] sm:$0xff]   ;;  %v2111_v24 = vld [vmem:[%s2971_s0 + $0x34] ss:$24 sps:$4 sm:$0xff]  }
   0x8   :  { %1737 = vmatprep.subr.bf16.mxu0 %v2089_v4  ;;  %2071 = vmatprep.subr.bf16.mxu1 %v2089_v4  ;;  %v2100_v17 = vld [vmem:[%s2970_s1] sm:$0xff]   ;;  %v2109_v20 = vld [vmem:[%s2970_s1 + $0x178] sm:$0xff]   ;;  %v2113_v25 = vld [vmem:[%s2971_s0 + $0x1b4] ss:$24 sps:$4 sm:$0xff]  }
   0x9   :  { %1071 = vmatprep.mubr.bf16.mxu1 %v2106_v12  ;;  %v2108_v22 = vld [vmem:[%s2970_s1 + $0xb8] sm:$0xff]   ;;  %v2117_v26 = vld [vmem:[%s2970_s1 + $0xf0] sm:$0xff]   ;;  %v2127_v30 = vld [vmem:[%s2970_s1 + $0xe8] sm:$0xff]  }
   0xa   :  { %v2110_v23 = vld [vmem:[%s2970_s1 + $0x138] sm:$0xff]   ;;  %v2118_v27 = vld [vmem:[%s2970_s1 + $0xb0] sm:$0xff]   ;;  %v2129_v33 = vld [vmem:[%s2970_s1 + $0x168] sm:$0xff]  }
   0xb   :  { %1738 = vmatpush3.bf16.msra.mxu0 %v2090_v5  ;;  %2079 = vmatpush3.bf16.msra.mxu1 %v2090_v5  ;;  %v2119_v28 = vld [vmem:[%s2970_s1 + $0x170] sm:$0xff]   ;;  %v2121_v34 = vld [vmem:[%s2971_s0 + $0x64] ss:$24 sps:$4 sm:$0xff]   ;;  %v2128_v36 = vld [vmem:[%s2970_s1 + $0xa8] sm:$0xff]  }
   0xc   :  { %1739 = vmatprep.subr.bf16.mxu0 %v2091_v6  ;;  %2072 = vmatprep.subr.bf16.mxu1 %v2091_v6  ;;  %v2120_v29 = vld [vmem:[%s2970_s1 + $0x130] sm:$0xff]   ;;  %v2123_v35 = vld [vmem:[%s2971_s0 + $0x1e4] ss:$24 sps:$4 sm:$0xff]   ;;  %v2130_v37 = vld [vmem:[%s2970_s1 + $0x128] sm:$0xff]  }
   0xd   :  { %v2115_v31 = vld [vmem:[%s2971_s0 + $0x30] ss:$24 sps:$4 sm:$0xff]   ;;  %v2137_v38 = vld [vmem:[%s2970_s1 + $0xe0] sm:$0xff]   ;;  %v2131_v44 = vld [vmem:[%s2971_s0 + $0x94] ss:$24 sps:$4 sm:$0xff]  }
   0xe   :  { %v2116_v32 = vld [vmem:[%s2971_s0 + $0x1b0] ss:$24 sps:$4 sm:$0xff]   ;;  %v2139_v39 = vld [vmem:[%s2970_s1 + $0x160] sm:$0xff]   ;;  %v2133_v45 = vld [vmem:[%s2971_s0 + $0x214] ss:$24 sps:$4 sm:$0xff]  }
   0xf   :  { %1740 = vmatpush3.bf16.msra.mxu0 %v2092_v7  ;;  %2080 = vmatpush3.bf16.msra.mxu1 %v2092_v7  ;;  %v2125_v40 = vld [vmem:[%s2971_s0 + $0x60] ss:$24 sps:$4 sm:$0xff]   ;;  %v2135_v50 = vld [vmem:[%s2971_s0 + $0x90] ss:$24 sps:$4 sm:$0xff]   ;;  %v2141_v53 = vld [vmem:[%s2971_s0 + $0xc4] ss:$24 sps:$4 sm:$0xff]  }
  0x10   :  { %1741 = vmatprep.subr.bf16.mxu0 %v2093_v8  ;;  %2073 = vmatprep.subr.bf16.mxu1 %v2093_v8  ;;  %v2126_v41 = vld [vmem:[%s2971_s0 + $0x1e0] ss:$24 sps:$4 sm:$0xff]   ;;  %v2136_v51 = vld [vmem:[%s2971_s0 + $0x210] ss:$24 sps:$4 sm:$0xff]   ;;  %v2143_v54 = vld [vmem:[%s2971_s0 + $0x244] ss:$24 sps:$4 sm:$0xff]  }
  0x11   :  { %v2138_v42 = vld [vmem:[%s2970_s1 + $0xa0] sm:$0xff]   ;;  %v2147_v46 = vld [vmem:[%s2970_s1 + $0xd8] sm:$0xff]   ;;  %v2157_v52 = vld [vmem:[%s2970_s1 + $0xd0] sm:$0xff]  }
  0x12   :  { %v2140_v43 = vld [vmem:[%s2970_s1 + $0x120] sm:$0xff]   ;;  %v2148_v47 = vld [vmem:[%s2970_s1 + $0x98] sm:$0xff]   ;;  %v2158_v55 = vld [vmem:[%s2970_s1 + $0x90] sm:$0xff]  }
  0x13   :  { %1742 = vmatpush3.bf16.msra.mxu0 %v2094_v9  ;;  %2081 = vmatpush3.bf16.msra.mxu1 %v2094_v9  ;;  %v2149_v48 = vld [vmem:[%s2970_s1 + $0x158] sm:$0xff]   ;;  %v2159_v56 = vld [vmem:[%s2970_s1 + $0x150] sm:$0xff]   ;;  %v2167_v58 = vld [vmem:[%s2970_s1 + $0xc8] sm:$0xff]  }
  0x14   :  { %1743 = vmatprep.subr.bf16.mxu0 %v2095_v10  ;;  %2074 = vmatprep.subr.bf16.mxu1 %v2095_v10  ;;  %v2150_v49 = vld [vmem:[%s2970_s1 + $0x118] sm:$0xff]   ;;  %v2160_v57 = vld [vmem:[%s2970_s1 + $0x110] sm:$0xff]   ;;  %v2168_v61 = vld [vmem:[%s2970_s1 + $0x88] sm:$0xff]  }
  0x15   :  { %v2145_v59 = vld [vmem:[%s2971_s0 + $0xc0] ss:$24 sps:$4 sm:$0xff]   ;;  %v2151_v62 = vld [vmem:[%s2971_s0 + $0xf4] ss:$24 sps:$4 sm:$0xff]   ;;  %v2155_v6 = vld [vmem:[%s2971_s0 + $0xf0] ss:$24 sps:$4 sm:$0xff]  }
  0x16   :  { %v2146_v60 = vld [vmem:[%s2971_s0 + $0x240] ss:$24 sps:$4 sm:$0xff]   ;;  %v2169_v63 = vld [vmem:[%s2970_s1 + $0x148] sm:$0xff]   ;;  %v2161_v8 = vld [vmem:[%s2971_s0 + $0x124] ss:$24 sps:$4 sm:$0xff]  }
  0x17   :  { %1744 = vmatpush3.bf16.msra.mxu0 %v2096_v13  ;;  %2082 = vmatpush3.bf16.msra.mxu1 %v2096_v13  ;;  %v2170_v0 = vld [vmem:[%s2970_s1 + $0x108] sm:$0xff]   ;;  %v2177_v2 = vld [vmem:[%s2970_s1 + $0xc0] sm:$0xff]  }
  0x18   :  { %1745 = vmatprep.subr.bf16.mxu0 %v2097_v14  ;;  %2075 = vmatprep.subr.bf16.mxu1 %v2097_v14  ;;  %v2153_v1 = vld [vmem:[%s2971_s0 + $0x274] ss:$24 sps:$4 sm:$0xff]   ;;  %v2178_v3 = vld [vmem:[%s2970_s1 + $0x80] sm:$0xff]   ;;  %v2156_v7 = vld [vmem:[%s2971_s0 + $0x270] ss:$24 sps:$4 sm:$0xff]  }
  0x19   :  { %v2179_v4 = vld [vmem:[%s2970_s1 + $0x140] sm:$0xff]   ;;  %v2171_v12 = vld [vmem:[%s2971_s0 + $0x154] ss:$24 sps:$4 sm:$0xff]   ;;  %v2175_v14 = vld [vmem:[%s2971_s0 + $0x150] ss:$24 sps:$4 sm:$0xff]  }
  0x1a   :  { %v2180_v5 = vld [vmem:[%s2970_s1 + $0x100] sm:$0xff]   ;;  %v2173_v13 = vld [vmem:[%s2971_s0 + $0x2d4] ss:$24 sps:$4 sm:$0xff]  }
  0x1b   :  { %1746 = vmatpush3.bf16.msra.mxu0 %v2098_v15  ;;  %2083 = vmatpush3.bf16.msra.mxu1 %v2098_v15  ;;  %v2163_v9 = vld [vmem:[%s2971_s0 + $0x2a4] ss:$24 sps:$4 sm:$0xff]   ;;  %v2165_v10 = vld [vmem:[%s2971_s0 + $0x120] ss:$24 sps:$4 sm:$0xff]   ;;  %v2176_v15 = vld [vmem:[%s2971_s0 + $0x2d0] ss:$24 sps:$4 sm:$0xff]  }
  0x1c   :  { %1747 = vmatprep.subr.bf16.mxu0 %v2099_v16  ;;  %2076 = vmatprep.subr.bf16.mxu1 %v2099_v16  ;;  %v2166_v11 = vld [vmem:[%s2971_s0 + $0x2a0] ss:$24 sps:$4 sm:$0xff]   ;;  %v2183_v16 = vld [vmem:[%s2971_s0 + $0xc] ss:$24 sps:$4 sm:$0xff]  }
  0x1f   :  { %1748 = vmatpush3.bf16.msra.mxu0 %v2100_v17  ;;  %2084 = vmatpush3.bf16.msra.mxu1 %v2100_v17  ;;  %v2186_v17 = vld [vmem:[%s2971_s0 + $0x14] ss:$24 sps:$4 sm:$0xff]  }
  0x20   :  { %1845 = vmatprep.subr.bf16.mxu1 %v2107_v18  ;;  %1957 = vmatprep.subr.bf16.mxu0 %v2109_v20  ;;  %v2181_v18 = vld [vmem:[%s2971_s0 + $0x8] ss:$24 sps:$4 sm:$0xff]   ;;  %v2187_v20 = vld [vmem:[%s2971_s0 + $0x3c] ss:$24 sps:$4 sm:$0xff]  }
  0x22   :  { %1008 = vmatmul.mubr.bf16.vlgmr.msra.gmra.mxu0 %v2101_v19  ;;  %1072 = vmatmul.mubr.bf16.vlgmr.msra.gmra.mxu1 %v2104_v21  ;;  %v2184_v19 = vld [vmem:[%s2971_s0 + $0x10] ss:$24 sps:$4 sm:$0xff]   ;;  %v2189_v21 = vld [vmem:[%s2971_s0 + $0x44] ss:$24 sps:$4 sm:$0xff]  }
  0x23   :  { %1846 = vmatpush3.bf16.msra.mxu1 %v2108_v22  ;;  %1958 = vmatpush3.bf16.msra.mxu0 %v2110_v23  ;;  %v2191_v22 = vld [vmem:[%s2971_s0 + $0x38] ss:$24 sps:$4 sm:$0xff]  }
  0x24   :  { %1015 = vmatprep.mubr.bf16.mxu0 %v2111_v24  ;;  %1079 = vmatprep.mubr.bf16.mxu1 %v2113_v25  ;;  %v2192_v23 = vld [vmem:[%s2971_s0 + $0x40] ss:$24 sps:$4 sm:$0xff]   ;;  %v2193_v24 = vld [vmem:[%s2971_s0 + $0x6c] ss:$24 sps:$4 sm:$0xff]  }
  0x25   :  { %1847 = vmatprep.subr.bf16.mxu1 %v2117_v26  ;;  %1959 = vmatprep.subr.bf16.mxu0 %v2119_v28  ;;  %v2195_v25 = vld [vmem:[%s2971_s0 + $0x74] ss:$24 sps:$4 sm:$0xff]   ;;  %v2197_v26 = vld [vmem:[%s2971_s0 + $0x68] ss:$24 sps:$4 sm:$0xff]  }
  0x26   :  { %v2199_v28 = vld [vmem:[%s2971_s0 + $0x9c] ss:$24 sps:$4 sm:$0xff]  }
  0x27   :  { %1848 = vmatpush3.bf16.msra.mxu1 %v2118_v27  ;;  %1960 = vmatpush3.bf16.msra.mxu0 %v2120_v29  ;;  %v2198_v27 = vld [vmem:[%s2971_s0 + $0x70] ss:$24 sps:$4 sm:$0xff]   ;;  %v2201_v29 = vld [vmem:[%s2971_s0 + $0xa4] ss:$24 sps:$4 sm:$0xff]  }
  0x28   :  { %1849 = vmatprep.subr.bf16.mxu1 %v2127_v30  ;;  %1961 = vmatprep.subr.bf16.mxu0 %v2129_v33  ;;  %v2203_v30 = vld [vmem:[%s2971_s0 + $0x98] ss:$24 sps:$4 sm:$0xff]   ;;  %v2207_v33 = vld [vmem:[%s2971_s0 + $0xd4] ss:$24 sps:$4 sm:$0xff]  }
  0x2a   :  { %1016 = vmatmul.mubr.bf16.gmra.mxu0 %v2115_v31  ;;  %1080 = vmatmul.mubr.bf16.gmra.mxu1 %v2116_v32  ;;  %v2204_v31 = vld [vmem:[%s2971_s0 + $0xa0] ss:$24 sps:$4 sm:$0xff]   ;;  %v2205_v32 = vld [vmem:[%s2971_s0 + $0xcc] ss:$24 sps:$4 sm:$0xff]  }
  0x2b   :  { %1023 = vmatprep.mubr.bf16.mxu0 %v2121_v34  ;;  %1087 = vmatprep.mubr.bf16.mxu1 %v2123_v35  ;;  %v2209_v34 = vld [vmem:[%s2971_s0 + $0xc8] ss:$24 sps:$4 sm:$0xff]  }
  0x2c   :  { %1850 = vmatpush3.bf16.msra.mxu1 %v2128_v36  ;;  %1962 = vmatpush3.bf16.msra.mxu0 %v2130_v37  ;;  %v2210_v35 = vld [vmem:[%s2971_s0 + $0xd0] ss:$24 sps:$4 sm:$0xff]   ;;  %v2211_v36 = vld [vmem:[%s2971_s0 + $0xfc] ss:$24 sps:$4 sm:$0xff]  }
  0x2d   :  { %1851 = vmatprep.subr.bf16.mxu1 %v2137_v38  ;;  %1963 = vmatprep.subr.bf16.mxu0 %v2139_v39  ;;  %v2213_v37 = vld [vmem:[%s2971_s0 + $0x104] ss:$24 sps:$4 sm:$0xff]   ;;  %v2215_v38 = vld [vmem:[%s2971_s0 + $0xf8] ss:$24 sps:$4 sm:$0xff]  }
  0x2e   :  { %v2216_v39 = vld [vmem:[%s2971_s0 + $0x100] ss:$24 sps:$4 sm:$0xff]  }
  0x30   :  { %1852 = vmatpush3.bf16.msra.mxu1 %v2138_v42  ;;  %1964 = vmatpush3.bf16.msra.mxu0 %v2140_v43  ;;  %v2221_v42 = vld [vmem:[%s2971_s0 + $0x128] ss:$24 sps:$4 sm:$0xff]  }
  0x31   :  { %1853 = vmatprep.subr.bf16.mxu1 %v2147_v46  ;;  %1965 = vmatprep.subr.bf16.mxu0 %v2149_v48  ;;  %v2222_v43 = vld [vmem:[%s2971_s0 + $0x130] ss:$24 sps:$4 sm:$0xff]   ;;  %v2229_v48 = vld [vmem:[%s2971_s0 + $0x18c] ss:$24 sps:$4 sm:$0xff]  }
  0x32   :  { %1024 = vmatmul.mubr.bf16.gmra.mxu0 %v2125_v40  ;;  %1088 = vmatmul.mubr.bf16.gmra.mxu1 %v2126_v41  ;;  %v2217_v40 = vld [vmem:[%s2971_s0 + $0x12c] ss:$24 sps:$4 sm:$0xff]   ;;  %v2227_v46 = vld [vmem:[%s2971_s0 + $0x158] ss:$24 sps:$4 sm:$0xff]  }
  0x33   :  { %1031 = vmatprep.mubr.bf16.mxu0 %v2131_v44  ;;  %1095 = vmatprep.mubr.bf16.mxu1 %v2133_v45  ;;  %v2219_v41 = vld [vmem:[%s2971_s0 + $0x134] ss:$24 sps:$4 sm:$0xff]   ;;  %v2225_v45 = vld [vmem:[%s2971_s0 + $0x164] ss:$24 sps:$4 sm:$0xff]  }
  0x34   :  { %1854 = vmatpush3.bf16.msra.mxu1 %v2148_v47  ;;  %1966 = vmatpush3.bf16.msra.mxu0 %v2150_v49  ;;  %v2223_v44 = vld [vmem:[%s2971_s0 + $0x15c] ss:$24 sps:$4 sm:$0xff]   ;;  %v2228_v47 = vld [vmem:[%s2971_s0 + $0x160] ss:$24 sps:$4 sm:$0xff]  }
  0x35   :  { %1855 = vmatprep.subr.bf16.mxu1 %v2157_v52  ;;  %1967 = vmatprep.subr.bf16.mxu0 %v2159_v56  ;;  %v2231_v49 = vld [vmem:[%s2971_s0 + $0x194] ss:$24 sps:$4 sm:$0xff]  }
  0x36   :  { %v2235_v52 = vld [vmem:[%s2971_s0 + $0x1bc] ss:$24 sps:$4 sm:$0xff]   ;;  %v2241_v56 = vld [vmem:[%s2971_s0 + $0x1ec] ss:$24 sps:$4 sm:$0xff]  }
  0x38   :  { %1856 = vmatpush3.bf16.msra.mxu1 %v2158_v55  ;;  %1968 = vmatpush3.bf16.msra.mxu0 %v2160_v57  ;;  %v2240_v55 = vld [vmem:[%s2971_s0 + $0x1c0] ss:$24 sps:$4 sm:$0xff]   ;;  %v2243_v57 = vld [vmem:[%s2971_s0 + $0x1f4] ss:$24 sps:$4 sm:$0xff]  }
  0x39   :  { %1857 = vmatprep.subr.bf16.mxu1 %v2167_v58  ;;  %1969 = vmatprep.subr.bf16.mxu0 %v2169_v63  ;;  %v2245_v58 = vld [vmem:[%s2971_s0 + $0x1e8] ss:$24 sps:$4 sm:$0xff]  }
  0x3a   :  { %1032 = vmatmul.mubr.bf16.gmra.mxu0 %v2135_v50  ;;  %1096 = vmatmul.mubr.bf16.gmra.mxu1 %v2136_v51  ;;  %v2233_v50 = vld [vmem:[%s2971_s0 + $0x188] ss:$24 sps:$4 sm:$0xff]  }
  0x3b   :  { %1039 = vmatprep.mubr.bf16.mxu0 %v2141_v53  ;;  %1103 = vmatprep.mubr.bf16.mxu1 %v2143_v54  ;;  %v2234_v51 = vld [vmem:[%s2971_s0 + $0x190] ss:$24 sps:$4 sm:$0xff]   ;;  %v2237_v53 = vld [vmem:[%s2971_s0 + $0x1c4] ss:$24 sps:$4 sm:$0xff]   ;;  %v2252_v63 = vld [vmem:[%s2971_s0 + $0x220] ss:$24 sps:$4 sm:$0xff]  }
  0x3c   :  { %1858 = vmatpush3.bf16.msra.mxu1 %v2168_v61  ;;  %1970 = vmatpush3.bf16.msra.mxu0 %v2170_v0  ;;  %v2239_v54 = vld [vmem:[%s2971_s0 + $0x1b8] ss:$24 sps:$4 sm:$0xff]   ;;  %v2249_v61 = vld [vmem:[%s2971_s0 + $0x224] ss:$24 sps:$4 sm:$0xff]  }
  0x3d   :  { %1859 = vmatprep.subr.bf16.mxu1 %v2177_v2  ;;  %1971 = vmatprep.subr.bf16.mxu0 %v2179_v4  ;;  %v2253_v0 = vld [vmem:[%s2971_s0 + $0x24c] ss:$24 sps:$4 sm:$0xff]   ;;  %v2257_v2 = vld [vmem:[%s2971_s0 + $0x248] ss:$24 sps:$4 sm:$0xff]   ;;  %v2259_v4 = vld [vmem:[%s2971_s0 + $0x27c] ss:$24 sps:$4 sm:$0xff]  }
  0x40   :  { %1860 = vmatpush3.bf16.msra.mxu1 %v2178_v3  ;;  %1972 = vmatpush3.bf16.msra.mxu0 %v2180_v5  ;;  %v2258_v3 = vld [vmem:[%s2971_s0 + $0x250] ss:$24 sps:$4 sm:$0xff]   ;;  %v2261_v5 = vld [vmem:[%s2971_s0 + $0x284] ss:$24 sps:$4 sm:$0xff]  }
  0x42   :  { %1040 = vmatmul.mubr.bf16.gmra.mxu0 %v2145_v59  ;;  %1104 = vmatmul.mubr.bf16.gmra.mxu1 %v2146_v60  ;;  %v2246_v59 = vld [vmem:[%s2971_s0 + $0x1f0] ss:$24 sps:$4 sm:$0xff]   ;;  %v2247_v60 = vld [vmem:[%s2971_s0 + $0x21c] ss:$24 sps:$4 sm:$0xff]  }
  0x43   :  { %1047 = vmatprep.mubr.bf16.mxu0 %v2151_v62  ;;  %1111 = vmatprep.mubr.bf16.mxu1 %v2153_v1  ;;  %v2251_v62 = vld [vmem:[%s2971_s0 + $0x218] ss:$24 sps:$4 sm:$0xff]   ;;  %v2255_v1 = vld [vmem:[%s2971_s0 + $0x254] ss:$24 sps:$4 sm:$0xff]  }
  0x4a   :  { %1048 = vmatmul.mubr.bf16.gmra.mxu0 %v2155_v6  ;;  %1112 = vmatmul.mubr.bf16.gmra.mxu1 %v2156_v7  ;;  %v2263_v6 = vld [vmem:[%s2971_s0 + $0x278] ss:$24 sps:$4 sm:$0xff]  }
  0x4b   :  { %1055 = vmatprep.mubr.bf16.mxu0 %v2161_v8  ;;  %1119 = vmatprep.mubr.bf16.mxu1 %v2163_v9  ;;  %v2264_v7 = vld [vmem:[%s2971_s0 + $0x280] ss:$24 sps:$4 sm:$0xff]   ;;  %v2265_v8 = vld [vmem:[%s2971_s0 + $0x2ac] ss:$24 sps:$4 sm:$0xff]  }
  0x4c   :  { %v2267_v9 = vld [vmem:[%s2971_s0 + $0x2b4] ss:$24 sps:$4 sm:$0xff]  }
  0x52   :  { %1056 = vmatmul.mubr.bf16.gmra.mxu0 %v2165_v10  ;;  %1120 = vmatmul.mubr.bf16.gmra.mxu1 %v2166_v11  ;;  %v2269_v10 = vld [vmem:[%s2971_s0 + $0x2a8] ss:$24 sps:$4 sm:$0xff]  }
  0x53   :  { %1063 = vmatprep.mubr.bf16.mxu0 %v2171_v12  ;;  %1127 = vmatprep.mubr.bf16.mxu1 %v2173_v13  ;;  %v2270_v11 = vld [vmem:[%s2971_s0 + $0x2b0] ss:$24 sps:$4 sm:$0xff]   ;;  %v2271_v12 = vld [vmem:[%s2971_s0 + $0x2dc] ss:$24 sps:$4 sm:$0xff]  }
  0x54   :  { %v2273_v13 = vld [vmem:[%s2971_s0 + $0x2e4] ss:$24 sps:$4 sm:$0xff]  }
  0x5a   :  { %1064 = vmatmul.mubr.bf16.gmra.mxu0 %v2175_v14  ;;  %1128 = vmatmul.mubr.bf16.gmra.mxu1 %v2176_v15  ;;  %v2275_v14 = vld [vmem:[%s2971_s0 + $0x2d8] ss:$24 sps:$4 sm:$0xff]  }
  0x5b   :  { %1168 = vmatprep.mubr.bf16.mxu1 %v2183_v16  ;;  %1329 = vmatprep.mubr.bf16.mxu0 %v2186_v17  ;;  %v2276_v15 = vld [vmem:[%s2971_s0 + $0x2e0] ss:$24 sps:$4 sm:$0xff]  }
  0x62   :  { %1169 = vmatmul.mubr.bf16.vlgmr.msra.gmra.mxu1 %v2181_v18  ;;  %1330 = vmatmul.mubr.bf16.vlgmr.msra.gmra.mxu0 %v2184_v19 }
  0x63   :  { %1176 = vmatprep.mubr.bf16.mxu1 %v2187_v20  ;;  %1337 = vmatprep.mubr.bf16.mxu0 %v2189_v21 }
  0x6a   :  { %1177 = vmatmul.mubr.bf16.gmra.mxu1 %v2191_v22  ;;  %1338 = vmatmul.mubr.bf16.gmra.mxu0 %v2192_v23 }
  0x6b   :  { %1184 = vmatprep.mubr.bf16.mxu1 %v2193_v24  ;;  %1345 = vmatprep.mubr.bf16.mxu0 %v2195_v25 }
  0x72   :  { %1185 = vmatmul.mubr.bf16.gmra.mxu1 %v2197_v26  ;;  %1346 = vmatmul.mubr.bf16.gmra.mxu0 %v2198_v27 }
  0x73   :  { %1192 = vmatprep.mubr.bf16.mxu1 %v2199_v28  ;;  %1353 = vmatprep.mubr.bf16.mxu0 %v2201_v29 }
  0x7a   :  { %1193 = vmatmul.mubr.bf16.gmra.mxu1 %v2203_v30  ;;  %1354 = vmatmul.mubr.bf16.gmra.mxu0 %v2204_v31 }
  0x7b   :  { %1200 = vmatprep.mubr.bf16.mxu1 %v2205_v32  ;;  %1361 = vmatprep.mubr.bf16.mxu0 %v2207_v33 }
  0x82   :  { %1201 = vmatmul.mubr.bf16.gmra.mxu1 %v2209_v34  ;;  %1362 = vmatmul.mubr.bf16.gmra.mxu0 %v2210_v35 }
  0x83   :  { %1208 = vmatprep.mubr.bf16.mxu1 %v2211_v36  ;;  %1369 = vmatprep.mubr.bf16.mxu0 %v2213_v37 }
  0x8a   :  { %1209 = vmatmul.mubr.bf16.gmra.mxu1 %v2215_v38  ;;  %1370 = vmatmul.mubr.bf16.gmra.mxu0 %v2216_v39 }
  0x8b   :  { %1216 = vmatprep.mubr.bf16.mxu1 %v2217_v40  ;;  %1377 = vmatprep.mubr.bf16.mxu0 %v2219_v41 }
  0x92   :  { %1217 = vmatmul.mubr.bf16.gmra.mxu1 %v2221_v42  ;;  %1378 = vmatmul.mubr.bf16.gmra.mxu0 %v2222_v43 }
  0x93   :  { %1224 = vmatprep.mubr.bf16.mxu1 %v2223_v44  ;;  %1385 = vmatprep.mubr.bf16.mxu0 %v2225_v45 }
  0x9a   :  { %1225 = vmatmul.mubr.bf16.gmra.mxu1 %v2227_v46  ;;  %1386 = vmatmul.mubr.bf16.gmra.mxu0 %v2228_v47 }
  0x9b   :  { %1232 = vmatprep.mubr.bf16.mxu1 %v2229_v48  ;;  %1393 = vmatprep.mubr.bf16.mxu0 %v2231_v49 }
  0xa2   :  { %1233 = vmatmul.mubr.bf16.gmra.mxu1 %v2233_v50  ;;  %1394 = vmatmul.mubr.bf16.gmra.mxu0 %v2234_v51 }
  0xa3   :  { %1240 = vmatprep.mubr.bf16.mxu1 %v2235_v52  ;;  %1401 = vmatprep.mubr.bf16.mxu0 %v2237_v53 }
  0xaa   :  { %1241 = vmatmul.mubr.bf16.gmra.mxu1 %v2239_v54  ;;  %1402 = vmatmul.mubr.bf16.gmra.mxu0 %v2240_v55 }
  0xab   :  { %1248 = vmatprep.mubr.bf16.mxu1 %v2241_v56  ;;  %1409 = vmatprep.mubr.bf16.mxu0 %v2243_v57 }
  0xb2   :  { %1249 = vmatmul.mubr.bf16.gmra.mxu1 %v2245_v58  ;;  %1410 = vmatmul.mubr.bf16.gmra.mxu0 %v2246_v59 }
  0xb3   :  { %1256 = vmatprep.mubr.bf16.mxu1 %v2247_v60  ;;  %1417 = vmatprep.mubr.bf16.mxu0 %v2249_v61 }
  0xba   :  { %1257 = vmatmul.mubr.bf16.gmra.mxu1 %v2251_v62  ;;  %1418 = vmatmul.mubr.bf16.gmra.mxu0 %v2252_v63 }
  0xbb   :  { %1264 = vmatprep.mubr.bf16.mxu1 %v2253_v0  ;;  %1425 = vmatprep.mubr.bf16.mxu0 %v2255_v1 }
  0xc2   :  { %1265 = vmatmul.mubr.bf16.gmra.mxu1 %v2257_v2  ;;  %1426 = vmatmul.mubr.bf16.gmra.mxu0 %v2258_v3 }
  0xc3   :  { %1272 = vmatprep.mubr.bf16.mxu1 %v2259_v4  ;;  %1433 = vmatprep.mubr.bf16.mxu0 %v2261_v5 }
  0xca   :  { %1273 = vmatmul.mubr.bf16.gmra.mxu1 %v2263_v6  ;;  %1434 = vmatmul.mubr.bf16.gmra.mxu0 %v2264_v7 }
  0xcb   :  { %1280 = vmatprep.mubr.bf16.mxu1 %v2265_v8  ;;  %1441 = vmatprep.mubr.bf16.mxu0 %v2267_v9 }
  0xd2   :  { %1281 = vmatmul.mubr.bf16.gmra.mxu1 %v2269_v10  ;;  %1442 = vmatmul.mubr.bf16.gmra.mxu0 %v2270_v11 }
  0xd3   :  { %1288 = vmatprep.mubr.bf16.mxu1 %v2271_v12  ;;  %1449 = vmatprep.mubr.bf16.mxu0 %v2273_v13 }
  0xda   :  { %1289 = vmatmul.mubr.bf16.gmra.mxu1 %v2275_v14  ;;  %1450 = vmatmul.mubr.bf16.gmra.mxu0 %v2276_v15 }
  0xe2   :  { %v1749_v16 = vpop.f32.mrf.mxu0  ;;  %v1797_v17 = vpop.f32.mrf.mxu1 }
  0xe4   :  { %v1750_v18 = vpop.f32.mrf.mxu0  ;;  %v1798_v19 = vpop.f32.mrf.mxu1 }
  0xe5   :  { %v2729_v20 = vadd.f32 %v1750_v18, %v1749_v16  ;;  %v2731_v21 = vadd.f32 %v1798_v19, %v1797_v17 }
  0xe6   :  { %v1752_v22 = vpop.f32.mrf.mxu0  ;;  %v1800_v23 = vpop.f32.mrf.mxu1 }
  0xe8   :  { %v1753_v24 = vpop.f32.mrf.mxu0  ;;  %v1801_v25 = vpop.f32.mrf.mxu1 }
  0xe9   :  { %v2733_v26 = vadd.f32 %v1753_v24, %v1752_v22  ;;  %v2735_v27 = vadd.f32 %v1801_v25, %v1800_v23 }
  0xea   :  { %v1755_v28 = vpop.f32.mrf.mxu0  ;;  %v1803_v29 = vpop.f32.mrf.mxu1 }
  0xec   :  { %v1756_v30 = vpop.f32.mrf.mxu0  ;;  %v1804_v31 = vpop.f32.mrf.mxu1 }
  0xed   :  { %v2737_v32 = vadd.f32 %v1756_v30, %v1755_v28  ;;  %v2739_v33 = vadd.f32 %v1804_v31, %v1803_v29 }
  0xee   :  { %v1758_v34 = vpop.f32.mrf.mxu0  ;;  %v1806_v35 = vpop.f32.mrf.mxu1 }
  0xf0   :  { %v1759_v36 = vpop.f32.mrf.mxu0  ;;  %v1807_v37 = vpop.f32.mrf.mxu1 }
  0xf1   :  { %v2741_v38 = vadd.f32 %v1759_v36, %v1758_v34  ;;  %v2743_v39 = vadd.f32 %v1807_v37, %v1806_v35 }
  0xf2   :  { %v1761_v40 = vpop.f32.mrf.mxu0  ;;  %v1809_v41 = vpop.f32.mrf.mxu1 }
  0xf4   :  { %v1762_v42 = vpop.f32.mrf.mxu0  ;;  %v1810_v43 = vpop.f32.mrf.mxu1 }
  0xf5   :  { %v2745_v44 = vadd.f32 %v1762_v42, %v1761_v40  ;;  %v2747_v45 = vadd.f32 %v1810_v43, %v1809_v41 }
  0xf6   :  { %v1764_v46 = vpop.f32.mrf.mxu0  ;;  %v1812_v47 = vpop.f32.mrf.mxu1 }
  0xf8   :  { %v1765_v48 = vpop.f32.mrf.mxu0  ;;  %v1813_v49 = vpop.f32.mrf.mxu1 }
  0xf9   :  { %v2749_v50 = vadd.f32 %v1765_v48, %v1764_v46  ;;  %v2751_v51 = vadd.f32 %v1813_v49, %v1812_v47 }
  0xfa   :  { %v1767_v52 = vpop.f32.mrf.mxu0  ;;  %v1815_v53 = vpop.f32.mrf.mxu1 }
  0xfc   :  { %v1768_v54 = vpop.f32.mrf.mxu0  ;;  %v1816_v55 = vpop.f32.mrf.mxu1 }
  0xfd   :  { %v2753_v56 = vadd.f32 %v1768_v54, %v1767_v52  ;;  %v2755_v57 = vadd.f32 %v1816_v55, %v1815_v53 }
  0xfe   :  { %v1770_v58 = vpop.f32.mrf.mxu0  ;;  %v1818_v59 = vpop.f32.mrf.mxu1 }
  0xff   :  { %2982 = vst [vmem:[#allocation2_spill] sm:$0xff] %v2755_v57 }
 0x100   :  { %v1771_v60 = vpop.f32.mrf.mxu0  ;;  %v1819_v61 = vpop.f32.mrf.mxu1 }
 0x101   :  { %v2757_v62 = vadd.f32 %v1771_v60, %v1770_v58  ;;  %v2759_v63 = vadd.f32 %v1819_v61, %v1818_v59 }
 0x102   :  { %v1773_v0 = vpop.f32.mrf.mxu0  ;;  %v1821_v1 = vpop.f32.mrf.mxu1 }
 0x103   :  { %2983 = vst [vmem:[#allocation3_spill] sm:$0xff] %v2759_v63 }
 0x104   :  { %v1774_v2 = vpop.f32.mrf.mxu0  ;;  %v1822_v3 = vpop.f32.mrf.mxu1 }
 0x105   :  { %v2761_v4 = vadd.f32 %v1774_v2, %v1773_v0  ;;  %v2763_v5 = vadd.f32 %v1822_v3, %v1821_v1 }
 0x106   :  { %v1776_v6 = vpop.f32.mrf.mxu0  ;;  %v1824_v7 = vpop.f32.mrf.mxu1 }
 0x108   :  { %v1777_v8 = vpop.f32.mrf.mxu0  ;;  %v1825_v9 = vpop.f32.mrf.mxu1 }
 0x109   :  { %v2765_v10 = vadd.f32 %v1777_v8, %v1776_v6  ;;  %v2767_v11 = vadd.f32 %v1825_v9, %v1824_v7 }
 0x10a   :  { %v1779_v12 = vpop.f32.mrf.mxu0  ;;  %v1827_v13 = vpop.f32.mrf.mxu1 }
 0x10c   :  { %v1780_v14 = vpop.f32.mrf.mxu0  ;;  %v1828_v15 = vpop.f32.mrf.mxu1 }
 0x10d   :  { %v2769_v16 = vadd.f32 %v1780_v14, %v1779_v12  ;;  %v2771_v17 = vadd.f32 %v1828_v15, %v1827_v13 }
 0x10e   :  { %v1782_v18 = vpop.f32.mrf.mxu0  ;;  %v1830_v19 = vpop.f32.mrf.mxu1 }
 0x110   :  { %v1783_v22 = vpop.f32.mrf.mxu0  ;;  %v1831_v23 = vpop.f32.mrf.mxu1 }
 0x111   :  { %v2773_v24 = vadd.f32 %v1783_v22, %v1782_v18  ;;  %v2775_v25 = vadd.f32 %v1831_v23, %v1830_v19 }
 0x112   :  { %v1785_v28 = vpop.f32.mrf.mxu0  ;;  %v1833_v29 = vpop.f32.mrf.mxu1 }
 0x114   :  { %v1786_v30 = vpop.f32.mrf.mxu0  ;;  %v1834_v31 = vpop.f32.mrf.mxu1 }
 0x115   :  { %v2777_v34 = vadd.f32 %v1786_v30, %v1785_v28  ;;  %v2779_v35 = vadd.f32 %v1834_v31, %v1833_v29 }
 0x116   :  { %v1788_v36 = vpop.f32.mrf.mxu0  ;;  %v1836_v37 = vpop.f32.mrf.mxu1 }
 0x118   :  { %v1789_v40 = vpop.f32.mrf.mxu0  ;;  %v1837_v41 = vpop.f32.mrf.mxu1 }
 0x119   :  { %v2781_v42 = vadd.f32 %v1789_v40, %v1788_v36  ;;  %v2783_v43 = vadd.f32 %v1837_v41, %v1836_v37 }
 0x11a   :  { %v1791_v46 = vpop.f32.mrf.mxu0  ;;  %v1839_v47 = vpop.f32.mrf.mxu1 }
 0x11b   :  { %2984 = vst [vmem:[#allocation4_spill] sm:$0xff] %v2783_v43 }
 0x11c   :  { %v1792_v48 = vpop.f32.mrf.mxu0  ;;  %v1840_v49 = vpop.f32.mrf.mxu1 }
 0x11d   :  { %v2785_v52 = vadd.f32 %v1792_v48, %v1791_v46  ;;  %v2787_v53 = vadd.f32 %v1840_v49, %v1839_v47 }
 0x11e   :  { %v1794_v54 = vpop.f32.mrf.mxu0  ;;  %v1842_v55 = vpop.f32.mrf.mxu1 }
 0x11f   :  { %2985 = vst [vmem:[#allocation5_spill] sm:$0xff] %v2787_v53 }
 0x120   :  { %v1795_v58 = vpop.f32.mrf.mxu0  ;;  %v1843_v59 = vpop.f32.mrf.mxu1 }
 0x121   :  { %v2789_v60 = vadd.f32 %v1795_v58, %v1794_v54  ;;  %v2791_v61 = vadd.f32 %v1843_v59, %v1842_v55 }
 0x122   :  { %v1861_v0 = vpop.f32.mrf.mxu1  ;;  %v1973_v1 = vpop.f32.mrf.mxu0 }
 0x123   :  { %2986 = vst [vmem:[#allocation6_spill] sm:$0xff] %v2791_v61 }
 0x124   :  { %v1862_v2 = vpop.f32.mrf.mxu1  ;;  %v1974_v3 = vpop.f32.mrf.mxu0 }
 0x125   :  { %v1863_v6 = vadd.f32 %v1862_v2, %v1861_v0  ;;  %v1975_v7 = vadd.f32 %v1974_v3, %v1973_v1 }
 0x126   :  { %v1864_v8 = vpop.f32.mrf.mxu1  ;;  %v1976_v9 = vpop.f32.mrf.mxu0 }
 0x127   :  { %v1171_v12 = vadd.f32 %v1863_v6, %v2729_v20 }
 0x128   :  { %v1865_v13 = vpop.f32.mrf.mxu1  ;;  %v1977_v14 = vpop.f32.mrf.mxu0 }
 0x129   :  { %v2794_v15 = vadd.f32 %v1975_v7, %v1171_v12  ;;  %v1866_v18 = vadd.f32 %v1865_v13, %v1864_v8  ;;  %v1978_v19 = vadd.f32 %v1977_v14, %v1976_v9 }
 0x12a   :  { %v1867_v22 = vpop.f32.mrf.mxu1  ;;  %v1979_v23 = vpop.f32.mrf.mxu0 }
 0x12b   :  { %v1174_v28 = vadd.f32 %v1866_v18, %v2733_v26 }
 0x12c   :  { %v1868_v29 = vpop.f32.mrf.mxu1  ;;  %v1980_v30 = vpop.f32.mrf.mxu0 }
 0x12d   :  { %v2797_v31 = vadd.f32 %v1978_v19, %v1174_v28  ;;  %v1869_v36 = vadd.f32 %v1868_v29, %v1867_v22  ;;  %v1981_v37 = vadd.f32 %v1980_v30, %v1979_v23 }
 0x12e   :  { %v1870_v40 = vpop.f32.mrf.mxu1  ;;  %v1982_v41 = vpop.f32.mrf.mxu0 }
 0x12f   :  { %v1179_v20 = vadd.f32 %v1869_v36, %v2737_v32 }
 0x130   :  { %v1871_v46 = vpop.f32.mrf.mxu1  ;;  %v1983_v47 = vpop.f32.mrf.mxu0 }
 0x131   :  { %v2800_v48 = vadd.f32 %v1981_v37, %v1179_v20  ;;  %v1872_v49 = vadd.f32 %v1871_v46, %v1870_v40  ;;  %v1984_v54 = vadd.f32 %v1983_v47, %v1982_v41 }
 0x132   :  { %v1873_v55 = vpop.f32.mrf.mxu1  ;;  %v1985_v58 = vpop.f32.mrf.mxu0 }
 0x133   :  { %v1182_v26 = vadd.f32 %v1872_v49, %v2741_v38 }
 0x134   :  { %v1874_v59 = vpop.f32.mrf.mxu1  ;;  %v1986_v0 = vpop.f32.mrf.mxu0 }
 0x135   :  { %v2803_v1 = vadd.f32 %v1984_v54, %v1182_v26  ;;  %v1875_v2 = vadd.f32 %v1874_v59, %v1873_v55  ;;  %v1987_v3 = vadd.f32 %v1986_v0, %v1985_v58 }
 0x136   :  { %v1876_v6 = vpop.f32.mrf.mxu1  ;;  %v1988_v7 = vpop.f32.mrf.mxu0 }
 0x137   :  { %v1187_v32 = vadd.f32 %v1875_v2, %v2745_v44 }
 0x138   :  { %v1877_v8 = vpop.f32.mrf.mxu1  ;;  %v1989_v9 = vpop.f32.mrf.mxu0 }
 0x139   :  { %v2806_v12 = vadd.f32 %v1987_v3, %v1187_v32  ;;  %v1878_v13 = vadd.f32 %v1877_v8, %v1876_v6  ;;  %v1990_v14 = vadd.f32 %v1989_v9, %v1988_v7 }
 0x13a   :  { %v1879_v18 = vpop.f32.mrf.mxu1  ;;  %v1991_v19 = vpop.f32.mrf.mxu0 }
 0x13b   :  { %2987 = vst [vmem:[#allocation7_spill] sm:$0xff] %v2806_v12  ;;  %v1190_v38 = vadd.f32 %v1878_v13, %v2749_v50 }
 0x13c   :  { %v1880_v22 = vpop.f32.mrf.mxu1  ;;  %v1992_v23 = vpop.f32.mrf.mxu0 }
 0x13d   :  { %v2809_v28 = vadd.f32 %v1990_v14, %v1190_v38  ;;  %v1881_v29 = vadd.f32 %v1880_v22, %v1879_v18  ;;  %v1993_v30 = vadd.f32 %v1992_v23, %v1991_v19 }
 0x13e   :  { %v1882_v36 = vpop.f32.mrf.mxu1  ;;  %v1994_v37 = vpop.f32.mrf.mxu0 }
 0x13f   :  { %2988 = vst [vmem:[#allocation8_spill] sm:$0xff] %v2809_v28  ;;  %v1195_v44 = vadd.f32 %v1881_v29, %v2753_v56 }
 0x140   :  { %v1883_v40 = vpop.f32.mrf.mxu1  ;;  %v1995_v41 = vpop.f32.mrf.mxu0 }
 0x141   :  { %v2812_v20 = vadd.f32 %v1993_v30, %v1195_v44  ;;  %v1884_v46 = vadd.f32 %v1883_v40, %v1882_v36  ;;  %v1996_v47 = vadd.f32 %v1995_v41, %v1994_v37 }
 0x142   :  { %v1885_v49 = vpop.f32.mrf.mxu1  ;;  %v1997_v54 = vpop.f32.mrf.mxu0 }
 0x143   :  { %2989 = vst [vmem:[#allocation9_spill] sm:$0xff] %v2812_v20  ;;  %v1198_v50 = vadd.f32 %v1884_v46, %v2757_v62 }
 0x144   :  { %v1886_v55 = vpop.f32.mrf.mxu1  ;;  %v1998_v58 = vpop.f32.mrf.mxu0 }
 0x145   :  { %v2815_v26 = vadd.f32 %v1996_v47, %v1198_v50  ;;  %v1887_v59 = vadd.f32 %v1886_v55, %v1885_v49  ;;  %v1999_v0 = vadd.f32 %v1998_v58, %v1997_v54 }
 0x146   :  { %v1888_v2 = vpop.f32.mrf.mxu1  ;;  %v2000_v3 = vpop.f32.mrf.mxu0 }
 0x147   :  { %2990 = vst [vmem:[#allocation10_spill] sm:$0xff] %v2815_v26  ;;  %v1203_v56 = vadd.f32 %v1887_v59, %v2761_v4 }
 0x148   :  { %v1889_v6 = vpop.f32.mrf.mxu1  ;;  %v2001_v7 = vpop.f32.mrf.mxu0 }
 0x149   :  { %v2818_v32 = vadd.f32 %v1999_v0, %v1203_v56  ;;  %v1890_v8 = vadd.f32 %v1889_v6, %v1888_v2  ;;  %v2002_v9 = vadd.f32 %v2001_v7, %v2000_v3 }
 0x14a   :  { %v1891_v13 = vpop.f32.mrf.mxu1  ;;  %v2003_v14 = vpop.f32.mrf.mxu0 }
 0x14b   :  { %v1206_v18 = vadd.f32 %v1890_v8, %v2765_v10 }
 0x14c   :  { %v1892_v19 = vpop.f32.mrf.mxu1  ;;  %v2004_v38 = vpop.f32.mrf.mxu0 }
 0x14d   :  { %v2823_v22 = vadd.f32 %v2002_v9, %v1206_v18  ;;  %v1893_v23 = vadd.f32 %v1892_v19, %v1891_v13  ;;  %v2005_v29 = vadd.f32 %v2004_v38, %v2003_v14 }
 0x14e   :  { %v1894_v4 = vpop.f32.mrf.mxu1  ;;  %v2006_v30 = vpop.f32.mrf.mxu0 }
 0x14f   :  { %v1211_v37 = vadd.f32 %v1893_v23, %v2769_v16 }
 0x150   :  { %v1895_v44 = vpop.f32.mrf.mxu1  ;;  %v2007_v40 = vpop.f32.mrf.mxu0 }
 0x151   :  { %v2828_v41 = vadd.f32 %v2005_v29, %v1211_v37  ;;  %v1896_v46 = vadd.f32 %v1895_v44, %v1894_v4  ;;  %v2008_v47 = vadd.f32 %v2007_v40, %v2006_v30 }
 0x152   :  { %v1897_v10 = vpop.f32.mrf.mxu1  ;;  %v2009_v49 = vpop.f32.mrf.mxu0 }
 0x153   :  { %v1214_v50 = vadd.f32 %v1896_v46, %v2773_v24 }
 0x154   :  { %v1898_v55 = vpop.f32.mrf.mxu1  ;;  %v2010_v58 = vpop.f32.mrf.mxu0 }
 0x155   :  { %v2833_v59 = vadd.f32 %v2008_v47, %v1214_v50  ;;  %v1899_v0 = vadd.f32 %v1898_v55, %v1897_v10  ;;  %v2011_v2 = vadd.f32 %v2010_v58, %v2009_v49 }
 0x156   :  { %v1900_v16 = vpop.f32.mrf.mxu1  ;;  %v2012_v3 = vpop.f32.mrf.mxu0 }
 0x157   :  { %v1219_v6 = vadd.f32 %v1899_v0, %v2777_v34 }
 0x158   :  { %v1901_v7 = vpop.f32.mrf.mxu1  ;;  %v2013_v8 = vpop.f32.mrf.mxu0 }
 0x159   :  { %v2838_v9 = vadd.f32 %v2011_v2, %v1219_v6  ;;  %v1902_v13 = vadd.f32 %v1901_v7, %v1900_v16  ;;  %v2014_v14 = vadd.f32 %v2013_v8, %v2012_v3 }
 0x15a   :  { %v1903_v24 = vpop.f32.mrf.mxu1  ;;  %v2015_v18 = vpop.f32.mrf.mxu0 }
 0x15b   :  { %2991 = vst [vmem:[#allocation11_spill] sm:$0xff] %v2838_v9  ;;  %v1222_v38 = vadd.f32 %v1902_v13, %v2781_v42 }
 0x15c   :  { %v1904_v23 = vpop.f32.mrf.mxu1  ;;  %v2016_v29 = vpop.f32.mrf.mxu0 }
 0x15d   :  { %v2843_v4 = vadd.f32 %v2014_v14, %v1222_v38  ;;  %v1905_v30 = vadd.f32 %v1904_v23, %v1903_v24  ;;  %v2017_v37 = vadd.f32 %v2016_v29, %v2015_v18 }
 0x15e   :  { %v1906_v34 = vpop.f32.mrf.mxu1  ;;  %v2018_v44 = vpop.f32.mrf.mxu0 }
 0x15f   :  { %2992 = vst [vmem:[#allocation12_spill] sm:$0xff] %v2843_v4  ;;  %v1227_v46 = vadd.f32 %v1905_v30, %v2785_v52 }
 0x160   :  { %v1907_v47 = vpop.f32.mrf.mxu1  ;;  %v2019_v10 = vpop.f32.mrf.mxu0 }
 0x161   :  { %v2848_v49 = vadd.f32 %v2017_v37, %v1227_v46  ;;  %v1908_v50 = vadd.f32 %v1907_v47, %v1906_v34  ;;  %v2020_v55 = vadd.f32 %v2019_v10, %v2018_v44 }
 0x162   :  { %v1909_v42 = vpop.f32.mrf.mxu1  ;;  %v2021_v58 = vpop.f32.mrf.mxu0 }
 0x163   :  { %2993 = vst [vmem:[#allocation13_spill] sm:$0xff] %v2848_v49  ;;  %v1230_v2 = vadd.f32 %v1908_v50, %v2789_v60 }
 0x164   :  { %v1910_v16 = vpop.f32.mrf.mxu1  ;;  %v2022_v3 = vpop.f32.mrf.mxu0 }
 0x165   :  { %v2853_v6 = vadd.f32 %v2020_v55, %v1230_v2 }
 0x166   :  { %v1912_v7 = vpop.f32.mrf.mxu1  ;;  %v2024_v8 = vpop.f32.mrf.mxu0 }
 0x167   :  { %2994 = vst [vmem:[#allocation14_spill] sm:$0xff] %v2853_v6  ;;  %v1911_v6 = vadd.f32 %v1910_v16, %v1909_v42 }
 0x168   :  { %v1913_v13 = vpop.f32.mrf.mxu1  ;;  %v2025_v14 = vpop.f32.mrf.mxu0 }
 0x169   :  { %v1914_v20 = vadd.f32 %v1913_v13, %v1912_v7  ;;  %v1235_v28 = vadd.f32 %v1911_v6, %v2731_v21  ;;  %v2026_v7 = vadd.f32 %v2025_v14, %v2024_v8 }
 0x16a   :  { %v1915_v24 = vpop.f32.mrf.mxu1  ;;  %v2027_v18 = vpop.f32.mrf.mxu0 }
 0x16c   :  { %v1916_v38 = vpop.f32.mrf.mxu1  ;;  %v2028_v23 = vpop.f32.mrf.mxu0 }
 0x16d   :  { %v1917_v42 = vadd.f32 %v1916_v38, %v1915_v24 }
 0x16e   :  { %v1918_v29 = vpop.f32.mrf.mxu1  ;;  %v2857_v30 = vpop.f32.mrf.mxu0 }
 0x170   :  { %v1919_v37 = vpop.f32.mrf.mxu1  ;;  %v2859_v60 = vpop.f32.mrf.mxu0 }
 0x171   :  { %v2032_v14 = vadd.f32 %v2859_v60, %v2857_v30  ;;  %v3004_v30 = vmax.f32 %v2800_v48, %v2828_v41 }
 0x172   :  { %v1921_v34 = vpop.f32.mrf.mxu1  ;;  %v2861_v44 = vpop.f32.mrf.mxu0 }
 0x174   :  { %v1922_v46 = vpop.f32.mrf.mxu1  ;;  %v2863_v47 = vpop.f32.mrf.mxu0 }
 0x176   :  { %v2865_v10 = vpop.f32.mrf.mxu1  ;;  %v2867_v50 = vpop.f32.mrf.mxu0 }
 0x178   :  { %v2869_v55 = vpop.f32.mrf.mxu1  ;;  %v2871_v2 = vpop.f32.mrf.mxu0 }
 0x179   :  { %2995 = vst [vmem:[#allocation15_spill] sm:$0xff] %v2871_v2 }
 0x17a   :  { %v2873_v52 = vpop.f32.mrf.mxu1  ;;  %v2875_v0 = vpop.f32.mrf.mxu0 }
 0x17b   :  { %2996 = vst [vmem:[#allocation16_spill] sm:$0xff] %v2875_v0 }
 0x17c   :  { %v2877_v40 = vpop.f32.mrf.mxu1  ;;  %v2879_v19 = vpop.f32.mrf.mxu0 }
 0x17d   :  { %2997 = vst [vmem:[#allocation17_spill] sm:$0xff] %v2879_v19  ;;  %v2023_v19 = vadd.f32 %v2022_v3, %v2021_v58  ;;  %v1920_v58 = vadd.f32 %v1919_v37, %v1918_v29 }
 0x17e   :  { %v2881_v56 = vpop.f32.mrf.mxu1  ;;  %v2883_v54 = vpop.f32.mrf.mxu0 }
 0x17f   :  { %2998 = vst [vmem:[#allocation18_spill] sm:$0xff] %v2881_v56  ;;  %2999 = vst [vmem:[#allocation19_spill] sm:$0xff] %v2883_v54  ;;  %v1238_v54 = vadd.f32 %v1914_v20, %v2735_v27  ;;  %v3002_v27 = vmax.f32 %v2794_v15, %v2818_v32 }
 0x180   :  { %v2885_v36 = vpop.f32.mrf.mxu1  ;;  %v2887_v62 = vpop.f32.mrf.mxu0 }
 0x181   :  { %3000 = vst [vmem:[#allocation20_spill] sm:$0xff] %v2885_v36  ;;  %3001 = vst [vmem:[#allocation21_spill] sm:$0xff] %v2887_v62  ;;  %v1396_v62 = vadd.f32 %v2023_v19, %v1235_v28 }
 0x182   :  { %v1933_v26 = vpop.f32.mrf.mxu1  ;;  %v2045_v49 = vpop.f32.mrf.mxu0 }
 0x184   :  { %v1934_v61 = vpop.f32.mrf.mxu1  ;;  %v2046_v4 = vpop.f32.mrf.mxu0 }
 0x185   :  { %v1935_v63 = vadd.f32 %v1934_v61, %v1933_v26  ;;  %v2047_v12 = vadd.f32 %v2046_v4, %v2045_v49  ;;  %v1399_v26 = vadd.f32 %v2026_v7, %v1238_v54  ;;  %v3003_v49 = vmax.f32 %v2797_v31, %v2823_v22 }
 0x186   :  { %v1936_v53 = vpop.f32.mrf.mxu1  ;;  %v2048_v0 = vpop.f32.mrf.mxu0  ;;  %v1926_v31 = vadd.f32 %v2869_v55, %v2865_v10 }
 0x187   :  { %v1267_v9 = vadd.f32 %v1935_v63, %v2763_v5  ;;  %v1243_v5 = vadd.f32 %v1917_v42, %v2739_v33  ;;  %v1246_v33 = vadd.f32 %v1920_v58, %v2743_v39 }
 0x188   :  { %v1937_v36 = vpop.f32.mrf.mxu1  ;;  %v2049_v56 = vpop.f32.mrf.mxu0  ;;  %v1254_v55 = vadd.f32 %v1926_v31, %v2751_v51  ;;  %v3006_v51 = vld [vmem:[#allocation15_spill] sm:$0xff] }
 0x189   :  { %v1428_v16 = vadd.f32 %v2047_v12, %v1267_v9  ;;  %v1938_v57 = vadd.f32 %v1937_v36, %v1936_v53  ;;  %v2050_v61 = vadd.f32 %v2049_v56, %v2048_v0  ;;  %v2900_v53 = vld [vmem:[%s2972_s2] ss:$0 sm:$0xff]  ;;  %v1923_v9 = vadd.f32 %v1922_v46, %v1921_v34 }
 0x18a   :  { %v1939_v13 = vpop.f32.mrf.mxu1  ;;  %v2051_v43 = vpop.f32.mrf.mxu0 }
 0x18b   :  { %v1466_v2 = vmax.f32 %v1396_v62, %v1428_v16  ;;  %v1270_v21 = vadd.f32 %v1938_v57, %v2767_v11  ;;  %v2029_v11 = vadd.f32 %v2028_v23, %v2027_v18  ;;  %v1407_v23 = vadd.f32 %v2032_v14, %v1246_v33 }
 0x18c   :  { %v1940_v3 = vpop.f32.mrf.mxu1  ;;  %v2052_v63 = vpop.f32.mrf.mxu0  ;;  %v1251_v29 = vadd.f32 %v1923_v9, %v2747_v45 }
 0x18d   :  { %v1474_v28 = vmax.f32 %v3002_v27, %v1466_v2  ;;  %v1431_v12 = vadd.f32 %v2050_v61, %v1270_v21  ;;  %v1941_v20 = vadd.f32 %v1940_v3, %v1939_v13  ;;  %v2053_v56 = vadd.f32 %v2052_v63, %v2051_v43 }
 0x18e   :  { %v1942_v62 = vpop.f32.mrf.mxu1  ;;  %v2054_v57 = vpop.f32.mrf.mxu0  ;;  %v1404_v4 = vadd.f32 %v2029_v11, %v1243_v5  ;;  %v1929_v61 = vadd.f32 %v2877_v40, %v2873_v52  ;;  %v2038_v63 = vadd.f32 %v3006_v51, %v2867_v50  ;;  %v3012_v50 = vld [vmem:[#allocation11_spill] sm:$0xff] }
 0x18f   :  { %v1467_v36 = vmax.f32 %v1399_v26, %v1431_v12  ;;  %v1275_v54 = vadd.f32 %v1941_v20, %v2771_v17  ;;  %v1489_v15 = vadd.f32 %v2900_v53, %v1474_v28  ;;  %v3007_v28 = vld [vmem:[#allocation4_spill] sm:$0xff] }
 0x190   :  { %v1943_v32 = vpop.f32.mrf.mxu1  ;;  %v2055_v19 = vpop.f32.mrf.mxu0 }
 0x191   :  { %v1475_v0 = vmax.f32 %v3003_v49, %v1467_v36  ;;  %v1436_v6 = vadd.f32 %v2053_v56, %v1275_v54  ;;  %v1944_v8 = vadd.f32 %v1943_v32, %v1942_v62  ;;  %v2056_v38 = vadd.f32 %v2055_v19, %v2054_v57  ;;  %v3008_v57 = vld [vmem:[#allocation2_spill] sm:$0xff]  ;;  %v3010_v54 = vld [vmem:[#allocation20_spill] sm:$0xff] }
 0x192   :  { %v1945_v24 = vpop.f32.mrf.mxu1  ;;  %v2057_v17 = vpop.f32.mrf.mxu0  ;;  %v1497_v22 = vmax.f32 %v1489_v15, 0.0  ;;  %v1415_v62 = vadd.f32 %v2038_v63, %v1254_v55  ;;  %v1259_v11 = vadd.f32 %v1929_v61, %v3008_v57  ;;  %v3009_v36 = vld [vmem:[#allocation18_spill] sm:$0xff]  ;;  %v3011_v15 = vld [vmem:[#allocation7_spill] sm:$0xff] }
 0x193   :  { %v1490_v43 = vadd.f32 %v2900_v53, %v1475_v0  ;;  %v1468_v39 = vmax.f32 %v1404_v4, %v1436_v6  ;;  %v1278_v18 = vadd.f32 %v1944_v8, %v2775_v25  ;;  %v2035_v25 = vadd.f32 %v2863_v47, %v2861_v44  ;;  %v3014_v0 = vld [vmem:[#allocation16_spill] sm:$0xff]  ;;  %v3015_v6 = vld [vmem:[#allocation17_spill] sm:$0xff] }
 0x194   :  { %v1946_v37 = vpop.f32.mrf.mxu1  ;;  %v2058_v34 = vpop.f32.mrf.mxu0  ;;  %v3005_v44 = vmax.f32 %v2803_v1, %v2833_v59  ;;  %v1932_v1 = vadd.f32 %v3010_v54, %v3009_v36  ;;  %v3013_v32 = vmax.f32 %v3011_v15, %v3012_v50  ;;  %v2041_v8 = vadd.f32 %v3015_v6, %v3014_v0 }
 0x195   :  { %v1498_v46 = vmax.f32 %v1490_v43, 0.0  ;;  %v1476_v60 = vmax.f32 %v3004_v30, %v1468_v39  ;;  %v1439_v2 = vadd.f32 %v2056_v38, %v1278_v18  ;;  %v1947_v42 = vadd.f32 %v1946_v37, %v1945_v24  ;;  %v3016_v39 = vld [vmem:[#allocation5_spill] sm:$0xff]  ;;  %v3019_v30 = vld [vmem:[#allocation12_spill] sm:$0xff] }
 0x196   :  { %v1948_v16 = vpop.f32.mrf.mxu1  ;;  %v2060_v7 = vpop.f32.mrf.mxu0  ;;  %v2059_v10 = vadd.f32 %v2058_v34, %v2057_v17  ;;  %v1412_v58 = vadd.f32 %v2035_v25, %v1251_v29  ;;  %v3017_v29 = vld [vmem:[#allocation3_spill] sm:$0xff] }
 0x197   :  { %v1713_v13 = vpack.c.bf16 %v1498_v46, %v1497_v22  ;;  %v1469_v45 = vmax.f32 %v1407_v23, %v1439_v2  ;;  %v1283_v21 = vadd.f32 %v1947_v42, %v2779_v35  ;;  %v1491_v48 = vadd.f32 %v2900_v53, %v1476_v60  ;;  %v3018_v46 = vld [vmem:[#allocation8_spill] sm:$0xff] }
 0x198   :  { %v1949_v41 = vpop.f32.mrf.mxu1  ;;  %v2061_v26 = vpop.f32.mrf.mxu0  ;;  %v1420_v23 = vadd.f32 %v2041_v8, %v1259_v11  ;;  %v1262_v31 = vadd.f32 %v1932_v1, %v3017_v29  ;;  %v3020_v60 = vmax.f32 %v3018_v46, %v3019_v30 }
 0x199   :  { %1714 = vst [vmem:[%s2973_s3] sm:$0xff] %v1713_v13   ;;  %v1477_v47 = vmax.f32 %v3005_v44, %v1469_v45  ;;  %v1444_v35 = vadd.f32 %v2059_v10, %v1283_v21  ;;  %v1950_v3 = vadd.f32 %v1949_v41, %v1948_v16  ;;  %v2062_v20 = vadd.f32 %v2061_v26, %v2060_v7  ;;  %v3021_v16 = vld [vmem:[#allocation19_spill] sm:$0xff]  ;;  %v3022_v7 = vld [vmem:[#allocation21_spill] sm:$0xff]  ;;  %v3023_v10 = vld [vmem:[#allocation6_spill] sm:$0xff] }
 0x19a   :  { %v1951_v5 = vpop.f32.mrf.mxu1  ;;  %v2063_v40 = vpop.f32.mrf.mxu0  ;;  %v1499_v59 = vmax.f32 %v1491_v48, 0.0  ;;  %v2044_v13 = vadd.f32 %v3022_v7, %v3021_v16  ;;  %v3025_v44 = vld [vmem:[#allocation13_spill] sm:$0xff] }
 0x19b   :  { %v1492_v52 = vadd.f32 %v2900_v53, %v1477_v47  ;;  %v1470_v27 = vmax.f32 %v1412_v58, %v1444_v35  ;;  %v1286_v12 = vadd.f32 %v1950_v3, %v3007_v28  ;;  %v3024_v58 = vld [vmem:[#allocation9_spill] sm:$0xff] }
 0x19c   :  { %v1952_v56 = vpop.f32.mrf.mxu1  ;;  %v2064_v33 = vpop.f32.mrf.mxu0  ;;  %v1423_v48 = vadd.f32 %v2044_v13, %v1262_v31  ;;  %v3026_v47 = vmax.f32 %v3024_v58, %v3025_v44 }
 0x19d   :  { %v1500_v9 = vmax.f32 %v1492_v52, 0.0  ;;  %v1478_v19 = vmax.f32 %v3013_v32, %v1470_v27  ;;  %v1447_v4 = vadd.f32 %v2062_v20, %v1286_v12  ;;  %v1953_v49 = vadd.f32 %v1952_v56, %v1951_v5  ;;  %v3028_v52 = vld [vmem:[#allocation14_spill] sm:$0xff] }
 0x19e   :  { %v1954_v14 = vpop.f32.mrf.mxu1  ;;  %v2066_v24 = vpop.f32.mrf.mxu0  ;;  %v2065_v38 = vadd.f32 %v2064_v33, %v2063_v40  ;;  %v3027_v40 = vld [vmem:[#allocation10_spill] sm:$0xff] }
 0x19f   :  { %v1718_v17 = vpack.c.bf16 %v1500_v9, %v1499_v59  ;;  %v1471_v43 = vmax.f32 %v1415_v62, %v1447_v4  ;;  %v1291_v18 = vadd.f32 %v1953_v49, %v3016_v39  ;;  %v1493_v34 = vadd.f32 %v2900_v53, %v1478_v19 }
 0x1a0   :  { %v1955_v22 = vpop.f32.mrf.mxu1  ;;  %v2067_v37 = vpop.f32.mrf.mxu0  ;;  %v3029_v27 = vmax.f32 %v3027_v40, %v3028_v52 }
 0x1a1   :  { %1730 = vst [vmem:[%s2973_s3 + $0x8] sm:$0xff] %v1718_v17   ;;  %v1479_v2 = vmax.f32 %v3020_v60, %v1471_v43  ;;  %v1452_v42 = vadd.f32 %v2065_v38, %v1291_v18  ;;  %v1956_v25 = vadd.f32 %v1955_v22, %v1954_v14  ;;  %v2068_v61 = vadd.f32 %v2067_v37, %v2066_v24 }
 0x1a2   :  { %v1501_v41 = vmax.f32 %v1493_v34, 0.0 }
 0x1a3   :  { %v1494_v45 = vadd.f32 %v2900_v53, %v1479_v2  ;;  %v1472_v21 = vmax.f32 %v1420_v23, %v1452_v42  ;;  %v1294_v55 = vadd.f32 %v1956_v25, %v3023_v10 }
 0x1a5   :  { %v1502_v26 = vmax.f32 %v1494_v45, 0.0  ;;  %v1480_v35 = vmax.f32 %v3026_v47, %v1472_v21  ;;  %v1455_v3 = vadd.f32 %v2068_v61, %v1294_v55 }
 0x1a7   :  { %v1723_v51 = vpack.c.bf16 %v1502_v26, %v1501_v41  ;;  %v1473_v63 = vmax.f32 %v1423_v48, %v1455_v3  ;;  %v1495_v5 = vadd.f32 %v2900_v53, %v1480_v35 }
 0x1a9   :  { %1731 = vst [vmem:[%s2973_s3 + $0x10] sm:$0xff] %v1723_v51   ;;  %v1481_v28 = vmax.f32 %v3029_v27, %v1473_v63  ;;  %v1503_v20 = vmax.f32 %v1495_v5, 0.0 }
 0x1ab   :  { %v1496_v12 = vadd.f32 %v2900_v53, %v1481_v28 }
 0x1ad   :  { %v1504_v62 = vmax.f32 %v1496_v12, 0.0 }
 0x1af   :  { %v1728_v57 = vpack.c.bf16 %v1504_v62, %v1503_v20 }
 0x1b1   :  { %1732 = vst [vmem:[%s2973_s3 + $0x18] sm:$0xff] %v1728_v57  }

// kernel: classifier_forward.8
= control target key start
LH: loop header
LB: loop body
LE: loop exit
PB: predicated region body
PF: predicated region fallthrough
CT: control target
= control target key end

     0   :  { %s1245_s1 = inlined_call_operand.vmem [shape: bf16[512,128], index: 1, kind: input, shape index: {}]   ;;  %s1246_s0 = inlined_call_operand.vmem [shape: bf16[4,32,512], index: 0, kind: input, shape index: {}]   ;;  %s1247_s2 = inlined_call_operand.vmem [shape: f32[1,128], index: 2, kind: input, shape index: {}]   ;;  %s1248_s3 = inlined_call_operand.vmem [shape: bf16[32,128], index: 3, kind: output, shape index: {}]  }
   0x1   :  { %v920_v0 = vld [vmem:[%s1245_s1 + $0x78] sm:$0xff]   ;;  %v924_v4 = vld [vmem:[%s1245_s1 + $0x70] sm:$0xff]   ;;  %v928_v8 = vld [vmem:[%s1245_s1 + $0x68] sm:$0xff]  }
   0x2   :  { %v921_v1 = vld [vmem:[%s1245_s1 + $0xf8] sm:$0xff]   ;;  %792 = vmatprep.subr.bf16.mxu0 %v920_v0  ;;  %v925_v5 = vld [vmem:[%s1245_s1 + $0xf0] sm:$0xff]   ;;  %v929_v9 = vld [vmem:[%s1245_s1 + $0xe8] sm:$0xff]  }
   0x3   :  { %v922_v2 = vld [vmem:[%s1245_s1 + $0x38] sm:$0xff]   ;;  %856 = vmatprep.subr.bf16.mxu1 %v921_v1  ;;  %v926_v6 = vld [vmem:[%s1245_s1 + $0x30] sm:$0xff]   ;;  %v930_v10 = vld [vmem:[%s1245_s1 + $0x28] sm:$0xff]  }
   0x4   :  { %v923_v3 = vld [vmem:[%s1245_s1 + $0xb8] sm:$0xff]   ;;  %793 = vmatpush3.bf16.msra.mxu0 %v922_v2  ;;  %v927_v7 = vld [vmem:[%s1245_s1 + $0xb0] sm:$0xff]   ;;  %v931_v11 = vld [vmem:[%s1245_s1 + $0xa8] sm:$0xff]  }
   0x5   :  { %857 = vmatpush3.bf16.msra.mxu1 %v923_v3  ;;  %794 = vmatprep.subr.bf16.mxu0 %v924_v4  ;;  %v932_v12 = vld [vmem:[%s1245_s1 + $0x60] sm:$0xff]   ;;  %v936_v16 = vld [vmem:[%s1245_s1 + $0x58] sm:$0xff]   ;;  %v940_v20 = vld [vmem:[%s1245_s1 + $0x50] sm:$0xff]  }
   0x6   :  { %858 = vmatprep.subr.bf16.mxu1 %v925_v5  ;;  %v933_v13 = vld [vmem:[%s1245_s1 + $0xe0] sm:$0xff]   ;;  %v937_v17 = vld [vmem:[%s1245_s1 + $0xd8] sm:$0xff]   ;;  %v941_v21 = vld [vmem:[%s1245_s1 + $0xd0] sm:$0xff]  }
   0x7   :  { %v934_v14 = vld [vmem:[%s1245_s1 + $0x20] sm:$0xff]   ;;  %v938_v18 = vld [vmem:[%s1245_s1 + $0x18] sm:$0xff]   ;;  %v942_v22 = vld [vmem:[%s1245_s1 + $0x10] sm:$0xff]  }
   0x8   :  { %795 = vmatpush3.bf16.msra.mxu0 %v926_v6  ;;  %v935_v15 = vld [vmem:[%s1245_s1 + $0xa0] sm:$0xff]   ;;  %v939_v19 = vld [vmem:[%s1245_s1 + $0x98] sm:$0xff]   ;;  %v943_v23 = vld [vmem:[%s1245_s1 + $0x90] sm:$0xff]  }
   0x9   :  { %859 = vmatpush3.bf16.msra.mxu1 %v927_v7  ;;  %796 = vmatprep.subr.bf16.mxu0 %v928_v8  ;;  %v944_v24 = vld [vmem:[%s1245_s1 + $0x48] sm:$0xff]   ;;  %v948_v28 = vld [vmem:[%s1245_s1 + $0x40] sm:$0xff]  }
   0xa   :  { %860 = vmatprep.subr.bf16.mxu1 %v929_v9  ;;  %v945_v25 = vld [vmem:[%s1245_s1 + $0xc8] sm:$0xff]   ;;  %v949_v29 = vld [vmem:[%s1245_s1 + $0xc0] sm:$0xff]  }
   0xb   :  { %v946_v26 = vld [vmem:[%s1245_s1 + $0x8] sm:$0xff]   ;;  %v950_v30 = vld [vmem:[%s1245_s1] sm:$0xff]  }
   0xc   :  { %797 = vmatpush3.bf16.msra.mxu0 %v930_v10  ;;  %v947_v27 = vld [vmem:[%s1245_s1 + $0x88] sm:$0xff]   ;;  %v951_v31 = vld [vmem:[%s1245_s1 + $0x80] sm:$0xff]  }
   0xd   :  { %861 = vmatpush3.bf16.msra.mxu1 %v931_v11  ;;  %798 = vmatprep.subr.bf16.mxu0 %v932_v12  ;;  %v952_v32 = vld [vmem:[%s1246_s0] ss:$16 sps:$4 sm:$0xff]   ;;  %v954_v33 = vld [vmem:[%s1246_s0 + $0x4] ss:$16 sps:$4 sm:$0xff]   ;;  %v955_v34 = vld [vmem:[%s1246_s0 + $0x8] ss:$16 sps:$4 sm:$0xff]  }
   0xe   :  { %862 = vmatprep.subr.bf16.mxu1 %v933_v13  ;;  %v957_v35 = vld [vmem:[%s1246_s0 + $0xc] ss:$16 sps:$4 sm:$0xff]   ;;  %495 = vmatprep.mubr.bf16.mxu0 %v954_v33  ;;  %v958_v36 = vld [vmem:[%s1246_s0 + $0x24] ss:$16 sps:$4 sm:$0xff]   ;;  %v962_v38 = vld [vmem:[%s1246_s0 + $0x20] ss:$16 sps:$4 sm:$0xff]  }
   0xf   :  { %592 = vmatprep.mubr.bf16.mxu1 %v957_v35  ;;  %v960_v37 = vld [vmem:[%s1246_s0 + $0x2c] ss:$16 sps:$4 sm:$0xff]   ;;  %v963_v39 = vld [vmem:[%s1246_s0 + $0x28] ss:$16 sps:$4 sm:$0xff]   ;;  %v964_v40 = vld [vmem:[%s1246_s0 + $0x44] ss:$16 sps:$4 sm:$0xff]  }
  0x10   :  { %799 = vmatpush3.bf16.msra.mxu0 %v934_v14  ;;  %v966_v41 = vld [vmem:[%s1246_s0 + $0x4c] ss:$16 sps:$4 sm:$0xff]   ;;  %v968_v42 = vld [vmem:[%s1246_s0 + $0x40] ss:$16 sps:$4 sm:$0xff]   ;;  %v969_v43 = vld [vmem:[%s1246_s0 + $0x48] ss:$16 sps:$4 sm:$0xff]  }
  0x11   :  { %863 = vmatpush3.bf16.msra.mxu1 %v935_v15  ;;  %800 = vmatprep.subr.bf16.mxu0 %v936_v16  ;;  %v970_v44 = vld [vmem:[%s1246_s0 + $0x64] ss:$16 sps:$4 sm:$0xff]   ;;  %v972_v45 = vld [vmem:[%s1246_s0 + $0x6c] ss:$16 sps:$4 sm:$0xff]   ;;  %v974_v46 = vld [vmem:[%s1246_s0 + $0x60] ss:$16 sps:$4 sm:$0xff]  }
  0x12   :  { %864 = vmatprep.subr.bf16.mxu1 %v937_v17  ;;  %v975_v47 = vld [vmem:[%s1246_s0 + $0x68] ss:$16 sps:$4 sm:$0xff]   ;;  %v976_v48 = vld [vmem:[%s1246_s0 + $0x84] ss:$16 sps:$4 sm:$0xff]   ;;  %v978_v49 = vld [vmem:[%s1246_s0 + $0x8c] ss:$16 sps:$4 sm:$0xff]  }
  0x13   :  { %v980_v50 = vld [vmem:[%s1246_s0 + $0x80] ss:$16 sps:$4 sm:$0xff]   ;;  %v981_v51 = vld [vmem:[%s1246_s0 + $0x88] ss:$16 sps:$4 sm:$0xff]   ;;  %v982_v52 = vld [vmem:[%s1246_s0 + $0xa4] ss:$16 sps:$4 sm:$0xff]  }
  0x14   :  { %801 = vmatpush3.bf16.msra.mxu0 %v938_v18  ;;  %v984_v53 = vld [vmem:[%s1246_s0 + $0xac] ss:$16 sps:$4 sm:$0xff]   ;;  %v986_v54 = vld [vmem:[%s1246_s0 + $0xa0] ss:$16 sps:$4 sm:$0xff]   ;;  %v987_v55 = vld [vmem:[%s1246_s0 + $0xa8] ss:$16 sps:$4 sm:$0xff]  }
  0x15   :  { %865 = vmatpush3.bf16.msra.mxu1 %v939_v19  ;;  %802 = vmatprep.subr.bf16.mxu0 %v940_v20  ;;  %v988_v56 = vld [vmem:[%s1246_s0 + $0xc4] ss:$16 sps:$4 sm:$0xff]   ;;  %v990_v57 = vld [vmem:[%s1246_s0 + $0xcc] ss:$16 sps:$4 sm:$0xff]   ;;  %v992_v58 = vld [vmem:[%s1246_s0 + $0xc0] ss:$16 sps:$4 sm:$0xff]  }
  0x16   :  { %866 = vmatprep.subr.bf16.mxu1 %v941_v21  ;;  %v993_v59 = vld [vmem:[%s1246_s0 + $0xc8] ss:$16 sps:$4 sm:$0xff]   ;;  %v994_v60 = vld [vmem:[%s1246_s0 + $0xe4] ss:$16 sps:$4 sm:$0xff]   ;;  %v996_v61 = vld [vmem:[%s1246_s0 + $0xec] ss:$16 sps:$4 sm:$0xff]  }
  0x17   :  { %v998_v62 = vld [vmem:[%s1246_s0 + $0xe0] ss:$16 sps:$4 sm:$0xff]   ;;  %v999_v63 = vld [vmem:[%s1246_s0 + $0xe8] ss:$16 sps:$4 sm:$0xff]  }
  0x18   :  { %803 = vmatpush3.bf16.msra.mxu0 %v942_v22 }
  0x19   :  { %867 = vmatpush3.bf16.msra.mxu1 %v943_v23  ;;  %804 = vmatprep.subr.bf16.mxu0 %v944_v24 }
  0x1a   :  { %868 = vmatprep.subr.bf16.mxu1 %v945_v25 }
  0x1c   :  { %805 = vmatpush3.bf16.msra.mxu0 %v946_v26 }
  0x1d   :  { %869 = vmatpush3.bf16.msra.mxu1 %v947_v27  ;;  %806 = vmatprep.subr.bf16.mxu0 %v948_v28 }
  0x1e   :  { %870 = vmatprep.subr.bf16.mxu1 %v949_v29 }
  0x20   :  { %807 = vmatpush3.bf16.msra.mxu0 %v950_v30 }
  0x21   :  { %871 = vmatpush3.bf16.msra.mxu1 %v951_v31 }
  0x23   :  { %496 = vmatmul.mubr.bf16.vlgmr.msra.gmra.mxu0 %v952_v32 }
  0x24   :  { %593 = vmatmul.mubr.bf16.vlgmr.msra.gmra.mxu1 %v955_v34  ;;  %503 = vmatprep.mubr.bf16.mxu0 %v958_v36 }
  0x25   :  { %600 = vmatprep.mubr.bf16.mxu1 %v960_v37 }
  0x2b   :  { %504 = vmatmul.mubr.bf16.gmra.mxu0 %v962_v38 }
  0x2c   :  { %601 = vmatmul.mubr.bf16.gmra.mxu1 %v963_v39  ;;  %511 = vmatprep.mubr.bf16.mxu0 %v964_v40 }
  0x2d   :  { %608 = vmatprep.mubr.bf16.mxu1 %v966_v41 }
  0x33   :  { %512 = vmatmul.mubr.bf16.gmra.mxu0 %v968_v42 }
  0x34   :  { %609 = vmatmul.mubr.bf16.gmra.mxu1 %v969_v43  ;;  %519 = vmatprep.mubr.bf16.mxu0 %v970_v44 }
  0x35   :  { %616 = vmatprep.mubr.bf16.mxu1 %v972_v45 }
  0x3b   :  { %520 = vmatmul.mubr.bf16.gmra.mxu0 %v974_v46 }
  0x3c   :  { %617 = vmatmul.mubr.bf16.gmra.mxu1 %v975_v47  ;;  %527 = vmatprep.mubr.bf16.mxu0 %v976_v48 }
  0x3d   :  { %624 = vmatprep.mubr.bf16.mxu1 %v978_v49 }
  0x43   :  { %528 = vmatmul.mubr.bf16.gmra.mxu0 %v980_v50 }
  0x44   :  { %625 = vmatmul.mubr.bf16.gmra.mxu1 %v981_v51  ;;  %535 = vmatprep.mubr.bf16.mxu0 %v982_v52 }
  0x45   :  { %632 = vmatprep.mubr.bf16.mxu1 %v984_v53 }
  0x4b   :  { %536 = vmatmul.mubr.bf16.gmra.mxu0 %v986_v54 }
  0x4c   :  { %633 = vmatmul.mubr.bf16.gmra.mxu1 %v987_v55  ;;  %543 = vmatprep.mubr.bf16.mxu0 %v988_v56 }
  0x4d   :  { %640 = vmatprep.mubr.bf16.mxu1 %v990_v57 }
  0x53   :  { %544 = vmatmul.mubr.bf16.gmra.mxu0 %v992_v58 }
  0x54   :  { %641 = vmatmul.mubr.bf16.gmra.mxu1 %v993_v59  ;;  %551 = vmatprep.mubr.bf16.mxu0 %v994_v60 }
  0x55   :  { %648 = vmatprep.mubr.bf16.mxu1 %v996_v61 }
  0x5b   :  { %552 = vmatmul.mubr.bf16.gmra.mxu0 %v998_v62 }
  0x5c   :  { %649 = vmatmul.mubr.bf16.gmra.mxu1 %v999_v63 }
  0xe3   :  { %v808_v0 = vpop.f32.mrf.mxu0 }
  0xe4   :  { %v872_v1 = vpop.f32.mrf.mxu1 }
  0xe5   :  { %v809_v2 = vpop.f32.mrf.mxu0 }
  0xe6   :  { %v873_v3 = vpop.f32.mrf.mxu1  ;;  %v810_v48 = vadd.f32 %v809_v2, %v808_v0 }
  0xe7   :  { %v811_v4 = vpop.f32.mrf.mxu0  ;;  %v874_v49 = vadd.f32 %v873_v3, %v872_v1 }
  0xe8   :  { %v875_v5 = vpop.f32.mrf.mxu1 }
  0xe9   :  { %v812_v6 = vpop.f32.mrf.mxu0  ;;  %v595_v61 = vadd.f32 %v874_v49, %v810_v48 }
  0xea   :  { %v876_v7 = vpop.f32.mrf.mxu1 }
  0xeb   :  { %v814_v8 = vpop.f32.mrf.mxu0 }
  0xec   :  { %v878_v9 = vpop.f32.mrf.mxu1 }
  0xed   :  { %v815_v10 = vpop.f32.mrf.mxu0 }
  0xee   :  { %v879_v11 = vpop.f32.mrf.mxu1  ;;  %v816_v2 = vadd.f32 %v815_v10, %v814_v8 }
  0xef   :  { %v1212_v12 = vpop.f32.mrf.mxu0  ;;  %v880_v3 = vadd.f32 %v879_v11, %v878_v9 }
  0xf0   :  { %1249 = vst [vmem:[#allocation2_spill] sm:$0xff] %v1212_v12  ;;  %v1214_v13 = vpop.f32.mrf.mxu1 }
  0xf1   :  { %1250 = vst [vmem:[#allocation3_spill] sm:$0xff] %v1214_v13  ;;  %v1216_v14 = vpop.f32.mrf.mxu0  ;;  %v813_v13 = vadd.f32 %v812_v6, %v811_v4  ;;  %v603_v10 = vadd.f32 %v880_v3, %v816_v2 }
  0xf2   :  { %1251 = vst [vmem:[#allocation4_spill] sm:$0xff] %v1216_v14  ;;  %v1218_v15 = vpop.f32.mrf.mxu1  ;;  %v877_v14 = vadd.f32 %v876_v7, %v875_v5 }
  0xf3   :  { %1252 = vst [vmem:[#allocation5_spill] sm:$0xff] %v1218_v15  ;;  %v820_v16 = vpop.f32.mrf.mxu0 }
  0xf4   :  { %v884_v17 = vpop.f32.mrf.mxu1  ;;  %v598_v48 = vadd.f32 %v877_v14, %v813_v13 }
  0xf5   :  { %v821_v18 = vpop.f32.mrf.mxu0 }
  0xf6   :  { %v885_v19 = vpop.f32.mrf.mxu1  ;;  %v822_v50 = vadd.f32 %v821_v18, %v820_v16 }
  0xf7   :  { %v823_v20 = vpop.f32.mrf.mxu0  ;;  %v886_v51 = vadd.f32 %v885_v19, %v884_v17 }
  0xf8   :  { %v887_v21 = vpop.f32.mrf.mxu1 }
  0xf9   :  { %v824_v22 = vpop.f32.mrf.mxu0  ;;  %v611_v62 = vadd.f32 %v886_v51, %v822_v50 }
  0xfa   :  { %v888_v23 = vpop.f32.mrf.mxu1  ;;  %v825_v57 = vadd.f32 %v824_v22, %v823_v20 }
  0xfb   :  { %v826_v24 = vpop.f32.mrf.mxu0  ;;  %v889_v58 = vadd.f32 %v888_v23, %v887_v21  ;;  %v657_v23 = vmax.f32 %v595_v61, %v611_v62 }
  0xfc   :  { %v890_v25 = vpop.f32.mrf.mxu1 }
  0xfd   :  { %v827_v26 = vpop.f32.mrf.mxu0  ;;  %v614_v19 = vadd.f32 %v889_v58, %v825_v57 }
  0xfe   :  { %v891_v27 = vpop.f32.mrf.mxu1 }
  0xff   :  { %v1220_v28 = vpop.f32.mrf.mxu0  ;;  %v892_v20 = vadd.f32 %v891_v27, %v890_v25  ;;  %v658_v11 = vmax.f32 %v598_v48, %v614_v19 }
 0x100   :  { %v1222_v29 = vpop.f32.mrf.mxu1 }
 0x101   :  { %v1224_v30 = vpop.f32.mrf.mxu0 }
 0x102   :  { %v1226_v31 = vpop.f32.mrf.mxu1 }
 0x103   :  { %v832_v32 = vpop.f32.mrf.mxu0 }
 0x104   :  { %v896_v33 = vpop.f32.mrf.mxu1 }
 0x105   :  { %v833_v34 = vpop.f32.mrf.mxu0 }
 0x106   :  { %v897_v35 = vpop.f32.mrf.mxu1  ;;  %v834_v54 = vadd.f32 %v833_v34, %v832_v32  ;;  %v828_v32 = vadd.f32 %v827_v26, %v826_v24  ;;  %v831_v26 = vadd.f32 %v1224_v30, %v1220_v28 }
 0x107   :  { %v835_v36 = vpop.f32.mrf.mxu0  ;;  %v898_v55 = vadd.f32 %v897_v35, %v896_v33 }
 0x108   :  { %v899_v37 = vpop.f32.mrf.mxu1 }
 0x109   :  { %v836_v38 = vpop.f32.mrf.mxu0  ;;  %v627_v16 = vadd.f32 %v898_v55, %v834_v54 }
 0x10a   :  { %v900_v39 = vpop.f32.mrf.mxu1  ;;  %v837_v12 = vadd.f32 %v836_v38, %v835_v36  ;;  %v1253_v38 = vld [vmem:[#allocation2_spill] sm:$0xff] }
 0x10b   :  { %v838_v40 = vpop.f32.mrf.mxu0  ;;  %v901_v0 = vadd.f32 %v900_v39, %v899_v37  ;;  %v619_v37 = vadd.f32 %v892_v20, %v828_v32  ;;  %v1254_v39 = vld [vmem:[#allocation4_spill] sm:$0xff] }
 0x10c   :  { %v902_v41 = vpop.f32.mrf.mxu1 }
 0x10d   :  { %v839_v42 = vpop.f32.mrf.mxu0  ;;  %v630_v4 = vadd.f32 %v901_v0, %v837_v12  ;;  %v895_v12 = vadd.f32 %v1226_v31, %v1222_v29  ;;  %v659_v30 = vmax.f32 %v603_v10, %v619_v37 }
 0x10e   :  { %v903_v43 = vpop.f32.mrf.mxu1  ;;  %v840_v6 = vadd.f32 %v839_v42, %v838_v40  ;;  %v819_v40 = vadd.f32 %v1254_v39, %v1253_v38  ;;  %v1256_v42 = vld [vmem:[#allocation5_spill] sm:$0xff] }
 0x10f   :  { %v841_v44 = vpop.f32.mrf.mxu0  ;;  %v904_v7 = vadd.f32 %v903_v43, %v902_v41  ;;  %v1255_v41 = vld [vmem:[#allocation3_spill] sm:$0xff]  ;;  %v622_v31 = vadd.f32 %v895_v12, %v831_v26 }
 0x110   :  { %v905_v45 = vpop.f32.mrf.mxu1  ;;  %v883_v43 = vadd.f32 %v1256_v42, %v1255_v41 }
 0x111   :  { %v842_v46 = vpop.f32.mrf.mxu0 }
 0x112   :  { %v906_v47 = vpop.f32.mrf.mxu1  ;;  %v843_v49 = vadd.f32 %v842_v46, %v841_v44 }
 0x113   :  { %v844_v52 = vpop.f32.mrf.mxu0  ;;  %v907_v50 = vadd.f32 %v906_v47, %v905_v45 }
 0x114   :  { %v908_v53 = vpop.f32.mrf.mxu1 }
 0x115   :  { %v845_v56 = vpop.f32.mrf.mxu0  ;;  %v638_v61 = vadd.f32 %v907_v50, %v843_v49 }
 0x116   :  { %v846_v59 = vadd.f32 %v845_v56, %v844_v52  ;;  %v909_v60 = vpop.f32.mrf.mxu1  ;;  %v635_v52 = vadd.f32 %v904_v7, %v840_v6 }
 0x117   :  { %v910_v63 = vadd.f32 %v909_v60, %v908_v53  ;;  %v847_v15 = vpop.f32.mrf.mxu0  ;;  %v606_v60 = vadd.f32 %v883_v43, %v819_v40 }
 0x118   :  { %v911_v1 = vpop.f32.mrf.mxu1 }
 0x119   :  { %v643_v17 = vadd.f32 %v910_v63, %v846_v59  ;;  %v848_v18 = vpop.f32.mrf.mxu0  ;;  %v660_v45 = vmax.f32 %v606_v60, %v622_v31 }
 0x11a   :  { %v849_v21 = vadd.f32 %v848_v18, %v847_v15  ;;  %v912_v22 = vpop.f32.mrf.mxu1  ;;  %v772_v15 = vld [vmem:[%s1247_s2] ss:$0 sm:$0xff] }
 0x11b   :  { %v661_v33 = vmax.f32 %v627_v16, %v643_v17  ;;  %v913_v34 = vadd.f32 %v912_v22, %v911_v1  ;;  %v850_v35 = vpop.f32.mrf.mxu0 }
 0x11c   :  { %v914_v5 = vpop.f32.mrf.mxu1 }
 0x11d   :  { %v665_v36 = vmax.f32 %v657_v23, %v661_v33  ;;  %v646_v8 = vadd.f32 %v913_v34, %v849_v21  ;;  %v851_v9 = vpop.f32.mrf.mxu0 }
 0x11e   :  { %v852_v24 = vadd.f32 %v851_v9, %v850_v35  ;;  %v915_v25 = vpop.f32.mrf.mxu1 }
 0x11f   :  { %v662_v13 = vmax.f32 %v630_v4, %v646_v8  ;;  %v916_v14 = vadd.f32 %v915_v25, %v914_v5  ;;  %v853_v27 = vpop.f32.mrf.mxu0  ;;  %v676_v53 = vadd.f32 %v772_v15, %v665_v36 }
 0x120   :  { %v917_v51 = vpop.f32.mrf.mxu1 }
 0x121   :  { %v666_v54 = vmax.f32 %v658_v11, %v662_v13  ;;  %v651_v55 = vadd.f32 %v916_v14, %v852_v24  ;;  %v854_v28 = vpop.f32.mrf.mxu0  ;;  %v680_v62 = vmax.f32 %v676_v53, 0.0 }
 0x122   :  { %v855_v56 = vadd.f32 %v854_v28, %v853_v27  ;;  %v918_v29 = vpop.f32.mrf.mxu1 }
 0x123   :  { %v677_v57 = vadd.f32 %v772_v15, %v666_v54  ;;  %v663_v58 = vmax.f32 %v635_v52, %v651_v55  ;;  %v919_v59 = vadd.f32 %v918_v29, %v917_v51 }
 0x125   :  { %v681_v63 = vmax.f32 %v677_v57, 0.0  ;;  %v667_v0 = vmax.f32 %v659_v30, %v663_v58  ;;  %v654_v44 = vadd.f32 %v919_v59, %v855_v56 }
 0x127   :  { %v784_v46 = vpack.c.bf16 %v681_v63, %v680_v62  ;;  %v664_v47 = vmax.f32 %v638_v61, %v654_v44  ;;  %v678_v1 = vadd.f32 %v772_v15, %v667_v0 }
 0x129   :  { %785 = vst [vmem:[%s1248_s3] sm:$0xff] %v784_v46   ;;  %v668_v2 = vmax.f32 %v660_v45, %v664_v47  ;;  %v682_v16 = vmax.f32 %v678_v1, 0.0 }
 0x12b   :  { %v679_v3 = vadd.f32 %v772_v15, %v668_v2 }
 0x12d   :  { %v683_v17 = vmax.f32 %v679_v3, 0.0 }
 0x12f   :  { %v789_v18 = vpack.c.bf16 %v683_v17, %v682_v16 }
 0x131   :  { %791 = vst [vmem:[%s1248_s3 + $0x8] sm:$0xff] %v789_v18  }

// kernel: classifier_forward.9
= control target key start
LH: loop header
LB: loop body
LE: loop exit
PB: predicated region body
PF: predicated region fallthrough
CT: control target
= control target key end

     0   :  { %v466_v1 = vmov 0.0   ;;  %vm467_vm0 = vmmov 0   ;;  %s597_s1 = inlined_call_operand.vmem [shape: bf16[256,128], index: 1, kind: input, shape index: {}]   ;;  %s598_s0 = inlined_call_operand.vmem [shape: bf16[16,256], index: 0, kind: input, shape index: {}]   ;;  %s599_s3 = inlined_call_operand.vmem [shape: bf16[128,128], index: 3, kind: input, shape index: {}]   ;;  %s600_s2 = inlined_call_operand.vmem [shape: f32[1,128], index: 2, kind: input, shape index: {}]   ;;  %s601_s4 = inlined_call_operand.vmem [shape: f32[1,128], index: 4, kind: input, shape index: {}]   ;;  %s602_s5 = inlined_call_operand.vmem [shape: f32[16,128], index: 5, kind: output, shape index: {}]  }
   0x1   :  { %v431_v0 = vld [vmem:[%s597_s1 + $0x78] sm:$0xff]   ;;  %409 = vmatprep.subr.bf16.mxu1 %v466_v1  ;;  %v433_v3 = vld [vmem:[%s597_s1 + $0x70] sm:$0xff]   ;;  %v435_v5 = vld [vmem:[%s597_s1 + $0x68] sm:$0xff]   ;;  %425 = vmatprep.mubr.msk.bf16.mxu1 %vm467_vm0, %v466_v1 }
   0x2   :  { %v432_v2 = vld [vmem:[%s597_s1 + $0x38] sm:$0xff]   ;;  %378 = vmatprep.subr.bf16.mxu0 %v431_v0  ;;  %v434_v4 = vld [vmem:[%s597_s1 + $0x30] sm:$0xff]   ;;  %v436_v6 = vld [vmem:[%s597_s1 + $0x28] sm:$0xff]  }
   0x3   :  { %379 = vmatpush3.bf16.msra.mxu0 %v432_v2  ;;  %v437_v7 = vld [vmem:[%s597_s1 + $0x60] sm:$0xff]   ;;  %v439_v9 = vld [vmem:[%s597_s1 + $0x58] sm:$0xff]   ;;  %v441_v11 = vld [vmem:[%s597_s1 + $0x50] sm:$0xff]  }
   0x4   :  { %380 = vmatprep.subr.bf16.mxu0 %v433_v3  ;;  %v438_v8 = vld [vmem:[%s597_s1 + $0x20] sm:$0xff]   ;;  %v440_v10 = vld [vmem:[%s597_s1 + $0x18] sm:$0xff]   ;;  %v442_v12 = vld [vmem:[%s597_s1 + $0x10] sm:$0xff]  }
   0x5   :  { %v449_v13 = vld [vmem:[%s598_s0 + $0x4] ss:$8 sps:$4 sm:$0xff]   ;;  %v450_v14 = vld [vmem:[%s599_s3 + $0x38] sm:$0xff]   ;;  %v451_v16 = vld [vmem:[%s599_s3 + $0x30] sm:$0xff]  }
   0x6   :  { %v443_v15 = vld [vmem:[%s597_s1 + $0x48] sm:$0xff]   ;;  %200 = vmatprep.mubr.bf16.mxu0 %v449_v13  ;;  %410 = vmatpush3.bf16.msra.mxu1 %v450_v14  ;;  %v445_v18 = vld [vmem:[%s597_s1 + $0x40] sm:$0xff]   ;;  %v454_v23 = vld [vmem:[%s599_s3 + $0x18] sm:$0xff]  }
   0x7   :  { %381 = vmatpush3.bf16.msra.mxu0 %v434_v4  ;;  %v444_v17 = vld [vmem:[%s597_s1 + $0x8] sm:$0xff]   ;;  %411 = vmatprep.subr.bf16.mxu1 %v466_v1  ;;  %v446_v20 = vld [vmem:[%s597_s1] sm:$0xff]   ;;  %v455_v24 = vld [vmem:[%s599_s3 + $0x10] sm:$0xff]  }
   0x8   :  { %382 = vmatprep.subr.bf16.mxu0 %v435_v5  ;;  %v452_v19 = vld [vmem:[%s599_s3 + $0x28] sm:$0xff]   ;;  %v453_v21 = vld [vmem:[%s599_s3 + $0x20] sm:$0xff]  }
   0x9   :  { %v447_v22 = vld [vmem:[%s598_s0] ss:$8 sps:$4 sm:$0xff]  }
   0xa   :  { %412 = vmatpush3.bf16.msra.mxu1 %v451_v16  ;;  %v456_v25 = vld [vmem:[%s599_s3 + $0x8] sm:$0xff]   ;;  %v457_v26 = vld [vmem:[%s599_s3] sm:$0xff]  }
   0xb   :  { %383 = vmatpush3.bf16.msra.mxu0 %v436_v6  ;;  %413 = vmatprep.subr.bf16.mxu1 %v466_v1  ;;  %v350_v30 = vld [vmem:[%s600_s2] ss:$0 sm:$0xff] }
   0xc   :  { %384 = vmatprep.subr.bf16.mxu0 %v437_v7  ;;  %v369_v39 = vld [vmem:[%s601_s4] ss:$0 sm:$0xff] }
   0xe   :  { %414 = vmatpush3.bf16.msra.mxu1 %v452_v19 }
   0xf   :  { %385 = vmatpush3.bf16.msra.mxu0 %v438_v8  ;;  %415 = vmatprep.subr.bf16.mxu1 %v466_v1 }
  0x10   :  { %386 = vmatprep.subr.bf16.mxu0 %v439_v9 }
  0x12   :  { %416 = vmatpush3.bf16.msra.mxu1 %v453_v21 }
  0x13   :  { %387 = vmatpush3.bf16.msra.mxu0 %v440_v10  ;;  %417 = vmatprep.subr.bf16.mxu1 %v466_v1 }
  0x14   :  { %388 = vmatprep.subr.bf16.mxu0 %v441_v11 }
  0x16   :  { %418 = vmatpush3.bf16.msra.mxu1 %v454_v23 }
  0x17   :  { %389 = vmatpush3.bf16.msra.mxu0 %v442_v12  ;;  %419 = vmatprep.subr.bf16.mxu1 %v466_v1 }
  0x18   :  { %390 = vmatprep.subr.bf16.mxu0 %v443_v15 }
  0x1a   :  { %420 = vmatpush3.bf16.msra.mxu1 %v455_v24 }
  0x1b   :  { %391 = vmatpush3.bf16.msra.mxu0 %v444_v17  ;;  %421 = vmatprep.subr.bf16.mxu1 %v466_v1 }
  0x1c   :  { %392 = vmatprep.subr.bf16.mxu0 %v445_v18 }
  0x1e   :  { %422 = vmatpush3.bf16.msra.mxu1 %v456_v25 }
  0x1f   :  { %393 = vmatpush3.bf16.msra.mxu0 %v446_v20  ;;  %423 = vmatprep.subr.bf16.mxu1 %v466_v1 }
  0x22   :  { %201 = vmatmul.mubr.bf16.vlgmr.msra.gmra.mxu0 %v447_v22  ;;  %424 = vmatpush3.bf16.msra.mxu1 %v457_v26 }
  0xe2   :  { %v394_v27 = vpop.f32.mrf.mxu0 }
  0xe4   :  { %v395_v28 = vpop.f32.mrf.mxu0 }
  0xe5   :  { %v396_v29 = vadd.f32 %v395_v28, %v394_v27 }
  0xe6   :  { %v397_v31 = vpop.f32.mrf.mxu0 }
  0xe7   :  { %v203_v33 = vadd.f32 %v396_v29, %v350_v30 }
  0xe8   :  { %v398_v32 = vpop.f32.mrf.mxu0 }
  0xe9   :  { %v399_v34 = vadd.f32 %v398_v32, %v397_v31  ;;  %v209_v36 = vmax.f32 %v203_v33, 0.0 }
  0xeb   :  { %v206_v35 = vadd.f32 %v399_v34, %v350_v30 }
  0xed   :  { %v210_v37 = vmax.f32 %v206_v35, 0.0 }
  0xef   :  { %v211_v38 = vpack.c.bf16 %v210_v37, %v209_v36 }
  0xf1   :  { %426 = vmatmul.mubr.bf16.vlgmr.msra.gmra.mxu1 %v211_v38 }
 0x1b1   :  { %v317_v40 = vpop.f32.mrf.mxu1 }
 0x1b2   :  { %v318_v41 = vadd.f32 %v369_v39, %v317_v40 }
 0x1b3   :  { %v427_v42 = vpop.f32.mrf.mxu1 }
 0x1b4   :  { %324 = vmax.xlane.f32.xlu0 %v318_v41 }
 0x1b5   :  { %v320_v43 = vpop.f32.mrf.mxu1 }
 0x1b6   :  { %v321_v44 = vadd.f32 %v369_v39, %v320_v43 }
 0x1b7   :  { %v428_v45 = vpop.f32.mrf.mxu1 }
 0x1b8   :  { %326 = vmax.xlane.f32.xlu0 %v321_v44 }
 0x23d   :  { %v325_v46 = vpop.xlane.xlu0 %324 }
 0x23e   :  { %v328_v47 = vsub.f32 %v318_v41, %v325_v46 }
 0x240   :  { %v330_v48 = vmul.f32 1.442695, %v328_v47 }
 0x241   :  { %v327_v49 = vpop.xlane.xlu0 %326 }
 0x242   :  { %v329_v50 = vsub.f32 %v321_v44, %v327_v49  ;;  %458 = vpow2.f32 %v330_v48 }
 0x244   :  { %v332_v51 = vmul.f32 1.442695, %v329_v50 }
 0x246   :  { %460 = vpow2.f32 %v332_v51 }
 0x24f   :  { %v459_v52 = vpop.eup %458 }
 0x250   :  { %334 = vadd.xlane.f32.xlu1 %v459_v52 }
 0x253   :  { %v461_v53 = vpop.eup %460 }
 0x254   :  { %336 = vadd.xlane.f32.xlu1 %v461_v53 }
 0x2d9   :  { %v335_v54 = vpop.xlane.xlu1 %334 }
 0x2da   :  { %462 = vlog2.f32 %v335_v54 }
 0x2dd   :  { %v337_v55 = vpop.xlane.xlu1 %336 }
 0x2de   :  { %464 = vlog2.f32 %v337_v55 }
 0x2e7   :  { %v463_v56 = vpop.eup %462 }
 0x2e8   :  { %v339_v57 = vmul.f32 0.6931472, %v463_v56 }
 0x2ea   :  { %v342_v58 = vsub.f32 %v328_v47, %v339_v57 }
 0x2eb   :  { %v465_v59 = vpop.eup %464 }
 0x2ec   :  { %344 = vst [vmem:[%s602_s5] sm:$0xff] %v342_v58  ;;  %v341_v60 = vmul.f32 0.6931472, %v465_v59 }
 0x2ee   :  { %v343_v61 = vsub.f32 %v329_v50, %v341_v60 }
 0x2f0   :  { %345 = vst [vmem:[%s602_s5 + $0x8] sm:$0xff] %v343_v61 }

</bundles_post_ra>
